<compile_context>
chip_gen: v7x
topology: tpu7x:2x2x1
jax: 0.10.0
libtpu: 0.0.40
codegen_flags: <defaults>
</compile_context>

<pallas_src>
import functools

import jax
import jax.numpy as jnp
import numpy as np
from jax import lax
from jax.experimental import pallas as pl
from jax.experimental.pallas import tpu as pltpu


def _convlstm_chunk_kernel(k, cout, width, unroll_steps,
                           mask_ref, gx_ref, wh_ref, out_ref,
                           h_sc, c_sc, patch_sc):
    """One (batch-block, time-chunk) step of the ConvLSTM recurrence.

    mask_ref : (k*k*Cout, N)      f32 'same'-padding validity masks (N = B_blk*H*W)
    gx_ref   : (Tc, 4*Cout, N)    Conv(x_t)+b gate pre-activations (compute dtype)
    wh_ref   : (4*Cout, k*k*Cout) hidden->gates weights (compute dtype), gate
                                  order [i, f, o, g]
    out_ref  : (Tc, Cout, N)      hidden states H_t (f32)
    h_sc,c_sc: (Cout, N)          persistent f32 carry across time chunks
    patch_sc : (k*k*Cout, N)      f32 scratch for the rolled "im2col" taps
    """
    p = (k - 1) // 2
    t_chunk = gx_ref.shape[0]
    n_lanes = mask_ref.shape[1]

    # Zero-init the carry at the first time chunk of each batch block.
    @pl.when(pl.program_id(1) == 0)
    def _():
        h_sc[...] = jnp.zeros_like(h_sc)
        c_sc[...] = jnp.zeros_like(c_sc)

    wh_mat = wh_ref[...]              # (4*Cout, k*k*Cout)
    masks = mask_ref[...]             # (k*k*Cout, N) f32
    cdt = wh_mat.dtype                # bf16 (default) or f32

    def step(t, carry):
        h, c = carry                  # (Cout, N) f32, pixels-in-lanes

        # Build the k*k taps of h_{t-1} with XLU lane rolls; slice-store each
        # (Cout, N) piece into the reused scratch (sublane-aligned, full-lane).
        # patch[(dy,dx,cin), b*HW + y*W + x] = h[cin, src] (0 where padded).
        for idx in range(k * k):
            dy, dx = idx // k, idx % k
            shift = ((p - dy) * width + (p - dx)) % n_lanes
            rolled = h if shift == 0 else pltpu.roll(h, shift, axis=1)
            patch_sc[idx * cout:(idx + 1) * cout, :] = rolled

        # One fused mask multiply + cast to the MXU input dtype.
        patches = (patch_sc[...] * masks).astype(cdt)     # (k*k*Cout, N)

        # Single deep matmul for the whole hidden-path conv; gx already holds
        # Conv(x_t) + bias.  f32 accumulation.
        gates = gx_ref[t].astype(jnp.float32) + jnp.dot(
            wh_mat, patches, preferred_element_type=jnp.float32)

        # Gate order is [i, f, o, g]: one sigmoid over (3*Cout, N), one tanh.
        sig = jax.nn.sigmoid(gates[:3 * cout])
        i_g = sig[0 * cout:1 * cout]
        f_g = sig[1 * cout:2 * cout]
        o_g = sig[2 * cout:3 * cout]
        g_g = jnp.tanh(gates[3 * cout:4 * cout])

        c_new = f_g * c + i_g * g_g
        h_new = o_g * jnp.tanh(c_new)

        out_ref[t] = h_new.astype(out_ref.dtype)
        return h_new, c_new

    h_fin, c_fin = lax.fori_loop(0, t_chunk, step, (h_sc[...], c_sc[...]),
                                 unroll=unroll_steps)
    h_sc[...] = h_fin
    c_sc[...] = c_fin


def conv_recurrent_layer_lstm(x, wx, wh, b, kernel_size, *,
                              compute_dtype=jnp.bfloat16,
                              batch_block=None, t_chunk=None, unroll=4):
    """ConvLSTM sequence forward.

    x : (B, C_in, T, H, W)  (PyTorch layout).  Returns (B, C_out, T, H, W) f32.
    wx: (k, k, C_in, 4*C_out) HWIO, wh: (k, k, C_out, 4*C_out) HWIO, b: (4*C_out,)
    Gate channel order of wx/wh/b is [i, f, g, o].

    compute_dtype: dtype of the MXU inputs and of gx in HBM (bf16 default,
                   f32 for bit-accurate-vs-reference numerics).
    batch_block  : batch elements folded into the lane axis per grid step.
                   None -> whole batch (best on single-TC v5e/v6e); on v7x use
                   ceil(B / 2) so both TensorCores get a batch block.
    t_chunk      : time steps per grid step (bounds VMEM; carry lives in
                   persistent VMEM scratch between chunks).
    """
    B, Cin, T, H, W = x.shape
    Cout = wh.shape[2]
    k = kernel_size
    assert k % 2 == 1, "roll+mask 'same' padding assumes odd kernel_size"
    assert wx.shape == (k, k, Cin, 4 * Cout) and wh.shape == (k, k, Cout, 4 * Cout)
    p = (k - 1) // 2
    HW = H * W

    b_blk = B if batch_block is None else max(1, min(int(batch_block), B))
    nb = -(-B // b_blk)
    B_pad = nb * b_blk
    if t_chunk is None:
        t_chunk = min(T, 8)
    t_chunk = max(1, min(int(t_chunk), T))
    nt = -(-T // t_chunk)
    T_pad = nt * t_chunk
    n_lanes = b_blk * HW
    unroll_steps = max(1, min(int(unroll), t_chunk))

    # ---- Gate reorder [i, f, g, o] -> [i, f, o, g] (weight-prep time).
    perm = np.concatenate([np.arange(0, Cout), np.arange(Cout, 2 * Cout),
                           np.arange(3 * Cout, 4 * Cout),
                           np.arange(2 * Cout, 3 * Cout)])
    wx_p = jnp.asarray(wx)[..., perm]
    wh_p = jnp.asarray(wh)[..., perm]
    b_p = jnp.asarray(b)[perm]

    # ---- Non-recurrent input path: Conv(x_t) + b for all timesteps at once,
    # emitting NCHW directly so no post-conv transpose of the big gx tensor.
    x_f = jnp.transpose(x, (0, 2, 1, 3, 4)).reshape(B * T, Cin, H, W)
    gx = lax.conv_general_dilated(
        x_f.astype(jnp.float32), wx_p.astype(jnp.float32), (1, 1), 'SAME',
        dimension_numbers=('NCHW', 'HWIO', 'NCHW'))
    gx = gx + b_p.astype(jnp.float32).reshape(1, 4 * Cout, 1, 1)
    gx = gx.reshape(B, T, 4 * Cout, HW)

    # ---- Pad batch / time to whole blocks (padded steps come after the valid
    # ones, so the recurrence of valid outputs is untouched; pads are sliced off).
    if B_pad != B or T_pad != T:
        gx = jnp.pad(gx, ((0, B_pad - B), (0, T_pad - T), (0, 0), (0, 0)))

    # ---- Optional batch folding into the lane axis (widens the matmul N on
    # single-TC chips).  Only this branch pays one gx-sized transpose.
    if b_blk > 1:
        gx = gx.reshape(nb, b_blk, T_pad, 4 * Cout, HW)
        gx = jnp.transpose(gx, (0, 2, 3, 1, 4))
        gx = gx.reshape(nb, T_pad, 4 * Cout, n_lanes)
    else:
        gx = gx.reshape(nb, T_pad, 4 * Cout, n_lanes)
    gx = gx.astype(compute_dtype)                          # bf16 in HBM by default

    # ---- Hidden-path weights flattened over taps: (4*Cout, k*k*Cout), column
    # order (dy, dx, cin) matching the kernel's patch construction.
    wh_mat = jnp.transpose(
        wh_p.reshape(k * k * Cout, 4 * Cout)).astype(compute_dtype)

    # ---- Per-tap 'same'-padding validity masks, pre-expanded to
    # (k*k*Cout, n_lanes) so the kernel does a single fused multiply per step.
    hh = np.arange(H)[:, None]
    ww = np.arange(W)[None, :]
    tap_masks = []
    for dy in range(k):
        for dx in range(k):
            valid = ((hh + dy - p >= 0) & (hh + dy - p < H) &
                     (ww + dx - p >= 0) & (ww + dx - p < W))
            tap_masks.append(np.broadcast_to(valid.reshape(1, HW), (Cout, HW)))
    masks_np = np.tile(np.concatenate(tap_masks, axis=0).astype(np.float32),
                       (1, b_blk))                          # (k*k*Cout, n_lanes)
    masks = jnp.asarray(masks_np, dtype=jnp.float32)

    kernel = functools.partial(_convlstm_chunk_kernel, k, Cout, W, unroll_steps)

    out = pl.pallas_call(
        kernel,
        out_shape=jax.ShapeDtypeStruct((nb, T_pad, Cout, n_lanes), jnp.float32),
        grid_spec=pltpu.PrefetchScalarGridSpec(
            num_scalar_prefetch=0,
            grid=(nb, nt),                       # (batch-block, time-chunk)
            in_specs=[
                # constant index_maps => fetched once across the grid
                pl.BlockSpec((k * k * Cout, n_lanes), lambda bb, tc: (0, 0)),
                pl.BlockSpec((None, t_chunk, 4 * Cout, n_lanes),
                             lambda bb, tc: (bb, tc, 0, 0)),
                pl.BlockSpec((4 * Cout, k * k * Cout), lambda bb, tc: (0, 0)),
            ],
            out_specs=pl.BlockSpec((None, t_chunk, Cout, n_lanes),
                                   lambda bb, tc: (bb, tc, 0, 0)),
            scratch_shapes=[
                pltpu.VMEM((Cout, n_lanes), jnp.float32),        # h carry
                pltpu.VMEM((Cout, n_lanes), jnp.float32),        # c carry
                pltpu.VMEM((k * k * Cout, n_lanes), jnp.float32),  # im2col taps
            ],
        ),
        compiler_params=pltpu.CompilerParams(
            # 'parallel' only pays off on multi-TC chips (v7x); harmless elsewhere.
            dimension_semantics=("parallel", "arbitrary")),
    )(masks, gx, wh_mat)

    # (nb, T_pad, Cout, b_blk*HW) -> (B, Cout, T, H, W)  (PyTorch output layout)
    out = out.reshape(nb, T_pad, Cout, b_blk, H, W)
    out = jnp.transpose(out, (0, 3, 2, 1, 4, 5))     # (nb, b_blk, Cout, T_pad, H, W)
    out = out.reshape(B_pad, Cout, T_pad, H, W)[:B, :, :T]
    return out


def _ref_forward(x, wx, wh, b, kernel_size):
    """Pure-JAX f32 reference of the same ConvLSTM recurrence (gate order [i,f,g,o])."""
    B, Cin, T, H, W = x.shape
    Cout = wh.shape[2]
    dn = ('NHWC', 'HWIO', 'NHWC')
    h = jnp.zeros((B, H, W, Cout), jnp.float32)
    c = jnp.zeros((B, H, W, Cout), jnp.float32)
    outs = []
    for t in range(T):
        xt = jnp.transpose(x[:, :, t], (0, 2, 3, 1)).astype(jnp.float32)
        gates = (lax.conv_general_dilated(xt, wx, (1, 1), 'SAME',
                                          dimension_numbers=dn)
                 + lax.conv_general_dilated(h, wh, (1, 1), 'SAME',
                                            dimension_numbers=dn)
                 + b)
        i_g = jax.nn.sigmoid(gates[..., 0 * Cout:1 * Cout])
        f_g = jax.nn.sigmoid(gates[..., 1 * Cout:2 * Cout])
        g_g = jnp.tanh(gates[..., 2 * Cout:3 * Cout])
        o_g = jax.nn.sigmoid(gates[..., 3 * Cout:4 * Cout])
        c = f_g * c + i_g * g_g
        h = o_g * jnp.tanh(c)
        outs.append(h)
    out = jnp.stack(outs, axis=0)                 # (T, B, H, W, Cout)
    return jnp.transpose(out, (1, 4, 0, 2, 3))    # (B, Cout, T, H, W)


if __name__ == "__main__":
    B, Cin, T, H, W = 2, 4, 8, 16, 16
    Cout, K = 8, 3

    key = jax.random.PRNGKey(0)
    kx, kwx, kwh, kb = jax.random.split(key, 4)

    x = jax.random.normal(kx, (B, Cin, T, H, W), dtype=jnp.float32)
    wx = jax.random.normal(kwx, (K, K, Cin, 4 * Cout), jnp.float32) * (
        1.0 / np.sqrt(K * K * Cin))
    wh = jax.random.normal(kwh, (K, K, Cout, 4 * Cout), jnp.float32) * (
        1.0 / np.sqrt(K * K * Cout))
    b = jax.random.normal(kb, (4 * Cout,), jnp.float32) * 0.1

    ref = jax.block_until_ready(_ref_forward(x, wx, wh, b, K))

    # f32 path, batch folded into lanes (v5e/v6e style), T chunked (exercises
    # the persistent h/c carry across chunks).  Tight tolerance.
    out_f32 = jax.block_until_ready(conv_recurrent_layer_lstm(
        x, wx, wh, b, K, compute_dtype=jnp.float32, batch_block=2, t_chunk=4))
    assert out_f32.shape == (B, Cout, T, H, W)
    if not np.allclose(np.asarray(out_f32), np.asarray(ref), rtol=1e-4, atol=1e-4):
        raise AssertionError("f32 Pallas ConvLSTM kernel mismatch vs JAX reference")

    # bf16 MXU path (default dtype), one batch per grid step (v7x style), with a
    # non-dividing t_chunk to exercise the time-padding path.  Looser tolerance.
    out_bf16 = jax.block_until_ready(conv_recurrent_layer_lstm(
        x, wx, wh, b, K, compute_dtype=jnp.bfloat16, batch_block=1, t_chunk=3))
    assert out_bf16.shape == (B, Cout, T, H, W)
    err = float(np.max(np.abs(np.asarray(out_bf16) - np.asarray(ref))))
    if not err < 1e-1:
        raise AssertionError(f"bf16 Pallas ConvLSTM drift too large: {err}")

    print("KERNEL_OK")
</pallas_src>

<mosaic_0001>
module attributes {stable_mosaic.version = 11 : i64} {
  func.func @_convlstm_chunk_kernel(%arg0: i32, %arg1: i32, %arg2: memref<72x512xf32, #tpu.memory_space<vmem>>, %arg3: memref<1x4x32x512xf32, #tpu.memory_space<vmem>>, %arg4: memref<32x72xf32, #tpu.memory_space<vmem>>, %arg5: memref<1x4x8x512xf32, #tpu.memory_space<vmem>>, %arg6: memref<8x512xf32, #tpu.memory_space<vmem>>, %arg7: memref<8x512xf32, #tpu.memory_space<vmem>>, %arg8: memref<72x512xf32, #tpu.memory_space<vmem>>) attributes {dimension_semantics = [#tpu.dimension_semantics<parallel>, #tpu.dimension_semantics<arbitrary>], iteration_bounds = array<i64: 1, 2>, scalar_prefetch = 0 : i64, scratch_operands = 3 : i64, tpu.core_type = #tpu.core_type<tc>, window_params = [{pipeline_mode = #tpu.pipeline_mode<synchronous>, transform_indices = @transform_0, window_bounds = array<i64: 72, 512>}, {transform_indices = @transform_1, window_bounds = array<i64: 1, 4, 32, 512>}, {pipeline_mode = #tpu.pipeline_mode<synchronous>, transform_indices = @transform_2, window_bounds = array<i64: 32, 72>}, {transform_indices = @transform_3, window_bounds = array<i64: 1, 4, 8, 512>}]} {
    %c0_i32 = arith.constant 0 : i32
    %0 = arith.cmpi eq, %arg1, %c0_i32 : i32
    %1 = arith.extui %0 : i1 to i32
    %c0_i32_0 = arith.constant 0 : i32
    %2 = arith.cmpi ne, %1, %c0_i32_0 : i32
    scf.if %2 {
      %cst_141 = arith.constant 0.000000e+00 : f32
      %185 = vector.broadcast %cst_141 : f32 to vector<8x512xf32>
      %c0_142 = arith.constant 0 : index
      %c0_143 = arith.constant 0 : index
      %186 = vector.load %arg6[%c0_142, %c0_143] : memref<8x512xf32, #tpu.memory_space<vmem>>, vector<8x512xf32>
      tpu.vector_store %arg6[%c0_142, %c0_143], %185 {strides = array<i32>} : memref<8x512xf32, #tpu.memory_space<vmem>>, vector<8x512xf32>,
      %cst_144 = arith.constant 0.000000e+00 : f32
      %187 = vector.broadcast %cst_144 : f32 to vector<8x512xf32>
      %c0_145 = arith.constant 0 : index
      %c0_146 = arith.constant 0 : index
      %188 = vector.load %arg7[%c0_145, %c0_146] : memref<8x512xf32, #tpu.memory_space<vmem>>, vector<8x512xf32>
      tpu.vector_store %arg7[%c0_145, %c0_146], %187 {strides = array<i32>} : memref<8x512xf32, #tpu.memory_space<vmem>>, vector<8x512xf32>,
    } else {
    }
    %c0 = arith.constant 0 : index
    %c0_1 = arith.constant 0 : index
    %3 = vector.load %arg4[%c0, %c0_1] : memref<32x72xf32, #tpu.memory_space<vmem>>, vector<32x72xf32>
    %c0_2 = arith.constant 0 : index
    %c0_3 = arith.constant 0 : index
    %4 = vector.load %arg2[%c0_2, %c0_3] : memref<72x512xf32, #tpu.memory_space<vmem>>, vector<72x512xf32>
    %c0_4 = arith.constant 0 : index
    %c0_5 = arith.constant 0 : index
    %5 = vector.load %arg6[%c0_4, %c0_5] : memref<8x512xf32, #tpu.memory_space<vmem>>, vector<8x512xf32>
    %c0_6 = arith.constant 0 : index
    %c0_7 = arith.constant 0 : index
    %6 = vector.load %arg7[%c0_6, %c0_7] : memref<8x512xf32, #tpu.memory_space<vmem>>, vector<8x512xf32>
    %c0_i32_8 = arith.constant 0 : i32
    %c17_i32 = arith.constant 17 : i32
    %7 = tpu.dynamic_rotate %5 by %c17_i32 dim 1 : vector<8x512xf32>, i32 -> vector<8x512xf32>
    %c0_9 = arith.constant 0 : index
    %c0_10 = arith.constant 0 : index
    %8 = vector.load %arg8[%c0_9, %c0_10] : memref<72x512xf32, #tpu.memory_space<vmem>>, vector<8x512xf32>
    tpu.vector_store %arg8[%c0_9, %c0_10], %7 {strides = array<i32>} : memref<72x512xf32, #tpu.memory_space<vmem>>, vector<8x512xf32>,
    %c16_i32 = arith.constant 16 : i32
    %9 = tpu.dynamic_rotate %5 by %c16_i32 dim 1 : vector<8x512xf32>, i32 -> vector<8x512xf32>
    %c8 = arith.constant 8 : index
    %c0_11 = arith.constant 0 : index
    %10 = vector.load %arg8[%c8, %c0_11] : memref<72x512xf32, #tpu.memory_space<vmem>>, vector<8x512xf32>
    tpu.vector_store %arg8[%c8, %c0_11], %9 {strides = array<i32>} : memref<72x512xf32, #tpu.memory_space<vmem>>, vector<8x512xf32>,
    %c15_i32 = arith.constant 15 : i32
    %11 = tpu.dynamic_rotate %5 by %c15_i32 dim 1 : vector<8x512xf32>, i32 -> vector<8x512xf32>
    %c16 = arith.constant 16 : index
    %c0_12 = arith.constant 0 : index
    %12 = vector.load %arg8[%c16, %c0_12] : memref<72x512xf32, #tpu.memory_space<vmem>>, vector<8x512xf32>
    tpu.vector_store %arg8[%c16, %c0_12], %11 {strides = array<i32>} : memref<72x512xf32, #tpu.memory_space<vmem>>, vector<8x512xf32>,
    %c1_i32 = arith.constant 1 : i32
    %13 = tpu.dynamic_rotate %5 by %c1_i32 dim 1 : vector<8x512xf32>, i32 -> vector<8x512xf32>
    %c24 = arith.constant 24 : index
    %c0_13 = arith.constant 0 : index
    %14 = vector.load %arg8[%c24, %c0_13] : memref<72x512xf32, #tpu.memory_space<vmem>>, vector<8x512xf32>
    tpu.vector_store %arg8[%c24, %c0_13], %13 {strides = array<i32>} : memref<72x512xf32, #tpu.memory_space<vmem>>, vector<8x512xf32>,
    %c32 = arith.constant 32 : index
    %c0_14 = arith.constant 0 : index
    %15 = vector.load %arg8[%c32, %c0_14] : memref<72x512xf32, #tpu.memory_space<vmem>>, vector<8x512xf32>
    tpu.vector_store %arg8[%c32, %c0_14], %5 {strides = array<i32>} : memref<72x512xf32, #tpu.memory_space<vmem>>, vector<8x512xf32>,
    %c511_i32 = arith.constant 511 : i32
    %16 = tpu.dynamic_rotate %5 by %c511_i32 dim 1 : vector<8x512xf32>, i32 -> vector<8x512xf32>
    %c40 = arith.constant 40 : index
    %c0_15 = arith.constant 0 : index
    %17 = vector.load %arg8[%c40, %c0_15] : memref<72x512xf32, #tpu.memory_space<vmem>>, vector<8x512xf32>
    tpu.vector_store %arg8[%c40, %c0_15], %16 {strides = array<i32>} : memref<72x512xf32, #tpu.memory_space<vmem>>, vector<8x512xf32>,
    %c497_i32 = arith.constant 497 : i32
    %18 = tpu.dynamic_rotate %5 by %c497_i32 dim 1 : vector<8x512xf32>, i32 -> vector<8x512xf32>
    %c48 = arith.constant 48 : index
    %c0_16 = arith.constant 0 : index
    %19 = vector.load %arg8[%c48, %c0_16] : memref<72x512xf32, #tpu.memory_space<vmem>>, vector<8x512xf32>
    tpu.vector_store %arg8[%c48, %c0_16], %18 {strides = array<i32>} : memref<72x512xf32, #tpu.memory_space<vmem>>, vector<8x512xf32>,
    %c496_i32 = arith.constant 496 : i32
    %20 = tpu.dynamic_rotate %5 by %c496_i32 dim 1 : vector<8x512xf32>, i32 -> vector<8x512xf32>
    %c56 = arith.constant 56 : index
    %c0_17 = arith.constant 0 : index
    %21 = vector.load %arg8[%c56, %c0_17] : memref<72x512xf32, #tpu.memory_space<vmem>>, vector<8x512xf32>
    tpu.vector_store %arg8[%c56, %c0_17], %20 {strides = array<i32>} : memref<72x512xf32, #tpu.memory_space<vmem>>, vector<8x512xf32>,
    %c495_i32 = arith.constant 495 : i32
    %22 = tpu.dynamic_rotate %5 by %c495_i32 dim 1 : vector<8x512xf32>, i32 -> vector<8x512xf32>
    %c64 = arith.constant 64 : index
    %c0_18 = arith.constant 0 : index
    %23 = vector.load %arg8[%c64, %c0_18] : memref<72x512xf32, #tpu.memory_space<vmem>>, vector<8x512xf32>
    tpu.vector_store %arg8[%c64, %c0_18], %22 {strides = array<i32>} : memref<72x512xf32, #tpu.memory_space<vmem>>, vector<8x512xf32>,
    %c0_19 = arith.constant 0 : index
    %c0_20 = arith.constant 0 : index
    %24 = vector.load %arg8[%c0_19, %c0_20] : memref<72x512xf32, #tpu.memory_space<vmem>>, vector<72x512xf32>
    %25 = arith.mulf %24, %4 : vector<72x512xf32>
    %c0_21 = arith.constant 0 : index
    %26 = arith.index_cast %c0_i32_8 : i32 to index
    %c0_22 = arith.constant 0 : index
    %c0_23 = arith.constant 0 : index
    %27 = vector.load %arg3[%c0_21, %26, %c0_22, %c0_23] : memref<1x4x32x512xf32, #tpu.memory_space<vmem>>, vector<1x1x32x512xf32>
    %28 = vector.shape_cast %27 : vector<1x1x32x512xf32> to vector<32x512xf32>
    %cst = arith.constant dense<0.000000e+00> : vector<32x512xf32>
    %29 = tpu.matmul %3, %25, %cst {dimension_numbers = #tpu.dot_dimension_numbers<[1], [0], [0], [1], [0, 0, 1, 1], [], []>} : vector<32x72xf32>, vector<72x512xf32>, vector<32x512xf32> -> vector<32x512xf32>
    %30 = arith.addf %28, %29 : vector<32x512xf32>
    %31 = vector.extract_strided_slice %30 {offsets = [0, 0], sizes = [24, 512], strides = [1, 1]} : vector<32x512xf32> to vector<24x512xf32>
    %32 = arith.negf %31 : vector<24x512xf32>
    %33 = math.exp %32 : vector<24x512xf32>
    %cst_24 = arith.constant 1.000000e+00 : f32
    %34 = vector.broadcast %cst_24 : f32 to vector<24x512xf32>
    %35 = arith.addf %34, %33 : vector<24x512xf32>
    %36 = arith.divf %34, %35 : vector<24x512xf32>
    %37 = vector.extract_strided_slice %36 {offsets = [0, 0], sizes = [8, 512], strides = [1, 1]} : vector<24x512xf32> to vector<8x512xf32>
    %38 = vector.extract_strided_slice %36 {offsets = [8, 0], sizes = [8, 512], strides = [1, 1]} : vector<24x512xf32> to vector<8x512xf32>
    %39 = vector.extract_strided_slice %36 {offsets = [16, 0], sizes = [8, 512], strides = [1, 1]} : vector<24x512xf32> to vector<8x512xf32>
    %40 = vector.extract_strided_slice %30 {offsets = [24, 0], sizes = [8, 512], strides = [1, 1]} : vector<32x512xf32> to vector<8x512xf32>
    %41 = math.tanh %40 : vector<8x512xf32>
    %42 = arith.mulf %38, %6 : vector<8x512xf32>
    %43 = arith.mulf %37, %41 : vector<8x512xf32>
    %44 = arith.addf %42, %43 : vector<8x512xf32>
    %45 = math.tanh %44 : vector<8x512xf32>
    %46 = arith.mulf %39, %45 : vector<8x512xf32>
    %c0_25 = arith.constant 0 : index
    %47 = arith.index_cast %c0_i32_8 : i32 to index
    %c0_26 = arith.constant 0 : index
    %c0_27 = arith.constant 0 : index
    %48 = vector.load %arg5[%c0_25, %47, %c0_26, %c0_27] : memref<1x4x8x512xf32, #tpu.memory_space<vmem>>, vector<1x1x8x512xf32>
    %49 = vector.shape_cast %48 : vector<1x1x8x512xf32> to vector<8x512xf32>
    %50 = vector.shape_cast %46 : vector<8x512xf32> to vector<1x1x8x512xf32>
    tpu.vector_store %arg5[%c0_25, %47, %c0_26, %c0_27], %50 {strides = array<i32>} : memref<1x4x8x512xf32, #tpu.memory_space<vmem>>, vector<1x1x8x512xf32>,
    %c1_i32_28 = arith.constant 1 : i32
    %c17_i32_29 = arith.constant 17 : i32
    %51 = tpu.dynamic_rotate %46 by %c17_i32_29 dim 1 : vector<8x512xf32>, i32 -> vector<8x512xf32>
    %c0_30 = arith.constant 0 : index
    %c0_31 = arith.constant 0 : index
    %52 = vector.load %arg8[%c0_30, %c0_31] : memref<72x512xf32, #tpu.memory_space<vmem>>, vector<8x512xf32>
    tpu.vector_store %arg8[%c0_30, %c0_31], %51 {strides = array<i32>} : memref<72x512xf32, #tpu.memory_space<vmem>>, vector<8x512xf32>,
    %c16_i32_32 = arith.constant 16 : i32
    %53 = tpu.dynamic_rotate %46 by %c16_i32_32 dim 1 : vector<8x512xf32>, i32 -> vector<8x512xf32>
    %c8_33 = arith.constant 8 : index
    %c0_34 = arith.constant 0 : index
    %54 = vector.load %arg8[%c8_33, %c0_34] : memref<72x512xf32, #tpu.memory_space<vmem>>, vector<8x512xf32>
    tpu.vector_store %arg8[%c8_33, %c0_34], %53 {strides = array<i32>} : memref<72x512xf32, #tpu.memory_space<vmem>>, vector<8x512xf32>,
    %c15_i32_35 = arith.constant 15 : i32
    %55 = tpu.dynamic_rotate %46 by %c15_i32_35 dim 1 : vector<8x512xf32>, i32 -> vector<8x512xf32>
    %c16_36 = arith.constant 16 : index
    %c0_37 = arith.constant 0 : index
    %56 = vector.load %arg8[%c16_36, %c0_37] : memref<72x512xf32, #tpu.memory_space<vmem>>, vector<8x512xf32>
    tpu.vector_store %arg8[%c16_36, %c0_37], %55 {strides = array<i32>} : memref<72x512xf32, #tpu.memory_space<vmem>>, vector<8x512xf32>,
    %c1_i32_38 = arith.constant 1 : i32
    %57 = tpu.dynamic_rotate %46 by %c1_i32_38 dim 1 : vector<8x512xf32>, i32 -> vector<8x512xf32>
    %c24_39 = arith.constant 24 : index
    %c0_40 = arith.constant 0 : index
    %58 = vector.load %arg8[%c24_39, %c0_40] : memref<72x512xf32, #tpu.memory_space<vmem>>, vector<8x512xf32>
    tpu.vector_store %arg8[%c24_39, %c0_40], %57 {strides = array<i32>} : memref<72x512xf32, #tpu.memory_space<vmem>>, vector<8x512xf32>,
    %c32_41 = arith.constant 32 : index
    %c0_42 = arith.constant 0 : index
    %59 = vector.load %arg8[%c32_41, %c0_42] : memref<72x512xf32, #tpu.memory_space<vmem>>, vector<8x512xf32>
    tpu.vector_store %arg8[%c32_41, %c0_42], %46 {strides = array<i32>} : memref<72x512xf32, #tpu.memory_space<vmem>>, vector<8x512xf32>,
    %c511_i32_43 = arith.constant 511 : i32
    %60 = tpu.dynamic_rotate %46 by %c511_i32_43 dim 1 : vector<8x512xf32>, i32 -> vector<8x512xf32>
    %c40_44 = arith.constant 40 : index
    %c0_45 = arith.constant 0 : index
    %61 = vector.load %arg8[%c40_44, %c0_45] : memref<72x512xf32, #tpu.memory_space<vmem>>, vector<8x512xf32>
    tpu.vector_store %arg8[%c40_44, %c0_45], %60 {strides = array<i32>} : memref<72x512xf32, #tpu.memory_space<vmem>>, vector<8x512xf32>,
    %c497_i32_46 = arith.constant 497 : i32
    %62 = tpu.dynamic_rotate %46 by %c497_i32_46 dim 1 : vector<8x512xf32>, i32 -> vector<8x512xf32>
    %c48_47 = arith.constant 48 : index
    %c0_48 = arith.constant 0 : index
    %63 = vector.load %arg8[%c48_47, %c0_48] : memref<72x512xf32, #tpu.memory_space<vmem>>, vector<8x512xf32>
    tpu.vector_store %arg8[%c48_47, %c0_48], %62 {strides = array<i32>} : memref<72x512xf32, #tpu.memory_space<vmem>>, vector<8x512xf32>,
    %c496_i32_49 = arith.constant 496 : i32
    %64 = tpu.dynamic_rotate %46 by %c496_i32_49 dim 1 : vector<8x512xf32>, i32 -> vector<8x512xf32>
    %c56_50 = arith.constant 56 : index
    %c0_51 = arith.constant 0 : index
    %65 = vector.load %arg8[%c56_50, %c0_51] : memref<72x512xf32, #tpu.memory_space<vmem>>, vector<8x512xf32>
    tpu.vector_store %arg8[%c56_50, %c0_51], %64 {strides = array<i32>} : memref<72x512xf32, #tpu.memory_space<vmem>>, vector<8x512xf32>,
    %c495_i32_52 = arith.constant 495 : i32
    %66 = tpu.dynamic_rotate %46 by %c495_i32_52 dim 1 : vector<8x512xf32>, i32 -> vector<8x512xf32>
    %c64_53 = arith.constant 64 : index
    %c0_54 = arith.constant 0 : index
    %67 = vector.load %arg8[%c64_53, %c0_54] : memref<72x512xf32, #tpu.memory_space<vmem>>, vector<8x512xf32>
    tpu.vector_store %arg8[%c64_53, %c0_54], %66 {strides = array<i32>} : memref<72x512xf32, #tpu.memory_space<vmem>>, vector<8x512xf32>,
    %c0_55 = arith.constant 0 : index
    %c0_56 = arith.constant 0 : index
    %68 = vector.load %arg8[%c0_55, %c0_56] : memref<72x512xf32, #tpu.memory_space<vmem>>, vector<72x512xf32>
    %69 = arith.mulf %68, %4 : vector<72x512xf32>
    %c0_57 = arith.constant 0 : index
    %70 = arith.index_cast %c1_i32_28 : i32 to index
    %c0_58 = arith.constant 0 : index
    %c0_59 = arith.constant 0 : index
    %71 = vector.load %arg3[%c0_57, %70, %c0_58, %c0_59] : memref<1x4x32x512xf32, #tpu.memory_space<vmem>>, vector<1x1x32x512xf32>
    %72 = vector.shape_cast %71 : vector<1x1x32x512xf32> to vector<32x512xf32>
    %cst_60 = arith.constant dense<0.000000e+00> : vector<32x512xf32>
    %73 = tpu.matmul %3, %69, %cst_60 {dimension_numbers = #tpu.dot_dimension_numbers<[1], [0], [0], [1], [0, 0, 1, 1], [], []>} : vector<32x72xf32>, vector<72x512xf32>, vector<32x512xf32> -> vector<32x512xf32>
    %74 = arith.addf %72, %73 : vector<32x512xf32>
    %75 = vector.extract_strided_slice %74 {offsets = [0, 0], sizes = [24, 512], strides = [1, 1]} : vector<32x512xf32> to vector<24x512xf32>
    %76 = arith.negf %75 : vector<24x512xf32>
    %77 = math.exp %76 : vector<24x512xf32>
    %cst_61 = arith.constant 1.000000e+00 : f32
    %78 = vector.broadcast %cst_61 : f32 to vector<24x512xf32>
    %79 = arith.addf %78, %77 : vector<24x512xf32>
    %80 = arith.divf %78, %79 : vector<24x512xf32>
    %81 = vector.extract_strided_slice %80 {offsets = [0, 0], sizes = [8, 512], strides = [1, 1]} : vector<24x512xf32> to vector<8x512xf32>
    %82 = vector.extract_strided_slice %80 {offsets = [8, 0], sizes = [8, 512], strides = [1, 1]} : vector<24x512xf32> to vector<8x512xf32>
    %83 = vector.extract_strided_slice %80 {offsets = [16, 0], sizes = [8, 512], strides = [1, 1]} : vector<24x512xf32> to vector<8x512xf32>
    %84 = vector.extract_strided_slice %74 {offsets = [24, 0], sizes = [8, 512], strides = [1, 1]} : vector<32x512xf32> to vector<8x512xf32>
    %85 = math.tanh %84 : vector<8x512xf32>
    %86 = arith.mulf %82, %44 : vector<8x512xf32>
    %87 = arith.mulf %81, %85 : vector<8x512xf32>
    %88 = arith.addf %86, %87 : vector<8x512xf32>
    %89 = math.tanh %88 : vector<8x512xf32>
    %90 = arith.mulf %83, %89 : vector<8x512xf32>
    %c0_62 = arith.constant 0 : index
    %91 = arith.index_cast %c1_i32_28 : i32 to index
    %c0_63 = arith.constant 0 : index
    %c0_64 = arith.constant 0 : index
    %92 = vector.load %arg5[%c0_62, %91, %c0_63, %c0_64] : memref<1x4x8x512xf32, #tpu.memory_space<vmem>>, vector<1x1x8x512xf32>
    %93 = vector.shape_cast %92 : vector<1x1x8x512xf32> to vector<8x512xf32>
    %94 = vector.shape_cast %90 : vector<8x512xf32> to vector<1x1x8x512xf32>
    tpu.vector_store %arg5[%c0_62, %91, %c0_63, %c0_64], %94 {strides = array<i32>} : memref<1x4x8x512xf32, #tpu.memory_space<vmem>>, vector<1x1x8x512xf32>,
    %c2_i32 = arith.constant 2 : i32
    %c17_i32_65 = arith.constant 17 : i32
    %95 = tpu.dynamic_rotate %90 by %c17_i32_65 dim 1 : vector<8x512xf32>, i32 -> vector<8x512xf32>
    %c0_66 = arith.constant 0 : index
    %c0_67 = arith.constant 0 : index
    %96 = vector.load %arg8[%c0_66, %c0_67] : memref<72x512xf32, #tpu.memory_space<vmem>>, vector<8x512xf32>
    tpu.vector_store %arg8[%c0_66, %c0_67], %95 {strides = array<i32>} : memref<72x512xf32, #tpu.memory_space<vmem>>, vector<8x512xf32>,
    %c16_i32_68 = arith.constant 16 : i32
    %97 = tpu.dynamic_rotate %90 by %c16_i32_68 dim 1 : vector<8x512xf32>, i32 -> vector<8x512xf32>
    %c8_69 = arith.constant 8 : index
    %c0_70 = arith.constant 0 : index
    %98 = vector.load %arg8[%c8_69, %c0_70] : memref<72x512xf32, #tpu.memory_space<vmem>>, vector<8x512xf32>
    tpu.vector_store %arg8[%c8_69, %c0_70], %97 {strides = array<i32>} : memref<72x512xf32, #tpu.memory_space<vmem>>, vector<8x512xf32>,
    %c15_i32_71 = arith.constant 15 : i32
    %99 = tpu.dynamic_rotate %90 by %c15_i32_71 dim 1 : vector<8x512xf32>, i32 -> vector<8x512xf32>
    %c16_72 = arith.constant 16 : index
    %c0_73 = arith.constant 0 : index
    %100 = vector.load %arg8[%c16_72, %c0_73] : memref<72x512xf32, #tpu.memory_space<vmem>>, vector<8x512xf32>
    tpu.vector_store %arg8[%c16_72, %c0_73], %99 {strides = array<i32>} : memref<72x512xf32, #tpu.memory_space<vmem>>, vector<8x512xf32>,
    %c1_i32_74 = arith.constant 1 : i32
    %101 = tpu.dynamic_rotate %90 by %c1_i32_74 dim 1 : vector<8x512xf32>, i32 -> vector<8x512xf32>
    %c24_75 = arith.constant 24 : index
    %c0_76 = arith.constant 0 : index
    %102 = vector.load %arg8[%c24_75, %c0_76] : memref<72x512xf32, #tpu.memory_space<vmem>>, vector<8x512xf32>
    tpu.vector_store %arg8[%c24_75, %c0_76], %101 {strides = array<i32>} : memref<72x512xf32, #tpu.memory_space<vmem>>, vector<8x512xf32>,
    %c32_77 = arith.constant 32 : index
    %c0_78 = arith.constant 0 : index
    %103 = vector.load %arg8[%c32_77, %c0_78] : memref<72x512xf32, #tpu.memory_space<vmem>>, vector<8x512xf32>
    tpu.vector_store %arg8[%c32_77, %c0_78], %90 {strides = array<i32>} : memref<72x512xf32, #tpu.memory_space<vmem>>, vector<8x512xf32>,
    %c511_i32_79 = arith.constant 511 : i32
    %104 = tpu.dynamic_rotate %90 by %c511_i32_79 dim 1 : vector<8x512xf32>, i32 -> vector<8x512xf32>
    %c40_80 = arith.constant 40 : index
    %c0_81 = arith.constant 0 : index
    %105 = vector.load %arg8[%c40_80, %c0_81] : memref<72x512xf32, #tpu.memory_space<vmem>>, vector<8x512xf32>
    tpu.vector_store %arg8[%c40_80, %c0_81], %104 {strides = array<i32>} : memref<72x512xf32, #tpu.memory_space<vmem>>, vector<8x512xf32>,
    %c497_i32_82 = arith.constant 497 : i32
    %106 = tpu.dynamic_rotate %90 by %c497_i32_82 dim 1 : vector<8x512xf32>, i32 -> vector<8x512xf32>
    %c48_83 = arith.constant 48 : index
    %c0_84 = arith.constant 0 : index
    %107 = vector.load %arg8[%c48_83, %c0_84] : memref<72x512xf32, #tpu.memory_space<vmem>>, vector<8x512xf32>
    tpu.vector_store %arg8[%c48_83, %c0_84], %106 {strides = array<i32>} : memref<72x512xf32, #tpu.memory_space<vmem>>, vector<8x512xf32>,
    %c496_i32_85 = arith.constant 496 : i32
    %108 = tpu.dynamic_rotate %90 by %c496_i32_85 dim 1 : vector<8x512xf32>, i32 -> vector<8x512xf32>
    %c56_86 = arith.constant 56 : index
    %c0_87 = arith.constant 0 : index
    %109 = vector.load %arg8[%c56_86, %c0_87] : memref<72x512xf32, #tpu.memory_space<vmem>>, vector<8x512xf32>
    tpu.vector_store %arg8[%c56_86, %c0_87], %108 {strides = array<i32>} : memref<72x512xf32, #tpu.memory_space<vmem>>, vector<8x512xf32>,
    %c495_i32_88 = arith.constant 495 : i32
    %110 = tpu.dynamic_rotate %90 by %c495_i32_88 dim 1 : vector<8x512xf32>, i32 -> vector<8x512xf32>
    %c64_89 = arith.constant 64 : index
    %c0_90 = arith.constant 0 : index
    %111 = vector.load %arg8[%c64_89, %c0_90] : memref<72x512xf32, #tpu.memory_space<vmem>>, vector<8x512xf32>
    tpu.vector_store %arg8[%c64_89, %c0_90], %110 {strides = array<i32>} : memref<72x512xf32, #tpu.memory_space<vmem>>, vector<8x512xf32>,
    %c0_91 = arith.constant 0 : index
    %c0_92 = arith.constant 0 : index
    %112 = vector.load %arg8[%c0_91, %c0_92] : memref<72x512xf32, #tpu.memory_space<vmem>>, vector<72x512xf32>
    %113 = arith.mulf %112, %4 : vector<72x512xf32>
    %c0_93 = arith.constant 0 : index
    %114 = arith.index_cast %c2_i32 : i32 to index
    %c0_94 = arith.constant 0 : index
    %c0_95 = arith.constant 0 : index
    %115 = vector.load %arg3[%c0_93, %114, %c0_94, %c0_95] : memref<1x4x32x512xf32, #tpu.memory_space<vmem>>, vector<1x1x32x512xf32>
    %116 = vector.shape_cast %115 : vector<1x1x32x512xf32> to vector<32x512xf32>
    %cst_96 = arith.constant dense<0.000000e+00> : vector<32x512xf32>
    %117 = tpu.matmul %3, %113, %cst_96 {dimension_numbers = #tpu.dot_dimension_numbers<[1], [0], [0], [1], [0, 0, 1, 1], [], []>} : vector<32x72xf32>, vector<72x512xf32>, vector<32x512xf32> -> vector<32x512xf32>
    %118 = arith.addf %116, %117 : vector<32x512xf32>
    %119 = vector.extract_strided_slice %118 {offsets = [0, 0], sizes = [24, 512], strides = [1, 1]} : vector<32x512xf32> to vector<24x512xf32>
    %120 = arith.negf %119 : vector<24x512xf32>
    %121 = math.exp %120 : vector<24x512xf32>
    %cst_97 = arith.constant 1.000000e+00 : f32
    %122 = vector.broadcast %cst_97 : f32 to vector<24x512xf32>
    %123 = arith.addf %122, %121 : vector<24x512xf32>
    %124 = arith.divf %122, %123 : vector<24x512xf32>
    %125 = vector.extract_strided_slice %124 {offsets = [0, 0], sizes = [8, 512], strides = [1, 1]} : vector<24x512xf32> to vector<8x512xf32>
    %126 = vector.extract_strided_slice %124 {offsets = [8, 0], sizes = [8, 512], strides = [1, 1]} : vector<24x512xf32> to vector<8x512xf32>
    %127 = vector.extract_strided_slice %124 {offsets = [16, 0], sizes = [8, 512], strides = [1, 1]} : vector<24x512xf32> to vector<8x512xf32>
    %128 = vector.extract_strided_slice %118 {offsets = [24, 0], sizes = [8, 512], strides = [1, 1]} : vector<32x512xf32> to vector<8x512xf32>
    %129 = math.tanh %128 : vector<8x512xf32>
    %130 = arith.mulf %126, %88 : vector<8x512xf32>
    %131 = arith.mulf %125, %129 : vector<8x512xf32>
    %132 = arith.addf %130, %131 : vector<8x512xf32>
    %133 = math.tanh %132 : vector<8x512xf32>
    %134 = arith.mulf %127, %133 : vector<8x512xf32>
    %c0_98 = arith.constant 0 : index
    %135 = arith.index_cast %c2_i32 : i32 to index
    %c0_99 = arith.constant 0 : index
    %c0_100 = arith.constant 0 : index
    %136 = vector.load %arg5[%c0_98, %135, %c0_99, %c0_100] : memref<1x4x8x512xf32, #tpu.memory_space<vmem>>, vector<1x1x8x512xf32>
    %137 = vector.shape_cast %136 : vector<1x1x8x512xf32> to vector<8x512xf32>
    %138 = vector.shape_cast %134 : vector<8x512xf32> to vector<1x1x8x512xf32>
    tpu.vector_store %arg5[%c0_98, %135, %c0_99, %c0_100], %138 {strides = array<i32>} : memref<1x4x8x512xf32, #tpu.memory_space<vmem>>, vector<1x1x8x512xf32>,
    %c3_i32 = arith.constant 3 : i32
    %c17_i32_101 = arith.constant 17 : i32
    %139 = tpu.dynamic_rotate %134 by %c17_i32_101 dim 1 : vector<8x512xf32>, i32 -> vector<8x512xf32>
    %c0_102 = arith.constant 0 : index
    %c0_103 = arith.constant 0 : index
    %140 = vector.load %arg8[%c0_102, %c0_103] : memref<72x512xf32, #tpu.memory_space<vmem>>, vector<8x512xf32>
    tpu.vector_store %arg8[%c0_102, %c0_103], %139 {strides = array<i32>} : memref<72x512xf32, #tpu.memory_space<vmem>>, vector<8x512xf32>,
    %c16_i32_104 = arith.constant 16 : i32
    %141 = tpu.dynamic_rotate %134 by %c16_i32_104 dim 1 : vector<8x512xf32>, i32 -> vector<8x512xf32>
    %c8_105 = arith.constant 8 : index
    %c0_106 = arith.constant 0 : index
    %142 = vector.load %arg8[%c8_105, %c0_106] : memref<72x512xf32, #tpu.memory_space<vmem>>, vector<8x512xf32>
    tpu.vector_store %arg8[%c8_105, %c0_106], %141 {strides = array<i32>} : memref<72x512xf32, #tpu.memory_space<vmem>>, vector<8x512xf32>,
    %c15_i32_107 = arith.constant 15 : i32
    %143 = tpu.dynamic_rotate %134 by %c15_i32_107 dim 1 : vector<8x512xf32>, i32 -> vector<8x512xf32>
    %c16_108 = arith.constant 16 : index
    %c0_109 = arith.constant 0 : index
    %144 = vector.load %arg8[%c16_108, %c0_109] : memref<72x512xf32, #tpu.memory_space<vmem>>, vector<8x512xf32>
    tpu.vector_store %arg8[%c16_108, %c0_109], %143 {strides = array<i32>} : memref<72x512xf32, #tpu.memory_space<vmem>>, vector<8x512xf32>,
    %c1_i32_110 = arith.constant 1 : i32
    %145 = tpu.dynamic_rotate %134 by %c1_i32_110 dim 1 : vector<8x512xf32>, i32 -> vector<8x512xf32>
    %c24_111 = arith.constant 24 : index
    %c0_112 = arith.constant 0 : index
    %146 = vector.load %arg8[%c24_111, %c0_112] : memref<72x512xf32, #tpu.memory_space<vmem>>, vector<8x512xf32>
    tpu.vector_store %arg8[%c24_111, %c0_112], %145 {strides = array<i32>} : memref<72x512xf32, #tpu.memory_space<vmem>>, vector<8x512xf32>,
    %c32_113 = arith.constant 32 : index
    %c0_114 = arith.constant 0 : index
    %147 = vector.load %arg8[%c32_113, %c0_114] : memref<72x512xf32, #tpu.memory_space<vmem>>, vector<8x512xf32>
    tpu.vector_store %arg8[%c32_113, %c0_114], %134 {strides = array<i32>} : memref<72x512xf32, #tpu.memory_space<vmem>>, vector<8x512xf32>,
    %c511_i32_115 = arith.constant 511 : i32
    %148 = tpu.dynamic_rotate %134 by %c511_i32_115 dim 1 : vector<8x512xf32>, i32 -> vector<8x512xf32>
    %c40_116 = arith.constant 40 : index
    %c0_117 = arith.constant 0 : index
    %149 = vector.load %arg8[%c40_116, %c0_117] : memref<72x512xf32, #tpu.memory_space<vmem>>, vector<8x512xf32>
    tpu.vector_store %arg8[%c40_116, %c0_117], %148 {strides = array<i32>} : memref<72x512xf32, #tpu.memory_space<vmem>>, vector<8x512xf32>,
    %c497_i32_118 = arith.constant 497 : i32
    %150 = tpu.dynamic_rotate %134 by %c497_i32_118 dim 1 : vector<8x512xf32>, i32 -> vector<8x512xf32>
    %c48_119 = arith.constant 48 : index
    %c0_120 = arith.constant 0 : index
    %151 = vector.load %arg8[%c48_119, %c0_120] : memref<72x512xf32, #tpu.memory_space<vmem>>, vector<8x512xf32>
    tpu.vector_store %arg8[%c48_119, %c0_120], %150 {strides = array<i32>} : memref<72x512xf32, #tpu.memory_space<vmem>>, vector<8x512xf32>,
    %c496_i32_121 = arith.constant 496 : i32
    %152 = tpu.dynamic_rotate %134 by %c496_i32_121 dim 1 : vector<8x512xf32>, i32 -> vector<8x512xf32>
    %c56_122 = arith.constant 56 : index
    %c0_123 = arith.constant 0 : index
    %153 = vector.load %arg8[%c56_122, %c0_123] : memref<72x512xf32, #tpu.memory_space<vmem>>, vector<8x512xf32>
    tpu.vector_store %arg8[%c56_122, %c0_123], %152 {strides = array<i32>} : memref<72x512xf32, #tpu.memory_space<vmem>>, vector<8x512xf32>,
    %c495_i32_124 = arith.constant 495 : i32
    %154 = tpu.dynamic_rotate %134 by %c495_i32_124 dim 1 : vector<8x512xf32>, i32 -> vector<8x512xf32>
    %c64_125 = arith.constant 64 : index
    %c0_126 = arith.constant 0 : index
    %155 = vector.load %arg8[%c64_125, %c0_126] : memref<72x512xf32, #tpu.memory_space<vmem>>, vector<8x512xf32>
    tpu.vector_store %arg8[%c64_125, %c0_126], %154 {strides = array<i32>} : memref<72x512xf32, #tpu.memory_space<vmem>>, vector<8x512xf32>,
    %c0_127 = arith.constant 0 : index
    %c0_128 = arith.constant 0 : index
    %156 = vector.load %arg8[%c0_127, %c0_128] : memref<72x512xf32, #tpu.memory_space<vmem>>, vector<72x512xf32>
    %157 = arith.mulf %156, %4 : vector<72x512xf32>
    %c0_129 = arith.constant 0 : index
    %158 = arith.index_cast %c3_i32 : i32 to index
    %c0_130 = arith.constant 0 : index
    %c0_131 = arith.constant 0 : index
    %159 = vector.load %arg3[%c0_129, %158, %c0_130, %c0_131] : memref<1x4x32x512xf32, #tpu.memory_space<vmem>>, vector<1x1x32x512xf32>
    %160 = vector.shape_cast %159 : vector<1x1x32x512xf32> to vector<32x512xf32>
    %cst_132 = arith.constant dense<0.000000e+00> : vector<32x512xf32>
    %161 = tpu.matmul %3, %157, %cst_132 {dimension_numbers = #tpu.dot_dimension_numbers<[1], [0], [0], [1], [0, 0, 1, 1], [], []>} : vector<32x72xf32>, vector<72x512xf32>, vector<32x512xf32> -> vector<32x512xf32>
    %162 = arith.addf %160, %161 : vector<32x512xf32>
    %163 = vector.extract_strided_slice %162 {offsets = [0, 0], sizes = [24, 512], strides = [1, 1]} : vector<32x512xf32> to vector<24x512xf32>
    %164 = arith.negf %163 : vector<24x512xf32>
    %165 = math.exp %164 : vector<24x512xf32>
    %cst_133 = arith.constant 1.000000e+00 : f32
    %166 = vector.broadcast %cst_133 : f32 to vector<24x512xf32>
    %167 = arith.addf %166, %165 : vector<24x512xf32>
    %168 = arith.divf %166, %167 : vector<24x512xf32>
    %169 = vector.extract_strided_slice %168 {offsets = [0, 0], sizes = [8, 512], strides = [1, 1]} : vector<24x512xf32> to vector<8x512xf32>
    %170 = vector.extract_strided_slice %168 {offsets = [8, 0], sizes = [8, 512], strides = [1, 1]} : vector<24x512xf32> to vector<8x512xf32>
    %171 = vector.extract_strided_slice %168 {offsets = [16, 0], sizes = [8, 512], strides = [1, 1]} : vector<24x512xf32> to vector<8x512xf32>
    %172 = vector.extract_strided_slice %162 {offsets = [24, 0], sizes = [8, 512], strides = [1, 1]} : vector<32x512xf32> to vector<8x512xf32>
    %173 = math.tanh %172 : vector<8x512xf32>
    %174 = arith.mulf %170, %132 : vector<8x512xf32>
    %175 = arith.mulf %169, %173 : vector<8x512xf32>
    %176 = arith.addf %174, %175 : vector<8x512xf32>
    %177 = math.tanh %176 : vector<8x512xf32>
    %178 = arith.mulf %171, %177 : vector<8x512xf32>
    %c0_134 = arith.constant 0 : index
    %179 = arith.index_cast %c3_i32 : i32 to index
    %c0_135 = arith.constant 0 : index
    %c0_136 = arith.constant 0 : index
    %180 = vector.load %arg5[%c0_134, %179, %c0_135, %c0_136] : memref<1x4x8x512xf32, #tpu.memory_space<vmem>>, vector<1x1x8x512xf32>
    %181 = vector.shape_cast %180 : vector<1x1x8x512xf32> to vector<8x512xf32>
    %182 = vector.shape_cast %178 : vector<8x512xf32> to vector<1x1x8x512xf32>
    tpu.vector_store %arg5[%c0_134, %179, %c0_135, %c0_136], %182 {strides = array<i32>} : memref<1x4x8x512xf32, #tpu.memory_space<vmem>>, vector<1x1x8x512xf32>,
    %c4_i32 = arith.constant 4 : i32
    %c0_137 = arith.constant 0 : index
    %c0_138 = arith.constant 0 : index
    %183 = vector.load %arg6[%c0_137, %c0_138] : memref<8x512xf32, #tpu.memory_space<vmem>>, vector<8x512xf32>
    tpu.vector_store %arg6[%c0_137, %c0_138], %178 {strides = array<i32>} : memref<8x512xf32, #tpu.memory_space<vmem>>, vector<8x512xf32>,
    %c0_139 = arith.constant 0 : index
    %c0_140 = arith.constant 0 : index
    %184 = vector.load %arg7[%c0_139, %c0_140] : memref<8x512xf32, #tpu.memory_space<vmem>>, vector<8x512xf32>
    tpu.vector_store %arg7[%c0_139, %c0_140], %176 {strides = array<i32>} : memref<8x512xf32, #tpu.memory_space<vmem>>, vector<8x512xf32>,
    return
  }
  func.func @transform_0(%arg0: i32, %arg1: i32) -> (i32, i32) {
    %c0_i32 = arith.constant 0 : i32
    %c0_i32_0 = arith.constant 0 : i32
    %c0_i32_1 = arith.constant 0 : i32
    return %c0_i32, %c0_i32_0 : i32, i32
  }
  func.func @transform_1(%arg0: i32, %arg1: i32) -> (i32, i32, i32, i32) {
    %c0_i32 = arith.constant 0 : i32
    %c0_i32_0 = arith.constant 0 : i32
    %c0_i32_1 = arith.constant 0 : i32
    return %arg0, %arg1, %c0_i32, %c0_i32_0 : i32, i32, i32, i32
  }
  func.func @transform_2(%arg0: i32, %arg1: i32) -> (i32, i32) {
    %c0_i32 = arith.constant 0 : i32
    %c0_i32_0 = arith.constant 0 : i32
    %c0_i32_1 = arith.constant 0 : i32
    return %c0_i32, %c0_i32_0 : i32, i32
  }
  func.func @transform_3(%arg0: i32, %arg1: i32) -> (i32, i32, i32, i32) {
    %c0_i32 = arith.constant 0 : i32
    %c0_i32_0 = arith.constant 0 : i32
    %c0_i32_1 = arith.constant 0 : i32
    return %arg0, %arg1, %c0_i32, %c0_i32_0 : i32, i32, i32, i32
  }
}

</mosaic_0001>

<bundles_post_ra>
// kernel: tpu_custom_call.1
= control target key start
LH: loop header
LB: loop body
LE: loop exit
PB: predicated region body
PF: predicated region fallthrough
CT: control target
= control target key end

     0   :  { %8 = vsyncpa [#allocation6], 0  ;;  %s4791_s0 = inlined_call_operand.hbm [shape: f32[72,512], index: 0, kind: input, shape index: {}]   ;;  %s4792_s1 = inlined_call_operand.hbm [shape: f32[1,8,32,512], index: 1, kind: input, shape index: {}]   ;;  %s4793_s2 = inlined_call_operand.hbm [shape: f32[32,72], index: 2, kind: input, shape index: {}]   ;;  %s4794_s3 = inlined_call_operand.hbm [shape: f32[1,8,8,512], index: 3, kind: output, shape index: {}]  }
   0x1   :  { %9 = vsyncpa [#allocation9], 0 }
   0x2   :  { %11 = vsyncpa [#allocation9 + $0x1], 0 }
   0x3   :  { %12 = vsyncpa [#allocation7], 0 }
   0x4   :  { %14 = vsyncpa [#allocation7 + $0x1], 0  ;;  %s3424_s12 = smov 0   ;;  %s3426_s13 = smov 0  }
   0x5   :  { %s3428_s14 = smov 0   ;;  %s3430_s15 = smov 0  }
   0x6   :  { %s3432_s16 = smov 0   ;;  %s3434_s17 = smov 0  }
   0x7 LB: > { %s3455_s18 = sadd.s32 4294967295, %s3382_s17   ;;  %s2518_s19 = sadd.s32 4294967294, %s3382_s17   ;;  %s3382_s17 = sphi %s3434_s17, %s20_s17   ;;  %s3378_s16 = sphi %s3432_s16, %s4857_s16   ;;  %s3374_s15 = sphi %s3430_s15, %s4856_s15   ;;  %s3370_s14 = sphi %s3428_s14, %s4855_s14   ;;  %s3366_s13 = sphi %s3426_s13, %s4854_s13   ;;  %s3362_s12 = sphi %s3424_s12, %s4853_s12  }
   0x8   : > { %p69_p0 = scmp.ne.s32.totalorder %s3370_s14, %s3366_s13  ;;  %p70_p1 = scmp.eq.s32.totalorder %s3382_s17, 0 }
   0x9   : > { %p75_p2 = scmp.ne.s32.totalorder %s3366_s13, %s3362_s12  ;;  %p4795_p3 = scmp.eq.s32.totalorder %s3455_s18, 0 }
   0xa   : > { %p3464_p4 = por %p70_p1, %p69_p0  ;;  %p122_p5 = scmp.eq.s32.totalorder %s3455_s18, 1 }
   0xb   : > { %p3471_p6 = por %p4795_p3, %p75_p2  ;;  %p128_p7 = scmp.eq.s32.totalorder %s2518_s19, 1 }
   0xc   : > { %p3475_p8 = por %p122_p5, %p69_p0  ;;  %p2519_p9 = scmp.ge.s32.totalorder %s3382_s17, 1 }
   0xd   : > { %s4818_s21 = scalar_select %p3471_p6, 1, 0 }
   0xe   : > { %s4819_s22 = scalar_select %p3475_p8, 1, 0 }
   0xf   : > { %p3480_p10 = por %p128_p7, %p75_p2  ;;  %p135_p11 = scmp.lt.s32.totalorder %s3382_s17, 3 }
  0x10   : > { %s3384_s25 = smov [#allocation10]   ;;  %p2840_p1 = scmp.lt.s32.totalorder %s3382_s17, 2 }
  0x11   : > { %s4820_s23 = scalar_select %p3480_p10, 1, 0 }
  0x12   : > { %p3485_p12 = pnand %p2519_p9, %p135_p11  ;;  %s160_s26 = sshll.u32 %s3384_s25, 4  ;;  %s161_s26 = int_to_ptr.vmem [resolvable:$true] %s160_s26 }
  0x13   : > { %p3501_p2 = pnand %p2840_p1, %p3464_p4  ;;  %s3206_s4 = scalar_lea.hbm %s4793_s2, 512 }
  0x14   : > { %s4821_s24 = scalar_select %p3485_p12, 1, 0 }
  0x15   : > { %p2823_p13 = pneg %p3485_p12  ;;  %p3207_p7 = scmp.ne.s32.totalorder %s4793_s2, %s3206_s4 }
  0x16   : > { %s4823_s28 = scalar_select %p3501_p2, 1, 0 }
  0x17   : > { %p3495_p5 = pnand %p2823_p13, %p4795_p3  ;;  %p3213_p4 = scmp.lt.u32.totalorder %s3206_s4, %s4793_s2 }
  0x19   : > { %p3208_p9 = pneg %p3495_p5 }
  0x1b   : > { %p3209_p11 = pnand %p3208_p9, %p3207_p7 }
  0x1d   : > { %p3210_p13 = pneg %p3209_p11 }
  0x1f   : > { %p3215_p1 = pnand %p3213_p4, %p3210_p13 }
  0x21   : > { %3218 = shalt.err (!%p3215_p1)
}
  0x22   : > { %s3219_s9 = scalar_lea.vmem %s161_s26, 512  ;;  %p3227_p8 = scmp.lt.s32.totalorder %s161_s26, %s161_s26 }
  0x23   : > { %p3220_p0 = scmp.ne.s32.totalorder %s161_s26, %s3219_s9  ;;  %p3228_p6 = scmp.lt.s32.totalorder %s3219_s9, %s3219_s9 }
  0x25   : > { %p3222_p3 = pnand %p3220_p0, %p3208_p9  ;;  %p3229_p12 = por %p3228_p6, %p3227_p8 }
  0x27   : > { %p3223_p10 = pneg %p3222_p3 }
  0x29   : > { %p3230_p2 = pnand %p3229_p12, %p3223_p10 }
  0x2b   : > { %3233 = shalt.err (!%p3230_p2)
}
  0x2c   : > { %s3385_s10 = smov 128   ;;  %s3386_s11 = smov 8  }
  0x2d   : > { %2829 = dma.hbm_to_vmem [thread:$0]  (!%p3495_p5), %s4793_s2, 512, %s161_s26, [#allocation9], %s3385_s10, %s3385_s10, %s3386_s11  }
  0x2e   : > { %s3387_s25 = smov [#allocation5]   ;;  %s3234_s5 = scalar_lea.hbm %s4791_s0, 4608 }
  0x2f   : > { %s147_s29 = sshll.u32 %s3387_s25, 4  ;;  %p3235_p3 = scmp.ne.s32.totalorder %s4791_s0, %s3234_s5  ;;  %s148_s29 = int_to_ptr.vmem [resolvable:$true] %s147_s29 }
  0x30   : > { %p3241_p10 = scmp.lt.u32.totalorder %s3234_s5, %s4791_s0 }
  0x31   : > { %p3237_p6 = pnand %p3235_p3, %p3208_p9 }
  0x33   : > { %p3238_p8 = pneg %p3237_p6 }
  0x35   : > { %p3243_p12 = pnand %p3241_p10, %p3238_p8 }
  0x37   : > { %3246 = shalt.err (!%p3243_p12)
}
  0x38   : > { %s3247_s26 = scalar_lea.vmem %s148_s29, 4608  ;;  %p3255_p11 = scmp.lt.s32.totalorder %s148_s29, %s148_s29 }
  0x39   : > { %p3248_p0 = scmp.ne.s32.totalorder %s148_s29, %s3247_s26  ;;  %p3256_p13 = scmp.lt.s32.totalorder %s3247_s26, %s3247_s26 }
  0x3b   : > { %p3250_p2 = pnand %p3248_p0, %p3208_p9  ;;  %p3257_p4 = por %p3256_p13, %p3255_p11 }
  0x3d   : > { %p3251_p7 = pneg %p3250_p2 }
  0x3f   : > { %p3258_p1 = pnand %p3257_p4, %p3251_p7 }
  0x41   : > { %3261 = shalt.err (!%p3258_p1)
}
  0x42   : > { %s4800_s10 = smov 512   ;;  %s3389_s11 = smov 32  }
  0x43   : > { %2826 = dma.hbm_to_vmem [thread:$0]  (!%p3495_p5), %s4791_s0, 4608, %s148_s29, [#allocation6], %s4800_s10, %s4800_s10, %s3389_s11  }
  0x44   : > { %s62_s25 = sadd.s32 1, %s3370_s14  ;;  %s29_s30 = sadd.s32 1, %s3378_s16 }
  0x45   : > { %s174_s4 = sand.u32 1, %s3382_s17   ;;  %p30_p9 = scmp.ge.s32.totalorder %s29_s30, 2 }
  0x46   : > { %s176_s5 = sand.u32 1, %s3370_s14   ;;  %s2680_s6 = sshll.u32 %s3378_s16, 13 }
  0x47   : > { %s4859_s30 = smov (%p30_p9, %s29_s30), 0  ;;  %s2523_s27 = sshll.u32 %s176_s5, 9 }
  0x48   : > { %s3560_s9 = scalar_lea.hbm %s4792_s1, %s2680_s6  ;;  %s58_s29 = ssub.s32 %s3378_s16, %s4859_s30 }
  0x49   : > { %p60_p5 = scmp.eq.s32.totalorder %s58_s29, 0  ;;  %s178_s26 = scalar_lea.vmem [#allocation8], %s2523_s27 }
  0x4a   : > { %s188_s19 = sshll.u32 %s178_s26, 4  ;;  %s3569_s10 = scalar_lea.sflag [#allocation9], %s174_s4  ;;  %s3564_s19 = int_to_ptr.vmem [resolvable:$true] %s188_s19 }
  0x4b   : > { %s3567_s20 = scalar_select %p60_p5, %s3370_s14, %s62_s25  }
  0x4c   : > { %s3262_s5 = scalar_lea.hbm %s3560_s9, 8192  ;;  %p4824_p6 = scmp.ne.s32.totalorder %s4823_s28, 0 }
  0x4d   : > { %p3263_p3 = scmp.ne.s32.totalorder %s3560_s9, %s3262_s5  ;;  %s3267_s8 = scalar_lea.hbm %s4792_s1, 16384 }
  0x4e   : > { %p3264_p8 = pneg %p4824_p6  ;;  %p3268_p0 = scmp.lt.u32.totalorder %s3560_s9, %s4792_s1 }
  0x4f   : > { %p3269_p2 = scmp.lt.u32.totalorder %s3267_s8, %s3262_s5  ;;  %p3271_p11 = scmp.lt.u32.totalorder %s3262_s5, %s3560_s9 }
  0x50   : > { %p3265_p10 = pnand %p3264_p8, %p3263_p3 }
  0x51   : > { %p3270_p7 = por %p3269_p2, %p3268_p0 }
  0x52   : > { %p3266_p12 = pneg %p3265_p10 }
  0x53   : > { %p3272_p13 = por %p3271_p11, %p3270_p7 }
  0x55   : > { %p3273_p4 = pnand %p3272_p13, %p3266_p12 }
  0x57   : > { %3276 = shalt.err (!%p3273_p4)
}
  0x58   : > { %s3277_s25 = scalar_lea.vmem %s3564_s19, 8192  ;;  %s3390_s4 = smov [#allocation8]  }
  0x59   : > { %p3278_p1 = scmp.ne.s32.totalorder %s3564_s19, %s3277_s25  ;;  %s3282_s26 = sshll.u32 %s3390_s4, 4  ;;  %s3283_s26 = int_to_ptr.vmem [resolvable:$false] %s3282_s26 }
  0x5a   : > { %s3284_s6 = scalar_lea.vmem %s3283_s26, 16384  ;;  %p3285_p3 = scmp.lt.s32.totalorder %s3564_s19, %s3283_s26 }
  0x5b   : > { %p3280_p9 = pnand %p3278_p1, %p3264_p8  ;;  %p3286_p10 = scmp.lt.s32.totalorder %s3284_s6, %s3277_s25 }
  0x5d   : > { %p3281_p5 = pneg %p3280_p9  ;;  %p3287_p0 = por %p3286_p10, %p3285_p3 }
  0x5f   : > { %p3288_p2 = pnand %p3287_p0, %p3281_p5 }
  0x61   : > { %3291 = shalt.err (!%p3288_p2)
}
  0x62   : > { %s4825_s5 = smov 512   ;;  %p4826_p8 = scmp.ne.s32.totalorder %s4821_s24, 0 }
  0x63   : > { %2833 = dma.hbm_to_vmem [thread:$0]  (!%p4824_p6), %s3560_s9, 8192, %s3564_s19, %s3569_s10, %s4825_s5, %s4825_s5, %s3389_s11  }
  0x64   : > { %200 = sbr.rel (%p4826_p8) target bundleno = 1926 (0x786), region = 32 }
  0x6b   : > { %p4827_p12 = scmp.eq.s32.totalorder %s3455_s18, 0 }
  0x6d   : > { %3345 = dma.done.wait (%p4827_p12), [#allocation6], 4608   ;;  %p4828_p7 = pmov %p4827_p12 }
  0x6e   : > { %s206_s28 = sand.u32 1, %s3455_s18   ;;  %s3608_s7 = sand.u32 1, %s3366_s13  }
  0x6f   : > { %3347 = vsyncadd (%p4828_p7), [#allocation6], 4294962688  ;;  %s2529_s8 = sshll.u32 %s3608_s7, 9  ;;  %s207_s27 = scalar_lea.sflag [#allocation9], %s206_s28 }
  0x70   : > { %s3611_s29 = scalar_lea.vmem [#allocation8], %s2529_s8  ;;  %p4829_p6 = scmp.ne.s32.totalorder %s4818_s21, 0 }
  0x72   : > { %3349 = dma.done.wait (%p4829_p6), %s207_s27, 8192  }
  0x73   : > { %3351 = vsyncadd (%p4829_p6), %s207_s27, 4294959104  ;;  %p4830_p11 = pmov %p4828_p7 }
  0x74   : > { %p4831_p13 = pmov %p4828_p7 }
  0x75   : > { %3353 = dma.done.wait (%p4830_p11), [#allocation9], 512  }
  0x76   : > { %3355 = vsyncadd (%p4831_p13), [#allocation9], 4294966784  ;;  %s2531_s24 = sshll.u32 %s3608_s7, 7  ;;  %p2532_p4 = scmp.ne.s32.totalorder %s3374_s15, 0 }
  0x77   : > { %s3622_s10 = scalar_lea.vmem [#allocation11], %s2531_s24  ;;  %v3391_v0 = vmov (!%p2532_p4), 0.0  }
  0x78   : > { %242 = sbr.rel (%p2532_p4) target bundleno = 127 (0x7f), region = 48  ;;  %243 = vst [vmem:[#allocation2] sm:$0xff] (!%p2532_p4), %v3391_v0  ;;  %244 = vst [vmem:[#allocation2 + $0x8] sm:$0xff] (!%p2532_p4), %v3391_v0 }
  0x79   : > { %245 = vst [vmem:[#allocation2 + $0x10] sm:$0xff] (!%p2532_p4), %v3391_v0  ;;  %246 = vst [vmem:[#allocation2 + $0x18] sm:$0xff] (!%p2532_p4), %v3391_v0 }
  0x7a   : > { %247 = vst [vmem:[#allocation3] sm:$0xff] (!%p2532_p4), %v3391_v0  ;;  %248 = vst [vmem:[#allocation3 + $0x8] sm:$0xff] (!%p2532_p4), %v3391_v0 }
  0x7b   : > { %249 = vst [vmem:[#allocation3 + $0x10] sm:$0xff] (!%p2532_p4), %v3391_v0  ;;  %250 = vst [vmem:[#allocation3 + $0x18] sm:$0xff] (!%p2532_p4), %v3391_v0 }
  0x7f PF: > { %v3627_v2 = vld [vmem:[#allocation2] sm:$0xff]  ;;  %s3392_s18 = smov 17   ;;  %v3635_v4 = vld [vmem:[#allocation2 + $0x8] sm:$0xff]  ;;  %s3393_s21 = smov 16   ;;  %v4801_v5 = vmov 0.0   ;;  %v307_v6 = vlaneseq  ;;  %v3719_v23 = vld [vmem:[#allocation5 + $0x18] sm:$0xff] }
  0x80   : > { %v3625_v1 = vld [vmem:[#allocation2 + $0x10] sm:$0xff]  ;;  %299 = vrot.lane.b32.xlu0 %v3627_v2, %s3392_s18  ;;  %v3633_v3 = vld [vmem:[#allocation2 + $0x18] sm:$0xff]  ;;  %s3394_s11 = smov 15   ;;  %s3395_s9 = smov 1   ;;  %606 = vmatprep.mubr.f32.mxu0 %v4801_v5  ;;  %v3703_v12 = vld [vmem:[#allocation5 + $0x8] sm:$0xff]  ;;  %vm529_vm8 = vcmask 588800  }
  0x81   : > { %303 = vrot.lane.b32.xlu1 %v3625_v1, %s3392_s18  ;;  %s3396_s19 = smov 127   ;;  %s3397_s25 = smov 113   ;;  %695 = vmatprep.mubr.f32.mxu1 %v4801_v5  ;;  %v3699_v9 = vand.u32 127, %v307_v6  ;;  %v3705_v13 = vld [vmem:[#allocation5 + $0x28] sm:$0xff]  ;;  %v3713_v19 = vld [vmem:[#allocation5] sm:$0xff]  ;;  %v3725_v26 = vld [vmem:[#allocation5 + $0x38] sm:$0xff] }
  0x82   : > { %s3398_s4 = smov 112   ;;  %s3400_s26 = smov 111   ;;  %v3717_v22 = vld [vmem:[#allocation5 + $0x20] sm:$0xff]  ;;  %v3727_v27 = vld [vmem:[#allocation5 + $0x10] sm:$0xff]  ;;  %v3745_v48 = vld [vmem:[#allocation5 + $0x48] sm:$0xff] }
  0x83   : > { %vm309_vm0 = vcmp.lt.s32.totalorder %v3699_v9, 17  ;;  %vm326_vm1 = vcmp.lt.s32.totalorder %v3699_v9, 16  ;;  %v3729_v28 = vld [vmem:[#allocation5 + $0x30] sm:$0xff]  ;;  %vm343_vm2 = vcmp.lt.s32.totalorder %v3699_v9, 15  ;;  %vm360_vm3 = vcmp.lt.s32.totalorder %v3699_v9, 1  ;;  %v3749_v50 = vld [vmem:[#allocation5 + $0x68] sm:$0xff] }
  0x84   : > { %301 = vrot.lane.b32.xlu0 %v3635_v4, %s3392_s18  ;;  %v3751_v53 = vld [vmem:[#allocation5 + $0x40] sm:$0xff]  ;;  %v3758_v57 = vld [vmem:[#allocation5 + $0x50] sm:$0xff]  ;;  %v3760_v58 = vld [vmem:[#allocation5 + $0x58] sm:$0xff]  ;;  %vm381_vm4 = vcmp.lt.s32.totalorder %v3699_v9, 127  ;;  %vm415_vm5 = vcmp.lt.s32.totalorder %v3699_v9, 112  ;;  %vm398_vm6 = vcmp.lt.s32.totalorder %v3699_v9, 113 }
  0x85   : > { %305 = vrot.lane.b32.xlu1 %v3633_v3, %s3392_s18  ;;  %v3767_v62 = vld [vmem:[#allocation5 + $0x60] sm:$0xff]  ;;  %v3769_v63 = vld [vmem:[#allocation5 + $0x70] sm:$0xff]  ;;  %v3771_v0 = vld [vmem:[#allocation5 + $0x78] sm:$0xff]  ;;  %vm432_vm7 = vcmp.lt.s32.totalorder %v3699_v9, 111  ;;  %s2682_s6 = sshll.u32 %s3374_s15, 11  ;;  %s2409_s5 = sshll.u32 %s3622_s10, 4  ;;  %s4739_s5 = int_to_ptr.vmem [resolvable:$true] %s2409_s5 }
  0x86   : > { %s4737_s27 = scalar_lea.hbm %s4794_s3, %s2682_s6  ;;  %s2393_s15 = scalar_lea.sflag [#allocation7], %s3608_s7 }
  0x87   : > { %p4850_p9 = scmp.ne.s32.totalorder %s4819_s22, 0  ;;  %s3401_s24 = smov [#allocation11]  }
  0x88   : > { %318 = vrot.lane.b32.xlu0 %v3627_v2, %s3393_s21 }
  0x89   : > { %320 = vrot.lane.b32.xlu1 %v3635_v4, %s3393_s21 }
  0x8c   : > { %322 = vrot.lane.b32.xlu0 %v3625_v1, %s3393_s21 }
  0x8d   : > { %324 = vrot.lane.b32.xlu1 %v3633_v3, %s3393_s21 }
  0x90   : > { %335 = vrot.lane.b32.xlu0 %v3627_v2, %s3394_s11 }
  0x91   : > { %337 = vrot.lane.b32.xlu1 %v3635_v4, %s3394_s11 }
  0x94   : > { %339 = vrot.lane.b32.xlu0 %v3625_v1, %s3394_s11 }
  0x95   : > { %341 = vrot.lane.b32.xlu1 %v3633_v3, %s3394_s11 }
  0x98   : > { %352 = vrot.lane.b32.xlu0 %v3627_v2, %s3395_s9 }
  0x99   : > { %354 = vrot.lane.b32.xlu1 %v3635_v4, %s3395_s9 }
  0x9c   : > { %356 = vrot.lane.b32.xlu0 %v3625_v1, %s3395_s9 }
  0x9d   : > { %358 = vrot.lane.b32.xlu1 %v3633_v3, %s3395_s9 }
  0xa0   : > { %373 = vrot.lane.b32.xlu0 %v3627_v2, %s3396_s19 }
  0xa1   : > { %375 = vrot.lane.b32.xlu1 %v3635_v4, %s3396_s19 }
  0xa4   : > { %377 = vrot.lane.b32.xlu0 %v3625_v1, %s3396_s19 }
  0xa5   : > { %379 = vrot.lane.b32.xlu1 %v3633_v3, %s3396_s19 }
  0xa8   : > { %390 = vrot.lane.b32.xlu0 %v3627_v2, %s3397_s25 }
  0xa9   : > { %392 = vrot.lane.b32.xlu1 %v3635_v4, %s3397_s25 }
  0xac   : > { %394 = vrot.lane.b32.xlu0 %v3625_v1, %s3397_s25 }
  0xad   : > { %396 = vrot.lane.b32.xlu1 %v3633_v3, %s3397_s25 }
  0xb0   : > { %407 = vrot.lane.b32.xlu0 %v3627_v2, %s3398_s4 }
  0xb1   : > { %409 = vrot.lane.b32.xlu1 %v3635_v4, %s3398_s4 }
  0xb4   : > { %411 = vrot.lane.b32.xlu0 %v3625_v1, %s3398_s4 }
  0xb5   : > { %413 = vrot.lane.b32.xlu1 %v3633_v3, %s3398_s4 }
  0xb8   : > { %424 = vrot.lane.b32.xlu0 %v3627_v2, %s3400_s26 }
  0xb9   : > { %426 = vrot.lane.b32.xlu1 %v3635_v4, %s3400_s26 }
  0xbc   : > { %428 = vrot.lane.b32.xlu0 %v3625_v1, %s3400_s26 }
  0xbd   : > { %430 = vrot.lane.b32.xlu1 %v3633_v3, %s3400_s26 }
  0xf2   : > { %v300_v8 = vpop.permute.xlu0 %299 }
  0xf3   : > { %v304_v7 = vpop.permute.xlu1 %303 }
  0xf6   : > { %v302_v11 = vpop.permute.xlu0 %301 }
  0xf7   : > { %v306_v10 = vpop.permute.xlu1 %305  ;;  %v312_v14 = vsel %vm309_vm0, %v300_v8, %v302_v11  ;;  %v311_v25 = vsel %vm309_vm0, %v302_v11, %v304_v7 }
  0xf8   : > { %v313_v17 = vsel %vm309_vm0, %v306_v10, %v300_v8  ;;  %v478_v20 = vmul.f32 %v312_v14, %v3703_v12  ;;  %v310_v24 = vsel %vm309_vm0, %v304_v7, %v306_v10  ;;  %v479_v39 = vmul.f32 %v311_v25, %v3727_v27 }
  0xf9   : > { %v477_v32 = vmul.f32 %v313_v17, %v3713_v19  ;;  %v480_v36 = vmul.f32 %v310_v24, %v3719_v23 }
  0xfa   : > { %v319_v16 = vpop.permute.xlu0 %318 }
  0xfb   : > { %v321_v15 = vpop.permute.xlu1 %320 }
  0xfc   : > { %v329_v18 = vsel %vm326_vm1, %v319_v16, %v321_v15 }
  0xfd   : > { %v482_v21 = vmul.f32 %v329_v18, %v3705_v13 }
  0xfe   : > { %v323_v30 = vpop.permute.xlu0 %322 }
  0xff   : > { %v325_v29 = vpop.permute.xlu1 %324  ;;  %v2683_v31 = vpack.c.bf16 %v482_v21, %v478_v20  ;;  %v328_v34 = vsel %vm326_vm1, %v321_v15, %v323_v30 }
 0x100   : > { %v330_v33 = vsel %vm326_vm1, %v325_v29, %v319_v16  ;;  %v327_v35 = vsel %vm326_vm1, %v323_v30, %v325_v29  ;;  %v483_v40 = vmul.f32 %v328_v34, %v3729_v28  ;;  %v3790_v34 = vld [vmem:[#allocation5 + $0x98] sm:$0xff] }
 0x101   : > { %2684 = vmatprep.subr.bf16.mxu0 %v2683_v31  ;;  %v481_v37 = vmul.f32 %v330_v33, %v3717_v22  ;;  %v484_v38 = vmul.f32 %v327_v35, %v3725_v26  ;;  %v3788_v33 = vld [vmem:[#allocation5 + $0x88] sm:$0xff]  ;;  %v3792_v35 = vld [vmem:[#allocation5 + $0x90] sm:$0xff] }
 0x102   : > { %v336_v42 = vpop.permute.xlu0 %335  ;;  %v2701_v45 = vpack.c.bf16 %v483_v40, %v479_v39  ;;  %v3800_v39 = vld [vmem:[#allocation5 + $0xa8] sm:$0xff]  ;;  %v3802_v40 = vld [vmem:[#allocation5 + $0xb0] sm:$0xff] }
 0x103   : > { %v338_v41 = vpop.permute.xlu1 %337  ;;  %v2685_v43 = vpack.c.bf16 %v481_v37, %v477_v32  ;;  %v2699_v44 = vpack.c.bf16 %v484_v38, %v480_v36  ;;  %v3786_v32 = vld [vmem:[#allocation5 + $0x80] sm:$0xff]  ;;  %v3798_v38 = vld [vmem:[#allocation5 + $0xb8] sm:$0xff] }
 0x104   : > { %v346_v49 = vsel %vm343_vm2, %v336_v42, %v338_v41  ;;  %v3794_v36 = vld [vmem:[#allocation5 + $0xa0] sm:$0xff] }
 0x105   : > { %2686 = vmatpush1.bf16.msra.mxu0 %v2685_v43  ;;  %2700 = vmatprep.subr.bf16.mxu1 %v2699_v44  ;;  %v486_v56 = vmul.f32 %v346_v49, %v3745_v48  ;;  %v494_v43 = vmul.f32 %v3635_v4, %v3788_v33  ;;  %v496_v44 = vmul.f32 %v3633_v3, %v3790_v34 }
 0x106   : > { %2702 = vmatpush1.bf16.msra.mxu1 %v2701_v45  ;;  %v340_v47 = vpop.permute.xlu0 %339  ;;  %v493_v45 = vmul.f32 %v3627_v2, %v3786_v32 }
 0x107   : > { %v342_v46 = vpop.permute.xlu1 %341  ;;  %v345_v59 = vsel %vm343_vm2, %v338_v41, %v340_v47 }
 0x108   : > { %v347_v54 = vsel %vm343_vm2, %v342_v46, %v336_v42  ;;  %v344_v61 = vsel %vm343_vm2, %v340_v47, %v342_v46  ;;  %v487_v11 = vmul.f32 %v345_v59, %v3758_v57  ;;  %v495_v46 = vmul.f32 %v3625_v1, %v3792_v35 }
 0x109   : > { %v485_v6 = vmul.f32 %v347_v54, %v3751_v53  ;;  %v488_v17 = vmul.f32 %v344_v61, %v3760_v58 }
 0x10a   : > { %v353_v52 = vpop.permute.xlu0 %352 }
 0x10b   : > { %v355_v51 = vpop.permute.xlu1 %354 }
 0x10c   : > { %v363_v55 = vsel %vm360_vm3, %v353_v52, %v355_v51 }
 0x10d   : > { %v490_v60 = vmul.f32 %v363_v55, %v3749_v50 }
 0x10e   : > { %v357_v8 = vpop.permute.xlu0 %356 }
 0x10f   : > { %v359_v7 = vpop.permute.xlu1 %358  ;;  %v2687_v10 = vpack.c.bf16 %v490_v60, %v486_v56  ;;  %v362_v16 = vsel %vm360_vm3, %v355_v51, %v357_v8 }
 0x110   : > { %v364_v14 = vsel %vm360_vm3, %v359_v7, %v353_v52  ;;  %v361_v15 = vsel %vm360_vm3, %v357_v8, %v359_v7  ;;  %v491_v20 = vmul.f32 %v362_v16, %v3769_v63  ;;  %v3832_v16 = vld [vmem:[#allocation5 + $0xd0] sm:$0xff] }
 0x111   : > { %v489_v18 = vmul.f32 %v364_v14, %v3767_v62  ;;  %v492_v21 = vmul.f32 %v361_v15, %v3771_v0  ;;  %2688 = vmatprep.subr.bf16.mxu0 %v2687_v10  ;;  %v3824_v10 = vld [vmem:[#allocation5 + $0xd8] sm:$0xff]  ;;  %v3828_v14 = vld [vmem:[#allocation5 + $0xc8] sm:$0xff] }
 0x112   : > { %v374_v25 = vpop.permute.xlu0 %373  ;;  %v2705_v31 = vpack.c.bf16 %v491_v20, %v487_v11 }
 0x113   : > { %v376_v24 = vpop.permute.xlu1 %375  ;;  %v2689_v29 = vpack.c.bf16 %v489_v18, %v485_v6  ;;  %v2703_v30 = vpack.c.bf16 %v492_v21, %v488_v17  ;;  %v3834_v17 = vld [vmem:[#allocation5 + $0xe0] sm:$0xff]  ;;  %v3840_v21 = vld [vmem:[#allocation5 + $0xf8] sm:$0xff] }
 0x114   : > { %v384_v37 = vsel %vm381_vm4, %v374_v25, %v376_v24 }
 0x115   : > { %2690 = vmatpush1.bf16.msra.mxu0 %v2689_v29  ;;  %2704 = vmatprep.subr.bf16.mxu1 %v2703_v30  ;;  %v497_v47 = vmul.f32 %v384_v37, %v3794_v36  ;;  %v3846_v29 = vld [vmem:[#allocation5 + $0xc0] sm:$0xff] }
 0x116   : > { %2706 = vmatpush1.bf16.msra.mxu1 %v2705_v31  ;;  %v378_v42 = vpop.permute.xlu0 %377 }
 0x117   : > { %v380_v41 = vpop.permute.xlu1 %379  ;;  %v383_v4 = vsel %vm381_vm4, %v376_v24, %v378_v42  ;;  %v2693_v60 = vpack.c.bf16 %v497_v47, %v493_v45  ;;  %v3842_v24 = vld [vmem:[#allocation5 + $0xe8] sm:$0xff] }
 0x118   : > { %v385_v49 = vsel %vm381_vm4, %v380_v41, %v374_v25  ;;  %v382_v51 = vsel %vm381_vm4, %v378_v42, %v380_v41  ;;  %v498_v3 = vmul.f32 %v383_v4, %v3800_v39  ;;  %v3844_v25 = vld [vmem:[#allocation5 + $0xf0] sm:$0xff] }
 0x119   : > { %v500_v52 = vmul.f32 %v385_v49, %v3798_v38  ;;  %v499_v2 = vmul.f32 %v382_v51, %v3802_v40 }
 0x11a   : > { %v391_v55 = vpop.permute.xlu0 %390  ;;  %v2691_v1 = vpack.c.bf16 %v498_v3, %v494_v43 }
 0x11b   : > { %v393_v54 = vpop.permute.xlu1 %392  ;;  %v2707_v56 = vpack.c.bf16 %v500_v52, %v496_v44  ;;  %v2709_v59 = vpack.c.bf16 %v499_v2, %v495_v46 }
 0x11c   : > { %2692 = vmatprep.subr.bf16.mxu0 %v2691_v1  ;;  %v401_v30 = vsel %vm398_vm6, %v391_v55, %v393_v54 }
 0x11d   : > { %2708 = vmatprep.subr.bf16.mxu1 %v2707_v56  ;;  %2694 = vmatpush1.bf16.msra.mxu0 %v2693_v60  ;;  %v501_v52 = vmul.f32 %v401_v30, %v3846_v29  ;;  %v3867_v60 = vld [vmem:[#allocation5 + $0x108] sm:$0xff] }
 0x11e   : > { %2710 = vmatpush1.bf16.msra.mxu1 %v2709_v59  ;;  %v395_v6 = vpop.permute.xlu0 %394  ;;  %v3865_v59 = vld [vmem:[#allocation5 + $0x118] sm:$0xff] }
 0x11f   : > { %v397_v61 = vpop.permute.xlu1 %396  ;;  %v400_v15 = vsel %vm398_vm6, %v393_v54, %v395_v6 }
 0x120   : > { %v402_v11 = vsel %vm398_vm6, %v397_v61, %v391_v55  ;;  %v399_v20 = vsel %vm398_vm6, %v395_v6, %v397_v61  ;;  %v502_v37 = vmul.f32 %v400_v15, %v3828_v14  ;;  %v3869_v61 = vld [vmem:[#allocation5 + $0x110] sm:$0xff] }
 0x121   : > { %v504_v31 = vmul.f32 %v402_v11, %v3824_v10  ;;  %v503_v47 = vmul.f32 %v399_v20, %v3832_v16  ;;  %v3873_v11 = vld [vmem:[#allocation5 + $0x100] sm:$0xff] }
 0x122   : > { %v408_v8 = vpop.permute.xlu0 %407 }
 0x123   : > { %v410_v7 = vpop.permute.xlu1 %409 }
 0x124   : > { %v418_v18 = vsel %vm415_vm5, %v408_v8, %v410_v7 }
 0x125   : > { %v505_v43 = vmul.f32 %v418_v18, %v3834_v17 }
 0x126   : > { %v412_v42 = vpop.permute.xlu0 %411 }
 0x127   : > { %v414_v41 = vpop.permute.xlu1 %413  ;;  %v417_v46 = vsel %vm415_vm5, %v410_v7, %v412_v42  ;;  %v2697_v56 = vpack.c.bf16 %v505_v43, %v501_v52  ;;  %v3893_v43 = vld [vmem:[#allocation10 + $0x8] sm:$0xff] }
 0x128   : > { %v419_v44 = vsel %vm415_vm5, %v414_v41, %v408_v8  ;;  %v416_v45 = vsel %vm415_vm5, %v412_v42, %v414_v41  ;;  %v506_v51 = vmul.f32 %v417_v46, %v3842_v24  ;;  %v3885_v42 = vld [vmem:[#allocation10] sm:$0xff] }
 0x129   : > { %v508_v49 = vmul.f32 %v419_v44, %v3840_v21  ;;  %v507_v4 = vmul.f32 %v416_v45, %v3844_v25  ;;  %v3900_v44 = vld [vmem:[#allocation10 + $0x10] sm:$0xff]  ;;  %v3908_v45 = vld [vmem:[#allocation10 + $0x18] sm:$0xff]  ;;  %v513_v46 = vld [vmem:[%s3611_s29] sm:$0xff] }
 0x12a   : > { %v425_v2 = vpop.permute.xlu0 %424  ;;  %v2695_v54 = vpack.c.bf16 %v506_v51, %v502_v37  ;;  %4832 = vst [vmem:[#allocation16_spill] sm:$0xff] %v3908_v45  ;;  %v516_v51 = vld [vmem:[%s3611_s29 + $0x18] sm:$0xff] }
 0x12b   : > { %v427_v3 = vpop.permute.xlu1 %426  ;;  %v2711_v55 = vpack.c.bf16 %v508_v49, %v504_v31  ;;  %v2713_v1 = vpack.c.bf16 %v507_v4, %v503_v47  ;;  %v515_v47 = vld [vmem:[%s3611_s29 + $0x10] sm:$0xff]  ;;  %v514_v49 = vld [vmem:[%s3611_s29 + $0x8] sm:$0xff] }
 0x12c   : > { %2696 = vmatprep.subr.bf16.mxu0 %v2695_v54  ;;  %v435_v6 = vsel %vm432_vm7, %v425_v2, %v427_v3 }
 0x12d   : > { %2712 = vmatprep.subr.bf16.mxu1 %v2711_v55  ;;  %2698 = vmatpush1.bf16.msra.mxu0 %v2697_v56  ;;  %v509_v41 = vmul.f32 %v435_v6, %v3873_v11  ;;  %v517_v6 = vld [vmem:[%s3611_s29 + $0x20] sm:$0xff] }
 0x12e   : > { %2714 = vmatpush1.bf16.msra.mxu1 %v2713_v1  ;;  %v429_v8 = vpop.permute.xlu0 %428 }
 0x12f   : > { %v431_v7 = vpop.permute.xlu1 %430  ;;  %v434_v20 = vsel %vm432_vm7, %v427_v3, %v429_v8 }
 0x130   : > { %v436_v15 = vsel %vm432_vm7, %v431_v7, %v425_v2  ;;  %v433_v18 = vsel %vm432_vm7, %v429_v8, %v431_v7  ;;  %v510_v31 = vmul.f32 %v434_v20, %v3867_v60  ;;  %v519_v7 = vld [vmem:[%s3611_s29 + $0x30] sm:$0xff]  ;;  %v520_v20 = vld [vmem:[%s3611_s29 + $0x38] sm:$0xff] }
 0x131   : > { %v512_v30 = vmul.f32 %v436_v15, %v3865_v59  ;;  %v511_v37 = vmul.f32 %v433_v18, %v3869_v61  ;;  %v518_v18 = vld [vmem:[%s3611_s29 + $0x28] sm:$0xff] }
 0x132   : > { %558 = vmatprep.subr.mxu0 %v510_v31 }
 0x133   : > { %647 = vmatprep.subr.mxu1 %v512_v30  ;;  %559 = vmatpush1.msra.mxu0 %v509_v41 }
 0x134   : > { %648 = vmatpush1.msra.mxu1 %v511_v37  ;;  %2533 = vmatmul.mubr.msk.f32.vlgmr.msra.gmra.mrb[0].mxu0 %vm529_vm8, %v3885_v42 }
 0x135   : > { %2537 = vmatmul.mubr.msk.f32.vlgmr.msra.gmra.mrb[0].mxu1 %vm529_vm8, %v3885_v42  ;;  %612 = vmatprep.mubr.f32.mxu0 %v4801_v5 }
 0x136   : > { %701 = vmatprep.mubr.f32.mxu1 %v4801_v5 }
 0x138   : > { %2534 = vmatmul.mubr.msk.f32.gmra.mrb[2].mxu0 %vm529_vm8, %v3893_v43 }
 0x139   : > { %2538 = vmatmul.mubr.msk.f32.gmra.mrb[2].mxu1 %vm529_vm8, %v3893_v43  ;;  %618 = vmatprep.mubr.f32.mxu0 %v4801_v5 }
 0x13a   : > { %707 = vmatprep.mubr.f32.mxu1 %v4801_v5 }
 0x13c   : > { %2535 = vmatmul.mubr.msk.f32.gmra.mrb[4].mxu0 %vm529_vm8, %v3900_v44 }
 0x13d   : > { %2539 = vmatmul.mubr.msk.f32.gmra.mrb[4].mxu1 %vm529_vm8, %v3900_v44  ;;  %624 = vmatprep.mubr.f32.mxu0 %v4801_v5 }
 0x13e   : > { %713 = vmatprep.mubr.f32.mxu1 %v4801_v5 }
 0x140   : > { %2536 = vmatmul.mubr.msk.f32.gmra.mrb[6].mxu0 %vm529_vm8, %v3908_v45 }
 0x141   : > { %2540 = vmatmul.mubr.msk.f32.gmra.mrb[6].mxu1 %vm529_vm8, %v3908_v45  ;;  %1121 = vmatprep.mubr.f32.mxu0 %v4801_v5 }
 0x142   : > { %1210 = vmatprep.mubr.f32.mxu1 %v4801_v5 }
 0x207   : > { %v608_v4 = vpop.f32.mrb[0].mxu0 }
 0x208   : > { %v697_v52 = vpop.f32.mrb[0].mxu1  ;;  %v720_v3 = vadd.f32 %v608_v4, %v513_v46  ;;  %v610_v2 = vpop.f32.mrb[1].mxu0  ;;  %v521_v4 = vld [vmem:[%s3611_s29 + $0x40] sm:$0xff] }
 0x209   : > { %v722_v54 = vadd.f32 %v697_v52, %v515_v47  ;;  %v699_v55 = vpop.f32.mrb[1].mxu1  ;;  %v721_v1 = vadd.f32 %v610_v2, %v514_v49 }
 0x20a   : > { %v723_v56 = vadd.f32 %v699_v55, %v516_v51  ;;  %v2541_v8 = vmul.f32 -1.442695, %v720_v3 }
 0x20b   : > { %v2543_v15 = vmul.f32 -1.442695, %v722_v54  ;;  %v2542_v30 = vmul.f32 -1.442695, %v721_v1  ;;  %v614_v37 = vpop.f32.mrb[2].mxu0 }
 0x20c   : > { %v2544_v31 = vmul.f32 -1.442695, %v723_v56  ;;  %v703_v41 = vpop.f32.mrb[2].mxu1  ;;  %2910 = vpow2.f32 %v2541_v8  ;;  %v724_v5 = vadd.f32 %v614_v37, %v517_v6  ;;  %v616_v46 = vpop.f32.mrb[3].mxu0  ;;  %v522_v6 = vld [vmem:[%s3611_s29 + $0x48] sm:$0xff] }
 0x20d   : > { %v726_v45 = vadd.f32 %v703_v41, %v519_v7  ;;  %v705_v47 = vpop.f32.mrb[3].mxu1  ;;  %2912 = vpow2.f32 %v2542_v30  ;;  %v725_v49 = vadd.f32 %v616_v46, %v518_v18  ;;  %v525_v18 = vld [vmem:[%s3611_s29 + $0x60] sm:$0xff]  ;;  %v526_v37 = vld [vmem:[%s3611_s29 + $0x68] sm:$0xff] }
 0x20e   : > { %v727_v51 = vadd.f32 %v705_v47, %v520_v20  ;;  %2914 = vpow2.f32 %v2543_v15  ;;  %v2545_v52 = vmul.f32 -1.442695, %v724_v5  ;;  %v523_v20 = vld [vmem:[%s3611_s29 + $0x50] sm:$0xff] }
 0x20f   : > { %v2547_v3 = vmul.f32 -1.442695, %v726_v45  ;;  %2916 = vpow2.f32 %v2544_v31  ;;  %v2546_v2 = vmul.f32 -1.442695, %v725_v49  ;;  %v620_v55 = vpop.f32.mrb[4].mxu0 }
 0x210   : > { %v2548_v54 = vmul.f32 -1.442695, %v727_v51  ;;  %v709_v1 = vpop.f32.mrb[4].mxu1  ;;  %2918 = vpow2.f32 %v2545_v52  ;;  %v728_v56 = vadd.f32 %v620_v55, %v521_v4  ;;  %v622_v7 = vpop.f32.mrb[5].mxu0 }
 0x211   : > { %v711_v8 = vpop.f32.mrb[5].mxu1  ;;  %2920 = vpow2.f32 %v2547_v3  ;;  %v729_v5 = vadd.f32 %v622_v7, %v522_v6  ;;  %v730_v46 = vadd.f32 %v709_v1, %v523_v20 }
 0x212   : > { %2922 = vpow2.f32 %v2546_v2  ;;  %v2549_v30 = vmul.f32 -1.442695, %v728_v56 }
 0x213   : > { %2924 = vpow2.f32 %v2548_v54  ;;  %v626_v45 = vpop.f32.mrb[6].mxu0  ;;  %v2550_v3 = vmul.f32 -1.442695, %v729_v5  ;;  %v2551_v56 = vmul.f32 -1.442695, %v730_v46  ;;  %v524_v54 = vld [vmem:[%s3611_s29 + $0x58] sm:$0xff] }
 0x214   : > { %v715_v15 = vpop.f32.mrb[6].mxu1  ;;  %v732_v31 = vadd.f32 %v626_v45, %v525_v18  ;;  %v628_v41 = vpop.f32.mrb[7].mxu0  ;;  %2926 = vpow2.f32 %v2549_v30  ;;  %v731_v30 = vadd.f32 %v711_v8, %v524_v54  ;;  %v527_v46 = vld [vmem:[%s3611_s29 + $0x70] sm:$0xff] }
 0x215   : > { %v717_v47 = vpop.f32.mrb[7].mxu1  ;;  %v733_v49 = vadd.f32 %v628_v41, %v526_v37 }
 0x216   : > { %v2911_v51 = vpop.eup %2910  ;;  %2928 = vtanh.f32 %v732_v31 }
 0x217   : > { %v2913_v4 = vpop.eup %2912  ;;  %v772_v52 = vadd.f32 1.0, %v2911_v51  ;;  %2930 = vtanh.f32 %v733_v49  ;;  %v2552_v51 = vmul.f32 -1.442695, %v731_v30 }
 0x218   : > { %v2915_v55 = vpop.eup %2914  ;;  %v773_v2 = vadd.f32 1.0, %v2913_v4  ;;  %v528_v4 = vld [vmem:[%s3611_s29 + $0x78] sm:$0xff] }
 0x219   : > { %v2917_v6 = vpop.eup %2916  ;;  %2932 = vrcp.f32 %v772_v52  ;;  %v774_v18 = vadd.f32 1.0, %v2915_v55  ;;  %v734_v55 = vadd.f32 %v715_v15, %v527_v46  ;;  %v735_v8 = vadd.f32 %v717_v47, %v528_v4 }
 0x21a   : > { %v2919_v7 = vpop.eup %2918  ;;  %2934 = vrcp.f32 %v773_v2  ;;  %v775_v31 = vadd.f32 1.0, %v2917_v6 }
 0x21b   : > { %v2921_v1 = vpop.eup %2920  ;;  %v776_v20 = vadd.f32 1.0, %v2919_v7  ;;  %2936 = vpow2.f32 %v2550_v3 }
 0x21c   : > { %v2923_v37 = vpop.eup %2922  ;;  %v778_v45 = vadd.f32 1.0, %v2921_v1  ;;  %2938 = vpow2.f32 %v2551_v56  ;;  %v295_v1 = vld [vmem:[#allocation3] sm:$0xff] }
 0x21d   : > { %v2925_v5 = vpop.eup %2924  ;;  %2940 = vrcp.f32 %v776_v20  ;;  %v777_v41 = vadd.f32 1.0, %v2923_v37  ;;  %v296_v37 = vld [vmem:[#allocation3 + $0x8] sm:$0xff] }
 0x21e   : > { %2942 = vrcp.f32 %v774_v18  ;;  %v779_v49 = vadd.f32 1.0, %v2925_v5  ;;  %v2927_v52 = vpop.eup %2926 }
 0x21f   : > { %2944 = vrcp.f32 %v777_v41  ;;  %v780_v5 = vadd.f32 1.0, %v2927_v52 }
 0x220   : > { %2946 = vrcp.f32 %v778_v45  ;;  %v2929_v2 = vpop.eup %2928 }
 0x221   : > { %2948 = vrcp.f32 %v775_v31  ;;  %v2931_v3 = vpop.eup %2930 }
 0x222   : > { %2950 = vrcp.f32 %v779_v49  ;;  %v297_v49 = vld [vmem:[#allocation3 + $0x10] sm:$0xff] }
 0x223   : > { %v2933_v54 = vpop.eup %2932  ;;  %2952 = vpow2.f32 %v2552_v51 }
 0x224   : > { %v2935_v56 = vpop.eup %2934  ;;  %v816_v6 = vmul.f32 %v2933_v54, %v2929_v2  ;;  %2954 = vtanh.f32 %v734_v55  ;;  %v298_v2 = vld [vmem:[#allocation3 + $0x18] sm:$0xff] }
 0x225   : > { %v2937_v7 = vpop.eup %2936  ;;  %v817_v18 = vmul.f32 %v2935_v56, %v2931_v3  ;;  %2956 = vtanh.f32 %v735_v8 }
 0x226   : > { %v2939_v20 = vpop.eup %2938  ;;  %v781_v31 = vadd.f32 1.0, %v2937_v7  ;;  %2958 = vrcp.f32 %v780_v5 }
 0x227   : > { %v2941_v30 = vpop.eup %2940  ;;  %v782_v52 = vadd.f32 1.0, %v2939_v20 }
 0x228   : > { %v2943_v45 = vpop.eup %2942  ;;  %v812_v15 = vmul.f32 %v2941_v30, %v295_v1 }
 0x229   : > { %v2945_v41 = vpop.eup %2944 }
 0x22a   : > { %v2947_v46 = vpop.eup %2946  ;;  %v813_v47 = vmul.f32 %v2945_v41, %v296_v37  ;;  %v3933_v4 = vadd.f32 %v816_v6, %v812_v15 }
 0x22b   : > { %v2949_v51 = vpop.eup %2948  ;;  %v814_v54 = vmul.f32 %v2947_v46, %v297_v49 }
 0x22c   : > { %v2951_v55 = vpop.eup %2950  ;;  %2960 = vtanh.f32 %v3933_v4  ;;  %v3936_v3 = vadd.f32 %v817_v18, %v813_v47 }
 0x22d   : > { %v2953_v8 = vpop.eup %2952  ;;  %2962 = vrcp.f32 %v781_v31  ;;  %v815_v1 = vmul.f32 %v2951_v55, %v298_v2 }
 0x22e   : > { %v2955_v56 = vpop.eup %2954  ;;  %2964 = vtanh.f32 %v3936_v3  ;;  %v783_v7 = vadd.f32 1.0, %v2953_v8 }
 0x22f   : > { %v818_v6 = vmul.f32 %v2955_v56, %v2943_v45  ;;  %v2957_v30 = vpop.eup %2956  ;;  %2966 = vrcp.f32 %v782_v52 }
 0x230   : > { %v819_v5 = vmul.f32 %v2957_v30, %v2949_v51  ;;  %2968 = vrcp.f32 %v783_v7  ;;  %v2959_v15 = vpop.eup %2958 }
 0x231   : > { %v3939_v37 = vadd.f32 %v818_v6, %v814_v54 }
 0x232   : > { %v3942_v18 = vadd.f32 %v819_v5, %v815_v1 }
 0x233   : > { %4833 = vst [vmem:[#allocation17_spill] sm:$0xff] %v3939_v37  ;;  %2970 = vtanh.f32 %v3939_v37 }
 0x234   : > { %4834 = vst [vmem:[#allocation18_spill] sm:$0xff] %v3942_v18  ;;  %2972 = vtanh.f32 %v3942_v18 }
 0x236   : > { %v2961_v20 = vpop.eup %2960 }
 0x237   : > { %v2963_v41 = vpop.eup %2962  ;;  %v3945_v31 = vmul.f32 %v2961_v20, %v2959_v15 }
 0x238   : > { %v2965_v45 = vpop.eup %2964 }
 0x239   : > { %832 = vst [vmem:[%s3622_s10] sm:$0xff] %v3945_v31  ;;  %v3949_v46 = vmul.f32 %v2965_v45, %v2963_v41  ;;  %836 = vrot.lane.b32.xlu0 %v3945_v31, %s3392_s18  ;;  %v2967_v49 = vpop.eup %2966 }
 0x23a   : > { %v2969_v47 = vpop.eup %2968 }
 0x23b   : > { %833 = vst [vmem:[%s3622_s10 + $0x8] sm:$0xff] %v3949_v46  ;;  %838 = vrot.lane.b32.xlu1 %v3949_v46, %s3392_s18 }
 0x23d   : > { %v2971_v51 = vpop.eup %2970 }
 0x23e   : > { %v3957_v55 = vmul.f32 %v2971_v51, %v2967_v49  ;;  %v2973_v2 = vpop.eup %2972 }
 0x23f   : > { %v3961_v8 = vmul.f32 %v2973_v2, %v2969_v47 }
 0x240   : > { %834 = vst [vmem:[%s3622_s10 + $0x10] sm:$0xff] %v3957_v55  ;;  %840 = vrot.lane.b32.xlu0 %v3957_v55, %s3392_s18 }
 0x241   : > { %835 = vst [vmem:[%s3622_s10 + $0x18] sm:$0xff] %v3961_v8  ;;  %842 = vrot.lane.b32.xlu1 %v3961_v8, %s3392_s18 }
 0x244   : > { %852 = vrot.lane.b32.xlu0 %v3945_v31, %s3393_s21 }
 0x245   : > { %854 = vrot.lane.b32.xlu1 %v3949_v46, %s3393_s21 }
 0x248   : > { %856 = vrot.lane.b32.xlu0 %v3957_v55, %s3393_s21 }
 0x249   : > { %858 = vrot.lane.b32.xlu1 %v3961_v8, %s3393_s21 }
 0x24c   : > { %868 = vrot.lane.b32.xlu0 %v3945_v31, %s3394_s11 }
 0x24d   : > { %870 = vrot.lane.b32.xlu1 %v3949_v46, %s3394_s11 }
 0x250   : > { %872 = vrot.lane.b32.xlu0 %v3957_v55, %s3394_s11 }
 0x251   : > { %874 = vrot.lane.b32.xlu1 %v3961_v8, %s3394_s11 }
 0x254   : > { %884 = vrot.lane.b32.xlu0 %v3945_v31, %s3395_s9 }
 0x255   : > { %886 = vrot.lane.b32.xlu1 %v3949_v46, %s3395_s9 }
 0x258   : > { %888 = vrot.lane.b32.xlu0 %v3957_v55, %s3395_s9 }
 0x259   : > { %890 = vrot.lane.b32.xlu1 %v3961_v8, %s3395_s9 }
 0x25c   : > { %904 = vrot.lane.b32.xlu0 %v3945_v31, %s3396_s19 }
 0x25d   : > { %906 = vrot.lane.b32.xlu1 %v3949_v46, %s3396_s19 }
 0x260   : > { %908 = vrot.lane.b32.xlu0 %v3957_v55, %s3396_s19 }
 0x261   : > { %910 = vrot.lane.b32.xlu1 %v3961_v8, %s3396_s19 }
 0x264   : > { %920 = vrot.lane.b32.xlu0 %v3945_v31, %s3397_s25 }
 0x265   : > { %922 = vrot.lane.b32.xlu1 %v3949_v46, %s3397_s25 }
 0x268   : > { %924 = vrot.lane.b32.xlu0 %v3957_v55, %s3397_s25 }
 0x269   : > { %926 = vrot.lane.b32.xlu1 %v3961_v8, %s3397_s25 }
 0x26c   : > { %936 = vrot.lane.b32.xlu0 %v3945_v31, %s3398_s4 }
 0x26d   : > { %938 = vrot.lane.b32.xlu1 %v3949_v46, %s3398_s4 }
 0x270   : > { %940 = vrot.lane.b32.xlu0 %v3957_v55, %s3398_s4 }
 0x271   : > { %942 = vrot.lane.b32.xlu1 %v3961_v8, %s3398_s4 }
 0x274   : > { %952 = vrot.lane.b32.xlu0 %v3945_v31, %s3400_s26 }
 0x275   : > { %954 = vrot.lane.b32.xlu1 %v3949_v46, %s3400_s26 }
 0x278   : > { %956 = vrot.lane.b32.xlu0 %v3957_v55, %s3400_s26 }
 0x279   : > { %958 = vrot.lane.b32.xlu1 %v3961_v8, %s3400_s26 }
 0x2ab   : > { %v837_v54 = vpop.permute.xlu0 %836 }
 0x2ad   : > { %v839_v52 = vpop.permute.xlu1 %838 }
 0x2ae   : > { %v846_v6 = vsel %vm309_vm0, %v837_v54, %v839_v52 }
 0x2af   : > { %v1005_v15 = vmul.f32 %v846_v6, %v3703_v12 }
 0x2b2   : > { %v841_v56 = vpop.permute.xlu0 %840 }
 0x2b3   : > { %v843_v7 = vpop.permute.xlu1 %842  ;;  %v845_v51 = vsel %vm309_vm0, %v839_v52, %v841_v56 }
 0x2b4   : > { %v844_v45 = vsel %vm309_vm0, %v841_v56, %v843_v7  ;;  %v847_v49 = vsel %vm309_vm0, %v843_v7, %v837_v54  ;;  %v1006_v56 = vmul.f32 %v845_v51, %v3727_v27 }
 0x2b5   : > { %v1004_v6 = vmul.f32 %v847_v49, %v3713_v19  ;;  %v1007_v54 = vmul.f32 %v844_v45, %v3719_v23 }
 0x2b6   : > { %v853_v1 = vpop.permute.xlu0 %852 }
 0x2b7   : > { %v855_v30 = vpop.permute.xlu1 %854 }
 0x2b8   : > { %v862_v5 = vsel %vm326_vm1, %v853_v1, %v855_v30 }
 0x2b9   : > { %v1009_v20 = vmul.f32 %v862_v5, %v3705_v13 }
 0x2ba   : > { %v857_v41 = vpop.permute.xlu0 %856 }
 0x2bb   : > { %v861_v47 = vsel %vm326_vm1, %v855_v30, %v857_v41  ;;  %v859_v2 = vpop.permute.xlu1 %858  ;;  %v2715_v18 = vpack.c.bf16 %v1009_v20, %v1005_v15 }
 0x2bc   : > { %v1010_v37 = vmul.f32 %v861_v47, %v3729_v28  ;;  %v860_v12 = vsel %vm326_vm1, %v857_v41, %v859_v2  ;;  %v863_v13 = vsel %vm326_vm1, %v859_v2, %v853_v1 }
 0x2bd   : > { %v1008_v7 = vmul.f32 %v863_v13, %v3717_v22  ;;  %v1011_v30 = vmul.f32 %v860_v12, %v3725_v26  ;;  %2716 = vmatprep.subr.bf16.mxu0 %v2715_v18 }
 0x2be   : > { %v869_v52 = vpop.permute.xlu0 %868  ;;  %v2733_v20 = vpack.c.bf16 %v1010_v37, %v1006_v56 }
 0x2bf   : > { %v2717_v5 = vpack.c.bf16 %v1008_v7, %v1004_v6  ;;  %v871_v28 = vpop.permute.xlu1 %870  ;;  %v2731_v15 = vpack.c.bf16 %v1011_v30, %v1007_v54 }
 0x2c0   : > { %v878_v23 = vsel %vm343_vm2, %v869_v52, %v871_v28 }
 0x2c1   : > { %2718 = vmatpush1.bf16.msra.mxu0 %v2717_v5  ;;  %2732 = vmatprep.subr.bf16.mxu1 %v2731_v15  ;;  %v1013_v18 = vmul.f32 %v878_v23, %v3745_v48 }
 0x2c2   : > { %v873_v41 = vpop.permute.xlu0 %872  ;;  %2734 = vmatpush1.bf16.msra.mxu1 %v2733_v20 }
 0x2c3   : > { %v875_v1 = vpop.permute.xlu1 %874  ;;  %v877_v51 = vsel %vm343_vm2, %v871_v28, %v873_v41 }
 0x2c4   : > { %v876_v37 = vsel %vm343_vm2, %v873_v41, %v875_v1  ;;  %v879_v49 = vsel %vm343_vm2, %v875_v1, %v869_v52  ;;  %v1014_v56 = vmul.f32 %v877_v51, %v3758_v57  ;;  %v1021_v57 = vmul.f32 %v3949_v46, %v3788_v33 }
 0x2c5   : > { %v1012_v6 = vmul.f32 %v879_v49, %v3751_v53  ;;  %v1015_v54 = vmul.f32 %v876_v37, %v3760_v58  ;;  %v1020_v1 = vmul.f32 %v3945_v31, %v3786_v32  ;;  %v1023_v33 = vmul.f32 %v3961_v8, %v3790_v34 }
 0x2c6   : > { %v885_v19 = vpop.permute.xlu0 %884 }
 0x2c7   : > { %v887_v22 = vpop.permute.xlu1 %886 }
 0x2c8   : > { %v894_v26 = vsel %vm360_vm3, %v885_v19, %v887_v22 }
 0x2c9   : > { %v1017_v27 = vmul.f32 %v894_v26, %v3749_v50 }
 0x2ca   : > { %v889_v45 = vpop.permute.xlu0 %888 }
 0x2cb   : > { %v893_v47 = vsel %vm360_vm3, %v887_v22, %v889_v45  ;;  %v891_v2 = vpop.permute.xlu1 %890  ;;  %v2719_v12 = vpack.c.bf16 %v1017_v27, %v1013_v18 }
 0x2cc   : > { %v1018_v13 = vmul.f32 %v893_v47, %v3769_v63  ;;  %v892_v48 = vsel %vm360_vm3, %v889_v45, %v891_v2  ;;  %v895_v50 = vsel %vm360_vm3, %v891_v2, %v885_v19  ;;  %v1022_v19 = vmul.f32 %v3957_v55, %v3792_v35 }
 0x2cd   : > { %v1016_v7 = vmul.f32 %v895_v50, %v3767_v62  ;;  %v1019_v30 = vmul.f32 %v892_v48, %v3771_v0  ;;  %2720 = vmatprep.subr.bf16.mxu0 %v2719_v12 }
 0x2ce   : > { %v905_v52 = vpop.permute.xlu0 %904  ;;  %v2737_v15 = vpack.c.bf16 %v1018_v13, %v1014_v56 }
 0x2cf   : > { %v2721_v5 = vpack.c.bf16 %v1016_v7, %v1012_v6  ;;  %v907_v63 = vpop.permute.xlu1 %906  ;;  %v2735_v28 = vpack.c.bf16 %v1019_v30, %v1015_v54 }
 0x2d0   : > { %v914_v20 = vsel %vm381_vm4, %v905_v52, %v907_v63 }
 0x2d1   : > { %2722 = vmatpush1.bf16.msra.mxu0 %v2721_v5  ;;  %2736 = vmatprep.subr.bf16.mxu1 %v2735_v28  ;;  %v1024_v58 = vmul.f32 %v914_v20, %v3794_v36 }
 0x2d2   : > { %v909_v53 = vpop.permute.xlu0 %908  ;;  %2738 = vmatpush1.bf16.msra.mxu1 %v2737_v15 }
 0x2d3   : > { %v913_v62 = vsel %vm381_vm4, %v907_v63, %v909_v53  ;;  %v911_v41 = vpop.permute.xlu1 %910  ;;  %v2725_v46 = vpack.c.bf16 %v1024_v58, %v1020_v1 }
 0x2d4   : > { %v1025_v0 = vmul.f32 %v913_v62, %v3800_v39  ;;  %v912_v23 = vsel %vm381_vm4, %v909_v53, %v911_v41  ;;  %v915_v36 = vsel %vm381_vm4, %v911_v41, %v905_v52  ;;  %v2556_v41 = vld [vmem:[%s3611_s29 + $0x98] sm:$0xff] }
 0x2d5   : > { %v1026_v22 = vmul.f32 %v912_v23, %v3802_v40  ;;  %v1027_v39 = vmul.f32 %v915_v36, %v3798_v38 }
 0x2d6   : > { %v921_v26 = vpop.permute.xlu0 %920  ;;  %v2723_v18 = vpack.c.bf16 %v1025_v0, %v1021_v57 }
 0x2d7   : > { %v2741_v32 = vpack.c.bf16 %v1026_v22, %v1022_v19  ;;  %v923_v31 = vpop.permute.xlu1 %922  ;;  %v2739_v35 = vpack.c.bf16 %v1027_v39, %v1023_v33  ;;  %v2557_v19 = vld [vmem:[%s3611_s29 + $0xa0] sm:$0xff]  ;;  %v2558_v39 = vld [vmem:[%s3611_s29 + $0xa8] sm:$0xff] }
 0x2d8   : > { %2724 = vmatprep.subr.bf16.mxu0 %v2723_v18  ;;  %v930_v34 = vsel %vm398_vm6, %v921_v26, %v923_v31 }
 0x2d9   : > { %2726 = vmatpush1.bf16.msra.mxu0 %v2725_v46  ;;  %2740 = vmatprep.subr.bf16.mxu1 %v2739_v35  ;;  %v1028_v50 = vmul.f32 %v930_v34, %v3846_v29  ;;  %v2559_v46 = vld [vmem:[%s3611_s29 + $0xb0] sm:$0xff] }
 0x2da   : > { %v925_v55 = vpop.permute.xlu0 %924  ;;  %2742 = vmatpush1.bf16.msra.mxu1 %v2741_v32 }
 0x2db   : > { %v927_v27 = vpop.permute.xlu1 %926  ;;  %v929_v38 = vsel %vm398_vm6, %v923_v31, %v925_v55 }
 0x2dc   : > { %v928_v8 = vsel %vm398_vm6, %v925_v55, %v927_v27  ;;  %v931_v47 = vsel %vm398_vm6, %v927_v27, %v921_v26  ;;  %v1029_v12 = vmul.f32 %v929_v38, %v3828_v14  ;;  %v2560_v55 = vld [vmem:[%s3611_s29 + $0xb8] sm:$0xff]  ;;  %v2561_v38 = vld [vmem:[%s3611_s29 + $0xc0] sm:$0xff] }
 0x2dd   : > { %v1030_v6 = vmul.f32 %v928_v8, %v3832_v16 }
 0x2de   : > { %v937_v45 = vpop.permute.xlu0 %936 }
 0x2df   : > { %v939_v37 = vpop.permute.xlu1 %938 }
 0x2e0   : > { %v946_v40 = vsel %vm415_vm5, %v937_v45, %v939_v37 }
 0x2e1   : > { %v1032_v51 = vmul.f32 %v946_v40, %v3834_v17  ;;  %v1031_v17 = vmul.f32 %v931_v47, %v3824_v10 }
 0x2e2   : > { %v941_v49 = vpop.permute.xlu0 %940 }
 0x2e3   : > { %v945_v2 = vsel %vm415_vm5, %v939_v37, %v941_v49  ;;  %v943_v48 = vpop.permute.xlu1 %942 }
 0x2e4   : > { %v1033_v13 = vmul.f32 %v945_v2, %v3842_v24  ;;  %v944_v54 = vsel %vm415_vm5, %v941_v49, %v943_v48  ;;  %v947_v7 = vsel %vm415_vm5, %v943_v48, %v937_v45  ;;  %v2729_v24 = vpack.c.bf16 %v1032_v51, %v1028_v50  ;;  %v2562_v49 = vld [vmem:[%s3611_s29 + $0xc8] sm:$0xff] }
 0x2e5   : > { %v1034_v30 = vmul.f32 %v944_v54, %v3844_v25  ;;  %v1035_v52 = vmul.f32 %v947_v7, %v3840_v21  ;;  %v2565_v54 = vld [vmem:[%s3611_s29 + $0xe0] sm:$0xff]  ;;  %v2563_v7 = vld [vmem:[%s3611_s29 + $0xd0] sm:$0xff] }
 0x2e6   : > { %v953_v14 = vpop.permute.xlu0 %952  ;;  %v2727_v56 = vpack.c.bf16 %v1033_v13, %v1029_v12 }
 0x2e7   : > { %v2745_v5 = vpack.c.bf16 %v1034_v30, %v1030_v6  ;;  %v955_v63 = vpop.permute.xlu1 %954  ;;  %v2743_v29 = vpack.c.bf16 %v1035_v52, %v1031_v17  ;;  %v2566_v52 = vld [vmem:[%s3611_s29 + $0xe8] sm:$0xff] }
 0x2e8   : > { %2728 = vmatprep.subr.bf16.mxu0 %v2727_v56  ;;  %v962_v16 = vsel %vm432_vm7, %v953_v14, %v955_v63 }
 0x2e9   : > { %2730 = vmatpush1.bf16.msra.mxu0 %v2729_v24  ;;  %2744 = vmatprep.subr.bf16.mxu1 %v2743_v29  ;;  %v1036_v15 = vmul.f32 %v962_v16, %v3873_v11  ;;  %v2554_v11 = vld [vmem:[%s3611_s29 + $0x88] sm:$0xff] }
 0x2ea   : > { %v957_v28 = vpop.permute.xlu0 %956  ;;  %2746 = vmatpush1.bf16.msra.mxu1 %v2745_v5 }
 0x2eb   : > { %v961_v10 = vsel %vm432_vm7, %v955_v63, %v957_v28  ;;  %v959_v21 = vpop.permute.xlu1 %958 }
 0x2ec   : > { %v1037_v25 = vmul.f32 %v961_v10, %v3867_v60  ;;  %v960_v20 = vsel %vm432_vm7, %v957_v28, %v959_v21  ;;  %v963_v53 = vsel %vm432_vm7, %v959_v21, %v953_v14  ;;  %v4835_v60 = vmov 0.0  }
 0x2ed   : > { %v1038_v58 = vmul.f32 %v960_v20, %v3869_v61  ;;  %v1039_v62 = vmul.f32 %v963_v53, %v3865_v59  ;;  %v4836_v59 = vld [vmem:[#allocation16_spill] sm:$0xff] }
 0x2ee   : > { %1073 = vmatprep.subr.mxu0 %v1037_v25  ;;  %v2553_v61 = vld [vmem:[%s3611_s29 + $0x80] sm:$0xff] }
 0x2ef   : > { %1074 = vmatpush1.msra.mxu0 %v1036_v15  ;;  %1162 = vmatprep.subr.mxu1 %v1039_v62  ;;  %v2564_v62 = vld [vmem:[%s3611_s29 + $0xd8] sm:$0xff] }
 0x2f0   : > { %2569 = vmatmul.mubr.msk.f32.vlgmr.msra.gmra.mrb[8].mxu0 %vm529_vm8, %v3885_v42  ;;  %1163 = vmatpush1.msra.mxu1 %v1038_v58 }
 0x2f1   : > { %1127 = vmatprep.mubr.f32.mxu0 %v4835_v60  ;;  %2573 = vmatmul.mubr.msk.f32.vlgmr.msra.gmra.mrb[8].mxu1 %vm529_vm8, %v3885_v42 }
 0x2f2   : > { %1216 = vmatprep.mubr.f32.mxu1 %v4835_v60 }
 0x2f4   : > { %2570 = vmatmul.mubr.msk.f32.gmra.mrb[10].mxu0 %vm529_vm8, %v3893_v43 }
 0x2f5   : > { %1133 = vmatprep.mubr.f32.mxu0 %v4835_v60  ;;  %2574 = vmatmul.mubr.msk.f32.gmra.mrb[10].mxu1 %vm529_vm8, %v3893_v43  ;;  %v2555_v43 = vld [vmem:[%s3611_s29 + $0x90] sm:$0xff] }
 0x2f6   : > { %1222 = vmatprep.mubr.f32.mxu1 %v4835_v60 }
 0x2f8   : > { %2571 = vmatmul.mubr.msk.f32.gmra.mrb[12].mxu0 %vm529_vm8, %v3900_v44 }
 0x2f9   : > { %1139 = vmatprep.mubr.f32.mxu0 %v4835_v60  ;;  %2575 = vmatmul.mubr.msk.f32.gmra.mrb[12].mxu1 %vm529_vm8, %v3900_v44 }
 0x2fa   : > { %1228 = vmatprep.mubr.f32.mxu1 %v4835_v60 }
 0x2fc   : > { %2572 = vmatmul.mubr.msk.f32.gmra.mrb[14].mxu0 %vm529_vm8, %v4836_v59 }
 0x2fd   : > { %1637 = vmatprep.mubr.f32.mxu0 %v4835_v60  ;;  %2576 = vmatmul.mubr.msk.f32.gmra.mrb[14].mxu1 %vm529_vm8, %v4836_v59 }
 0x2fe   : > { %1726 = vmatprep.mubr.f32.mxu1 %v4835_v60 }
 0x3c3   : > { %v1123_v42 = vpop.f32.mrb[8].mxu0 }
 0x3c4   : > { %v1235_v0 = vadd.f32 %v2553_v61, %v1123_v42  ;;  %v1125_v44 = vpop.f32.mrb[9].mxu0  ;;  %v1212_v1 = vpop.f32.mrb[8].mxu1 }
 0x3c5   : > { %v1236_v57 = vadd.f32 %v2554_v11, %v1125_v44  ;;  %v1237_v36 = vadd.f32 %v2555_v43, %v1212_v1  ;;  %v1214_v22 = vpop.f32.mrb[9].mxu1 }
 0x3c6   : > { %v2577_v23 = vmul.f32 -1.442695, %v1235_v0  ;;  %v1238_v33 = vadd.f32 %v2556_v41, %v1214_v22 }
 0x3c7   : > { %v2578_v26 = vmul.f32 -1.442695, %v1236_v57  ;;  %v1129_v18 = vpop.f32.mrb[10].mxu0  ;;  %v2579_v32 = vmul.f32 -1.442695, %v1237_v36 }
 0x3c8   : > { %2974 = vpow2.f32 %v2577_v23  ;;  %v1239_v31 = vadd.f32 %v2557_v19, %v1129_v18  ;;  %v1131_v35 = vpop.f32.mrb[11].mxu0  ;;  %v2580_v27 = vmul.f32 -1.442695, %v1238_v33  ;;  %v1218_v37 = vpop.f32.mrb[10].mxu1  ;;  %v2567_v23 = vld [vmem:[%s3611_s29 + $0xf0] sm:$0xff] }
 0x3c9   : > { %2976 = vpow2.f32 %v2578_v26  ;;  %v1240_v45 = vadd.f32 %v2558_v39, %v1131_v35  ;;  %v1241_v34 = vadd.f32 %v2559_v46, %v1218_v37  ;;  %v1220_v8 = vpop.f32.mrb[11].mxu1  ;;  %v2568_v26 = vld [vmem:[%s3611_s29 + $0xf8] sm:$0xff] }
 0x3ca   : > { %2978 = vpow2.f32 %v2579_v32  ;;  %v2581_v40 = vmul.f32 -1.442695, %v1239_v31  ;;  %v1242_v51 = vadd.f32 %v2560_v55, %v1220_v8 }
 0x3cb   : > { %2980 = vpow2.f32 %v2580_v27  ;;  %v2582_v47 = vmul.f32 -1.442695, %v1240_v45  ;;  %v1135_v2 = vpop.f32.mrb[12].mxu0  ;;  %v2583_v12 = vmul.f32 -1.442695, %v1241_v34 }
 0x3cc   : > { %2982 = vpow2.f32 %v2581_v40  ;;  %v1243_v13 = vadd.f32 %v2561_v38, %v1135_v2  ;;  %v1137_v48 = vpop.f32.mrb[13].mxu0  ;;  %v2584_v50 = vmul.f32 -1.442695, %v1242_v51  ;;  %v1224_v17 = vpop.f32.mrb[12].mxu1 }
 0x3cd   : > { %2984 = vpow2.f32 %v2582_v47  ;;  %v1244_v6 = vadd.f32 %v2562_v49, %v1137_v48  ;;  %v1226_v14 = vpop.f32.mrb[13].mxu1  ;;  %v1245_v29 = vadd.f32 %v2563_v7, %v1224_v17 }
 0x3ce   : > { %2986 = vpow2.f32 %v2583_v12  ;;  %v2585_v30 = vmul.f32 -1.442695, %v1243_v13  ;;  %v1246_v0 = vadd.f32 %v2564_v62, %v1226_v14 }
 0x3cf   : > { %2988 = vpow2.f32 %v2584_v50  ;;  %v2586_v56 = vmul.f32 -1.442695, %v1244_v6  ;;  %v1141_v24 = vpop.f32.mrb[14].mxu0  ;;  %v2587_v58 = vmul.f32 -1.442695, %v1245_v29 }
 0x3d0   : > { %v1247_v5 = vadd.f32 %v2565_v54, %v1141_v24  ;;  %v1143_v63 = vpop.f32.mrb[15].mxu0  ;;  %2990 = vpow2.f32 %v2585_v30  ;;  %v1230_v28 = vpop.f32.mrb[14].mxu1  ;;  %v2588_v39 = vmul.f32 -1.442695, %v1246_v0  ;;  %v4837_v54 = vld [vmem:[#allocation17_spill] sm:$0xff]  ;;  %v4838_v30 = vld [vmem:[#allocation18_spill] sm:$0xff] }
 0x3d1   : > { %v1248_v16 = vadd.f32 %v2566_v52, %v1143_v63  ;;  %2992 = vpow2.f32 %v2586_v56  ;;  %v1232_v25 = vpop.f32.mrb[15].mxu1  ;;  %v1249_v33 = vadd.f32 %v2567_v23, %v1230_v28  ;;  %v4272_v23 = vld [vmem:[#allocation5 + $0x28] sm:$0xff] }
 0x3d2   : > { %v2975_v10 = vpop.eup %2974  ;;  %2994 = vtanh.f32 %v1247_v5  ;;  %v1250_v31 = vadd.f32 %v2568_v26, %v1232_v25 }
 0x3d3   : > { %v2977_v21 = vpop.eup %2976  ;;  %v1287_v15 = vadd.f32 1.0, %v2975_v10  ;;  %2996 = vtanh.f32 %v1248_v16 }
 0x3d4   : > { %v2979_v20 = vpop.eup %2978  ;;  %v1288_v53 = vadd.f32 1.0, %v2977_v21 }
 0x3d5   : > { %v2981_v59 = vpop.eup %2980  ;;  %2998 = vrcp.f32 %v1287_v15  ;;  %v1289_v42 = vadd.f32 1.0, %v2979_v20 }
 0x3d6   : > { %v2983_v61 = vpop.eup %2982  ;;  %3000 = vrcp.f32 %v1288_v53  ;;  %v1290_v1 = vadd.f32 1.0, %v2981_v59 }
 0x3d7   : > { %v2985_v11 = vpop.eup %2984  ;;  %v1291_v43 = vadd.f32 1.0, %v2983_v61  ;;  %3002 = vpow2.f32 %v2587_v58 }
 0x3d8   : > { %v2987_v44 = vpop.eup %2986  ;;  %v1292_v41 = vadd.f32 1.0, %v2985_v11 }
 0x3d9   : > { %v2989_v57 = vpop.eup %2988  ;;  %3004 = vrcp.f32 %v1291_v43  ;;  %v1293_v19 = vadd.f32 1.0, %v2987_v44 }
 0x3da   : > { %3006 = vrcp.f32 %v1292_v41  ;;  %v1294_v36 = vadd.f32 1.0, %v2989_v57  ;;  %v2991_v22 = vpop.eup %2990 }
 0x3db   : > { %3008 = vrcp.f32 %v1289_v42  ;;  %v2993_v18 = vpop.eup %2992  ;;  %v1295_v38 = vadd.f32 1.0, %v2991_v22 }
 0x3dc   : > { %3010 = vrcp.f32 %v1293_v19  ;;  %v2995_v46 = vpop.eup %2994  ;;  %v1296_v34 = vadd.f32 1.0, %v2993_v18 }
 0x3dd   : > { %3012 = vrcp.f32 %v1290_v1  ;;  %v2997_v32 = vpop.eup %2996  ;;  %v4269_v1 = vld [vmem:[#allocation5 + $0x8] sm:$0xff] }
 0x3de   : > { %3014 = vrcp.f32 %v1294_v36 }
 0x3df   : > { %v2999_v35 = vpop.eup %2998  ;;  %3016 = vpow2.f32 %v2588_v39 }
 0x3e0   : > { %v3001_v55 = vpop.eup %3000  ;;  %v1331_v27 = vmul.f32 %v2999_v35, %v2995_v46  ;;  %3018 = vtanh.f32 %v1249_v33 }
 0x3e1   : > { %v1332_v45 = vmul.f32 %v3001_v55, %v2997_v32  ;;  %v3003_v37 = vpop.eup %3002  ;;  %3020 = vtanh.f32 %v1250_v31  ;;  %v4283_v31 = vld [vmem:[#allocation5 + $0x30] sm:$0xff] }
 0x3e2   : > { %3022 = vrcp.f32 %v1295_v38  ;;  %v4293_v38 = vld [vmem:[#allocation5 + $0x18] sm:$0xff] }
 0x3e3   : > { %v3005_v40 = vpop.eup %3004  ;;  %3024 = vrcp.f32 %v1296_v34  ;;  %v4296_v34 = vld [vmem:[#allocation5 + $0x20] sm:$0xff] }
 0x3e4   : > { %v3007_v8 = vpop.eup %3006  ;;  %v1327_v49 = vmul.f32 %v3005_v40, %v3933_v4  ;;  %v1297_v4 = vadd.f32 1.0, %v3003_v37 }
 0x3e5   : > { %v3009_v47 = vpop.eup %3008  ;;  %v1328_v51 = vmul.f32 %v3007_v8, %v3936_v3 }
 0x3e6   : > { %v3011_v2 = vpop.eup %3010  ;;  %v4171_v12 = vadd.f32 %v1331_v27, %v1327_v49  ;;  %v4299_v49 = vld [vmem:[#allocation5 + $0x38] sm:$0xff] }
 0x3e7   : > { %v3013_v13 = vpop.eup %3012  ;;  %v4173_v48 = vadd.f32 %v1332_v45, %v1328_v51  ;;  %v1329_v7 = vmul.f32 %v3011_v2, %v4837_v54  ;;  %v4290_v45 = vld [vmem:[#allocation5] sm:$0xff]  ;;  %v4302_v2 = vld [vmem:[#allocation5 + $0x10] sm:$0xff] }
 0x3e8   : > { %v3015_v50 = vpop.eup %3014  ;;  %3026 = vtanh.f32 %v4171_v12 }
 0x3e9   : > { %v3017_v6 = vpop.eup %3016  ;;  %3028 = vtanh.f32 %v4173_v48  ;;  %v1330_v3 = vmul.f32 %v3015_v50, %v4838_v30 }
 0x3ea   : > { %v3019_v17 = vpop.eup %3018  ;;  %v1298_v56 = vadd.f32 1.0, %v3017_v6  ;;  %3030 = vrcp.f32 %v1297_v4 }
 0x3eb   : > { %v1333_v52 = vmul.f32 %v3019_v17, %v3009_v47  ;;  %v3021_v14 = vpop.eup %3020 }
 0x3ec   : > { %v1334_v5 = vmul.f32 %v3021_v14, %v3013_v13  ;;  %v3023_v29 = vpop.eup %3022 }
 0x3ed   : > { %v4179_v24 = vadd.f32 %v1333_v52, %v1329_v7  ;;  %v3025_v16 = vpop.eup %3024 }
 0x3ee   : > { %v4182_v63 = vadd.f32 %v1334_v5, %v1330_v3 }
 0x3ef   : > { %3032 = vtanh.f32 %v4179_v24 }
 0x3f0   : > { %3034 = vrcp.f32 %v1298_v56  ;;  %v4309_v56 = vld [vmem:[#allocation5 + $0x48] sm:$0xff] }
 0x3f1   : > { %3036 = vtanh.f32 %v4182_v63 }
 0x3f2   : > { %v3027_v28 = vpop.eup %3026 }
 0x3f3   : > { %v3029_v10 = vpop.eup %3028  ;;  %v4185_v25 = vmul.f32 %v3027_v28, %v3023_v29  ;;  %v4312_v29 = vld [vmem:[#allocation5 + $0x68] sm:$0xff] }
 0x3f4   : > { %v4187_v21 = vmul.f32 %v3029_v10, %v3025_v16  ;;  %v3031_v15 = vpop.eup %3030 }
 0x3f5   : > { %2589 = vst [vmem:[%s3622_s10 + $0x20] sm:$0xff] %v4185_v25  ;;  %1352 = vrot.lane.b32.xlu0 %v4185_v25, %s3392_s18 }
 0x3f6   : > { %2590 = vst [vmem:[%s3622_s10 + $0x28] sm:$0xff] %v4187_v21  ;;  %1354 = vrot.lane.b32.xlu1 %v4187_v21, %s3392_s18 }
 0x3f9   : > { %v3033_v20 = vpop.eup %3032 }
 0x3fa   : > { %v3035_v53 = vpop.eup %3034  ;;  %v4197_v58 = vmul.f32 %v3033_v20, %v3031_v15 }
 0x3fb   : > { %v3037_v62 = vpop.eup %3036 }
 0x3fc   : > { %2591 = vst [vmem:[%s3622_s10 + $0x30] sm:$0xff] %v4197_v58  ;;  %v4201_v59 = vmul.f32 %v3037_v62, %v3035_v53  ;;  %1356 = vrot.lane.b32.xlu0 %v4197_v58, %s3392_s18 }
 0x3fe   : > { %2592 = vst [vmem:[%s3622_s10 + $0x38] sm:$0xff] %v4201_v59  ;;  %1358 = vrot.lane.b32.xlu1 %v4201_v59, %s3392_s18 }
 0x400   : > { %1368 = vrot.lane.b32.xlu0 %v4185_v25, %s3393_s21 }
 0x402   : > { %1370 = vrot.lane.b32.xlu1 %v4187_v21, %s3393_s21 }
 0x404   : > { %1372 = vrot.lane.b32.xlu0 %v4197_v58, %s3393_s21 }
 0x406   : > { %1374 = vrot.lane.b32.xlu1 %v4201_v59, %s3393_s21 }
 0x408   : > { %1384 = vrot.lane.b32.xlu0 %v4185_v25, %s3394_s11 }
 0x40a   : > { %1386 = vrot.lane.b32.xlu1 %v4187_v21, %s3394_s11 }
 0x40c   : > { %1388 = vrot.lane.b32.xlu0 %v4197_v58, %s3394_s11 }
 0x40e   : > { %1390 = vrot.lane.b32.xlu1 %v4201_v59, %s3394_s11 }
 0x410   : > { %1400 = vrot.lane.b32.xlu0 %v4185_v25, %s3395_s9 }
 0x412   : > { %1402 = vrot.lane.b32.xlu1 %v4187_v21, %s3395_s9 }
 0x414   : > { %1404 = vrot.lane.b32.xlu0 %v4197_v58, %s3395_s9 }
 0x416   : > { %1406 = vrot.lane.b32.xlu1 %v4201_v59, %s3395_s9 }
 0x418   : > { %1420 = vrot.lane.b32.xlu0 %v4185_v25, %s3396_s19 }
 0x41a   : > { %1422 = vrot.lane.b32.xlu1 %v4187_v21, %s3396_s19 }
 0x41c   : > { %1424 = vrot.lane.b32.xlu0 %v4197_v58, %s3396_s19 }
 0x41e   : > { %1426 = vrot.lane.b32.xlu1 %v4201_v59, %s3396_s19 }
 0x420   : > { %1436 = vrot.lane.b32.xlu0 %v4185_v25, %s3397_s25 }
 0x422   : > { %1438 = vrot.lane.b32.xlu1 %v4187_v21, %s3397_s25 }
 0x424   : > { %1440 = vrot.lane.b32.xlu0 %v4197_v58, %s3397_s25 }
 0x426   : > { %1442 = vrot.lane.b32.xlu1 %v4201_v59, %s3397_s25 }
 0x428   : > { %1452 = vrot.lane.b32.xlu0 %v4185_v25, %s3398_s4 }
 0x42a   : > { %1454 = vrot.lane.b32.xlu1 %v4187_v21, %s3398_s4 }
 0x42c   : > { %1456 = vrot.lane.b32.xlu0 %v4197_v58, %s3398_s4 }
 0x42e   : > { %1458 = vrot.lane.b32.xlu1 %v4201_v59, %s3398_s4 }
 0x430   : > { %1468 = vrot.lane.b32.xlu0 %v4185_v25, %s3400_s26 }
 0x432   : > { %1470 = vrot.lane.b32.xlu1 %v4187_v21, %s3400_s26 }
 0x434   : > { %1472 = vrot.lane.b32.xlu0 %v4197_v58, %s3400_s26 }
 0x436   : > { %1474 = vrot.lane.b32.xlu1 %v4201_v59, %s3400_s26 }
 0x467   : > { %v1353_v61 = vpop.permute.xlu0 %1352 }
 0x468   : > { %v1355_v11 = vpop.permute.xlu1 %1354 }
 0x469   : > { %v1362_v44 = vsel %vm309_vm0, %v1353_v61, %v1355_v11 }
 0x46a   : > { %v1521_v19 = vmul.f32 %v4269_v1, %v1362_v44  ;;  %v4330_v44 = vld [vmem:[#allocation5 + $0x40] sm:$0xff] }
 0x46e   : > { %v1357_v42 = vpop.permute.xlu0 %1356 }
 0x46f   : > { %v1361_v33 = vsel %vm309_vm0, %v1355_v11, %v1357_v42  ;;  %v4323_v11 = vld [vmem:[#allocation5 + $0x70] sm:$0xff] }
 0x470   : > { %v1359_v43 = vpop.permute.xlu1 %1358  ;;  %v1522_v13 = vmul.f32 %v4302_v2, %v1361_v33  ;;  %v4342_v33 = vld [vmem:[#allocation5 + $0x50] sm:$0xff] }
 0x471   : > { %v1360_v39 = vsel %vm309_vm0, %v1357_v42, %v1359_v43  ;;  %v1363_v26 = vsel %vm309_vm0, %v1359_v43, %v1353_v61 }
 0x472   : > { %v1369_v0 = vpop.permute.xlu0 %1368  ;;  %v1520_v37 = vmul.f32 %v4290_v45, %v1363_v26  ;;  %v1523_v40 = vmul.f32 %v4293_v38, %v1360_v39  ;;  %v4339_v39 = vld [vmem:[#allocation5 + $0x78] sm:$0xff] }
 0x474   : > { %v1371_v41 = vpop.permute.xlu1 %1370 }
 0x475   : > { %v1378_v57 = vsel %vm326_vm1, %v1369_v0, %v1371_v41 }
 0x476   : > { %v1525_v36 = vmul.f32 %v4272_v23, %v1378_v57  ;;  %v1373_v22 = vpop.permute.xlu0 %1372  ;;  %v4333_v57 = vld [vmem:[#allocation5 + $0x58] sm:$0xff] }
 0x477   : > { %v1377_v18 = vsel %vm326_vm1, %v1371_v41, %v1373_v22 }
 0x478   : > { %v1375_v46 = vpop.permute.xlu1 %1374  ;;  %v2747_v32 = vpack.c.bf16 %v1525_v36, %v1521_v19  ;;  %v1526_v35 = vmul.f32 %v4283_v31, %v1377_v18  ;;  %v4336_v36 = vld [vmem:[#allocation5 + $0x60] sm:$0xff] }
 0x479   : > { %v1376_v55 = vsel %vm326_vm1, %v1373_v22, %v1375_v46  ;;  %v1379_v27 = vsel %vm326_vm1, %v1375_v46, %v1369_v0 }
 0x47a   : > { %v1524_v8 = vmul.f32 %v4296_v34, %v1379_v27  ;;  %v1527_v47 = vmul.f32 %v4299_v49, %v1376_v55  ;;  %2748 = vmatprep.subr.bf16.mxu0 %v2747_v32  ;;  %v1385_v51 = vpop.permute.xlu0 %1384  ;;  %v2765_v7 = vpack.c.bf16 %v1526_v35, %v1522_v13  ;;  %v4352_v13 = vld [vmem:[#allocation5 + $0xa8] sm:$0xff] }
 0x47c   : > { %v2749_v50 = vpack.c.bf16 %v1524_v8, %v1520_v37  ;;  %v1387_v6 = vpop.permute.xlu1 %1386  ;;  %v2763_v54 = vpack.c.bf16 %v1527_v47, %v1523_v40  ;;  %v4347_v8 = vld [vmem:[#allocation5 + $0xa0] sm:$0xff] }
 0x47d   : > { %v1394_v3 = vsel %vm343_vm2, %v1385_v51, %v1387_v6 }
 0x47e   : > { %2750 = vmatpush1.bf16.msra.mxu0 %v2749_v50  ;;  %2764 = vmatprep.subr.bf16.mxu1 %v2763_v54  ;;  %v1389_v4 = vpop.permute.xlu0 %1388  ;;  %v1529_v5 = vmul.f32 %v4309_v56, %v1394_v3  ;;  %v4355_v54 = vld [vmem:[#allocation5 + $0x88] sm:$0xff] }
 0x47f   : > { %2766 = vmatpush1.bf16.msra.mxu1 %v2765_v7  ;;  %v1393_v53 = vsel %vm343_vm2, %v1387_v6, %v1389_v4  ;;  %v1537_v7 = vmul.f32 %v4355_v54, %v4187_v21 }
 0x480   : > { %v1391_v17 = vpop.permute.xlu1 %1390  ;;  %v1530_v46 = vmul.f32 %v4342_v33, %v1393_v53 }
 0x481   : > { %v1392_v10 = vsel %vm343_vm2, %v1389_v4, %v1391_v17  ;;  %v1395_v15 = vsel %vm343_vm2, %v1391_v17, %v1385_v51  ;;  %v4359_v4 = vld [vmem:[#allocation5 + $0x80] sm:$0xff] }
 0x482   : > { %v1401_v30 = vpop.permute.xlu0 %1400  ;;  %v1528_v41 = vmul.f32 %v4330_v44, %v1395_v15  ;;  %v1531_v19 = vmul.f32 %v4333_v57, %v1392_v10  ;;  %v1536_v17 = vmul.f32 %v4359_v4, %v4185_v25  ;;  %v4377_v15 = vld [vmem:[#allocation5 + $0x98] sm:$0xff] }
 0x484   : > { %v1403_v52 = vpop.permute.xlu1 %1402 }
 0x485   : > { %v1410_v14 = vsel %vm360_vm3, %v1401_v30, %v1403_v52 }
 0x486   : > { %v1533_v16 = vmul.f32 %v4312_v29, %v1410_v14  ;;  %v1405_v28 = vpop.permute.xlu0 %1404 }
 0x487   : > { %v1409_v20 = vsel %vm360_vm3, %v1403_v52, %v1405_v28 }
 0x488   : > { %v1407_v62 = vpop.permute.xlu1 %1406  ;;  %v2751_v61 = vpack.c.bf16 %v1533_v16, %v1529_v5  ;;  %v1534_v42 = vmul.f32 %v4323_v11, %v1409_v20  ;;  %v4371_v5 = vld [vmem:[#allocation5 + $0xb0] sm:$0xff]  ;;  %v4374_v16 = vld [vmem:[#allocation5 + $0xb8] sm:$0xff] }
 0x489   : > { %v1408_v43 = vsel %vm360_vm3, %v1405_v28, %v1407_v62  ;;  %v1411_v0 = vsel %vm360_vm3, %v1407_v62, %v1401_v30  ;;  %v4363_v30 = vld [vmem:[#allocation5 + $0x90] sm:$0xff] }
 0x48a   : > { %v1532_v22 = vmul.f32 %v4336_v36, %v1411_v0  ;;  %v1535_v26 = vmul.f32 %v4339_v39, %v1408_v43  ;;  %2752 = vmatprep.subr.bf16.mxu0 %v2751_v61  ;;  %v1421_v18 = vpop.permute.xlu0 %1420  ;;  %v2769_v27 = vpack.c.bf16 %v1534_v42, %v1530_v46  ;;  %v1538_v3 = vmul.f32 %v4363_v30, %v4197_v58 }
 0x48b   : > { %v1539_v58 = vmul.f32 %v4377_v15, %v4201_v59 }
 0x48c   : > { %v2753_v32 = vpack.c.bf16 %v1532_v22, %v1528_v41  ;;  %v1423_v35 = vpop.permute.xlu1 %1422  ;;  %v2767_v55 = vpack.c.bf16 %v1535_v26, %v1531_v19 }
 0x48d   : > { %v1430_v37 = vsel %vm381_vm4, %v1421_v18, %v1423_v35 }
 0x48e   : > { %2754 = vmatpush1.bf16.msra.mxu0 %v2753_v32  ;;  %2768 = vmatprep.subr.bf16.mxu1 %v2767_v55  ;;  %v1425_v40 = vpop.permute.xlu0 %1424  ;;  %v1540_v47 = vmul.f32 %v4347_v8, %v1430_v37  ;;  %v4391_v32 = vld [vmem:[#allocation5 + $0xe0] sm:$0xff] }
 0x48f   : > { %v1429_v51 = vsel %vm381_vm4, %v1423_v35, %v1425_v40  ;;  %2770 = vmatpush1.bf16.msra.mxu1 %v2769_v27  ;;  %v4396_v27 = vld [vmem:[#allocation5 + $0xc8] sm:$0xff] }
 0x490   : > { %v1541_v50 = vmul.f32 %v4352_v13, %v1429_v51  ;;  %v1427_v6 = vpop.permute.xlu1 %1426  ;;  %v2757_v20 = vpack.c.bf16 %v1540_v47, %v1536_v17 }
 0x491   : > { %v1428_v52 = vsel %vm381_vm4, %v1425_v40, %v1427_v6  ;;  %v1431_v14 = vsel %vm381_vm4, %v1427_v6, %v1421_v18  ;;  %v4399_v40 = vld [vmem:[#allocation5 + $0xe8] sm:$0xff] }
 0x492   : > { %v1542_v21 = vmul.f32 %v4371_v5, %v1428_v52  ;;  %v1543_v28 = vmul.f32 %v4374_v16, %v1431_v14  ;;  %v1437_v25 = vpop.permute.xlu0 %1436  ;;  %v2755_v10 = vpack.c.bf16 %v1541_v50, %v1537_v7  ;;  %v4402_v50 = vld [vmem:[#allocation5 + $0xc0] sm:$0xff]  ;;  %v4405_v7 = vld [vmem:[#allocation5 + $0xd0] sm:$0xff]  ;;  %v4412_v14 = vld [vmem:[#allocation5 + $0xd8] sm:$0xff] }
 0x494   : > { %v2773_v53 = vpack.c.bf16 %v1542_v21, %v1538_v3  ;;  %v1439_v62 = vpop.permute.xlu1 %1438  ;;  %2756 = vmatprep.subr.bf16.mxu0 %v2755_v10  ;;  %v2771_v61 = vpack.c.bf16 %v1543_v28, %v1539_v58  ;;  %v4415_v28 = vld [vmem:[#allocation5 + $0xf0] sm:$0xff]  ;;  %v4418_v10 = vld [vmem:[#allocation5 + $0xf8] sm:$0xff] }
 0x495   : > { %2758 = vmatpush1.bf16.msra.mxu0 %v2757_v20  ;;  %v1446_v59 = vsel %vm398_vm6, %v1437_v25, %v1439_v62 }
 0x496   : > { %2772 = vmatprep.subr.bf16.mxu1 %v2771_v61  ;;  %v1441_v42 = vpop.permute.xlu0 %1440  ;;  %v1544_v6 = vmul.f32 %v4402_v50, %v1446_v59 }
 0x497   : > { %2774 = vmatpush1.bf16.msra.mxu1 %v2773_v53  ;;  %v1445_v19 = vsel %vm398_vm6, %v1439_v62, %v1441_v42 }
 0x498   : > { %v1443_v43 = vpop.permute.xlu1 %1442  ;;  %v1545_v37 = vmul.f32 %v4396_v27, %v1445_v19 }
 0x499   : > { %v1444_v26 = vsel %vm398_vm6, %v1441_v42, %v1443_v43  ;;  %v1447_v46 = vsel %vm398_vm6, %v1443_v43, %v1437_v25 }
 0x49a   : > { %v1453_v0 = vpop.permute.xlu0 %1452  ;;  %v1546_v17 = vmul.f32 %v4405_v7, %v1444_v26  ;;  %v1547_v21 = vmul.f32 %v4412_v14, %v1447_v46 }
 0x49c   : > { %v1455_v41 = vpop.permute.xlu1 %1454 }
 0x49d   : > { %v1462_v22 = vsel %vm415_vm5, %v1453_v0, %v1455_v41 }
 0x49e   : > { %v1457_v18 = vpop.permute.xlu0 %1456  ;;  %v1548_v35 = vmul.f32 %v4391_v32, %v1462_v22  ;;  %v4425_v22 = vld [vmem:[#allocation5 + $0x108] sm:$0xff] }
 0x49f   : > { %v1461_v55 = vsel %vm415_vm5, %v1455_v41, %v1457_v18 }
 0x4a0   : > { %v1549_v47 = vmul.f32 %v4399_v40, %v1461_v55  ;;  %v1459_v51 = vpop.permute.xlu1 %1458  ;;  %v2761_v62 = vpack.c.bf16 %v1548_v35, %v1544_v6 }
 0x4a1   : > { %v1460_v3 = vsel %vm415_vm5, %v1457_v18, %v1459_v51  ;;  %v1463_v52 = vsel %vm415_vm5, %v1459_v51, %v1453_v0  ;;  %v4428_v18 = vld [vmem:[#allocation5 + $0x100] sm:$0xff]  ;;  %v4438_v51 = vld [vmem:[#allocation5 + $0x118] sm:$0xff] }
 0x4a2   : > { %v1550_v25 = vmul.f32 %v4415_v28, %v1460_v3  ;;  %v1551_v58 = vmul.f32 %v4418_v10, %v1463_v52  ;;  %v1469_v20 = vpop.permute.xlu0 %1468  ;;  %v2759_v53 = vpack.c.bf16 %v1549_v47, %v1545_v37  ;;  %v4435_v37 = vld [vmem:[#allocation5 + $0x110] sm:$0xff]  ;;  %4839 = vst [vmem:[#allocation16_spill] sm:$0xff] %v4438_v51  ;;  %v4449_v3 = vld [vmem:[#allocation10 + $0x8] sm:$0xff] }
 0x4a3   : > { %4841 = vst [vmem:[#allocation18_spill] sm:$0xff] %v4449_v3  ;;  %v4457_v52 = vld [vmem:[#allocation10 + $0x10] sm:$0xff] }
 0x4a4   : > { %v2777_v61 = vpack.c.bf16 %v1550_v25, %v1546_v17  ;;  %v1471_v42 = vpop.permute.xlu1 %1470  ;;  %2760 = vmatprep.subr.bf16.mxu0 %v2759_v53  ;;  %v2775_v43 = vpack.c.bf16 %v1551_v58, %v1547_v21  ;;  %v4441_v17 = vld [vmem:[#allocation10] sm:$0xff]  ;;  %4842 = vst [vmem:[#allocation19_spill] sm:$0xff] %v4457_v52  ;;  %v4465_v21 = vld [vmem:[#allocation10 + $0x18] sm:$0xff]  ;;  %v2594_v58 = vld [vmem:[%s3611_s29 + $0x108] sm:$0xff] }
 0x4a5   : > { %2762 = vmatpush1.bf16.msra.mxu0 %v2761_v62  ;;  %v1478_v0 = vsel %vm432_vm7, %v1469_v20, %v1471_v42  ;;  %4840 = vst [vmem:[#allocation17_spill] sm:$0xff] %v4441_v17  ;;  %4843 = vst [vmem:[#allocation20_spill] sm:$0xff] %v4465_v21  ;;  %v2593_v25 = vld [vmem:[%s3611_s29 + $0x100] sm:$0xff]  ;;  %v2595_v53 = vld [vmem:[%s3611_s29 + $0x110] sm:$0xff] }
 0x4a6   : > { %2776 = vmatprep.subr.bf16.mxu1 %v2775_v43  ;;  %v1473_v41 = vpop.permute.xlu0 %1472  ;;  %v1552_v46 = vmul.f32 %v4428_v18, %v1478_v0 }
 0x4a7   : > { %v1477_v19 = vsel %vm432_vm7, %v1471_v42, %v1473_v41  ;;  %2778 = vmatpush1.bf16.msra.mxu1 %v2777_v61  ;;  %v2596_v42 = vld [vmem:[%s3611_s29 + $0x118] sm:$0xff] }
 0x4a8   : > { %v1553_v59 = vmul.f32 %v4425_v22, %v1477_v19  ;;  %v1475_v26 = vpop.permute.xlu1 %1474 }
 0x4a9   : > { %v1476_v35 = vsel %vm432_vm7, %v1473_v41, %v1475_v26  ;;  %v1479_v55 = vsel %vm432_vm7, %v1475_v26, %v1469_v20  ;;  %v2597_v41 = vld [vmem:[%s3611_s29 + $0x120] sm:$0xff] }
 0x4aa   : > { %v1554_v47 = vmul.f32 %v4435_v37, %v1476_v35  ;;  %v1555_v6 = vmul.f32 %v4438_v51, %v1479_v55  ;;  %1589 = vmatprep.subr.mxu0 %v1553_v59  ;;  %v4847_v9 = vld [vmem:[#allocation18_spill] sm:$0xff] }
 0x4ab   : > { %1590 = vmatpush1.msra.mxu0 %v1552_v46  ;;  %v2598_v46 = vld [vmem:[%s3611_s29 + $0x128] sm:$0xff] }
 0x4ac   : > { %1678 = vmatprep.subr.mxu1 %v1555_v6  ;;  %2609 = vmatmul.mubr.msk.f32.vlgmr.msra.gmra.mrb[16].mxu0 %vm529_vm8, %v4441_v17  ;;  %v2599_v6 = vld [vmem:[%s3611_s29 + $0x130] sm:$0xff] }
 0x4ad   : > { %1679 = vmatpush1.msra.mxu1 %v1554_v47  ;;  %1643 = vmatprep.mubr.f32.mxu0 %v4835_v60 }
 0x4ae   : > { %2613 = vmatmul.mubr.msk.f32.vlgmr.msra.gmra.mrb[16].mxu1 %vm529_vm8, %v4441_v17 }
 0x4af   : > { %1732 = vmatprep.mubr.f32.mxu1 %v4835_v60 }
 0x4b0   : > { %2610 = vmatmul.mubr.msk.f32.gmra.mrb[18].mxu0 %vm529_vm8, %v4449_v3 }
 0x4b1   : > { %1649 = vmatprep.mubr.f32.mxu0 %v4835_v60 }
 0x4b2   : > { %2614 = vmatmul.mubr.msk.f32.gmra.mrb[18].mxu1 %vm529_vm8, %v4449_v3 }
 0x4b3   : > { %1738 = vmatprep.mubr.f32.mxu1 %v4835_v60 }
 0x4b4   : > { %2611 = vmatmul.mubr.msk.f32.gmra.mrb[20].mxu0 %vm529_vm8, %v4457_v52 }
 0x4b5   : > { %1655 = vmatprep.mubr.f32.mxu0 %v4835_v60 }
 0x4b6   : > { %2615 = vmatmul.mubr.msk.f32.gmra.mrb[20].mxu1 %vm529_vm8, %v4457_v52 }
 0x4b7   : > { %1744 = vmatprep.mubr.f32.mxu1 %v4835_v60 }
 0x4b8   : > { %2612 = vmatmul.mubr.msk.f32.gmra.mrb[22].mxu0 %vm529_vm8, %v4465_v21 }
 0x4b9   : > { %2153 = vmatprep.mubr.f32.mxu0 %v4835_v60 }
 0x4ba   : > { %2616 = vmatmul.mubr.msk.f32.gmra.mrb[22].mxu1 %vm529_vm8, %v4465_v21 }
 0x4bb   : > { %2242 = vmatprep.mubr.f32.mxu1 %v4835_v60  ;;  %v2601_v60 = vld [vmem:[%s3611_s29 + $0x140] sm:$0xff] }
 0x57f   : > { %v1639_v20 = vpop.f32.mrb[16].mxu0 }
 0x580   : > { %v1751_v62 = vadd.f32 %v2593_v25, %v1639_v20  ;;  %v1641_v61 = vpop.f32.mrb[17].mxu0  ;;  %v2600_v20 = vld [vmem:[%s3611_s29 + $0x138] sm:$0xff] }
 0x581   : > { %v1752_v43 = vadd.f32 %v2594_v58, %v1641_v61  ;;  %v1728_v0 = vpop.f32.mrb[16].mxu1 }
 0x582   : > { %v2617_v19 = vmul.f32 -1.442695, %v1751_v62  ;;  %v1753_v59 = vadd.f32 %v2595_v53, %v1728_v0  ;;  %v1730_v26 = vpop.f32.mrb[17].mxu1  ;;  %v2602_v0 = vld [vmem:[%s3611_s29 + $0x148] sm:$0xff] }
 0x583   : > { %v2618_v35 = vmul.f32 -1.442695, %v1752_v43  ;;  %v1645_v55 = vpop.f32.mrb[18].mxu0  ;;  %v1754_v47 = vadd.f32 %v2596_v42, %v1730_v26 }
 0x584   : > { %3038 = vpow2.f32 %v2617_v19  ;;  %v2619_v21 = vmul.f32 -1.442695, %v1753_v59  ;;  %v1755_v52 = vadd.f32 %v2597_v41, %v1645_v55  ;;  %v1647_v25 = vpop.f32.mrb[19].mxu0 }
 0x585   : > { %3040 = vpow2.f32 %v2618_v35  ;;  %v2620_v3 = vmul.f32 -1.442695, %v1754_v47  ;;  %v1756_v58 = vadd.f32 %v2598_v46, %v1647_v25  ;;  %v1734_v61 = vpop.f32.mrb[18].mxu1  ;;  %v2605_v47 = vld [vmem:[%s3611_s29 + $0x160] sm:$0xff] }
 0x586   : > { %3042 = vpow2.f32 %v2619_v21  ;;  %v2621_v53 = vmul.f32 -1.442695, %v1755_v52  ;;  %v1757_v62 = vadd.f32 %v2599_v6, %v1734_v61  ;;  %v1736_v43 = vpop.f32.mrb[19].mxu1  ;;  %v2603_v21 = vld [vmem:[%s3611_s29 + $0x150] sm:$0xff]  ;;  %v2606_v6 = vld [vmem:[%s3611_s29 + $0x168] sm:$0xff] }
 0x587   : > { %3044 = vpow2.f32 %v2620_v3  ;;  %v2622_v42 = vmul.f32 -1.442695, %v1756_v58  ;;  %v1758_v19 = vadd.f32 %v2600_v20, %v1736_v43  ;;  %v1651_v59 = vpop.f32.mrb[20].mxu0 }
 0x588   : > { %3046 = vpow2.f32 %v2621_v53  ;;  %v2623_v41 = vmul.f32 -1.442695, %v1757_v62  ;;  %v1759_v26 = vadd.f32 %v2601_v60, %v1651_v59  ;;  %v1653_v35 = vpop.f32.mrb[21].mxu0 }
 0x589   : > { %3048 = vpow2.f32 %v2622_v42  ;;  %v2624_v46 = vmul.f32 -1.442695, %v1758_v19  ;;  %v1760_v55 = vadd.f32 %v2602_v0, %v1653_v35  ;;  %v1740_v25 = vpop.f32.mrb[20].mxu1  ;;  %v2604_v35 = vld [vmem:[%s3611_s29 + $0x158] sm:$0xff] }
 0x58a   : > { %3050 = vpow2.f32 %v2623_v41  ;;  %v2625_v52 = vmul.f32 -1.442695, %v1759_v26  ;;  %v1742_v61 = vpop.f32.mrb[21].mxu1  ;;  %v1761_v53 = vadd.f32 %v2603_v21, %v1740_v25 }
 0x58b   : > { %3052 = vpow2.f32 %v2624_v46  ;;  %v2626_v3 = vmul.f32 -1.442695, %v1760_v55  ;;  %v1657_v17 = vpop.f32.mrb[22].mxu0  ;;  %v1762_v25 = vadd.f32 %v2604_v35, %v1742_v61 }
 0x58c   : > { %v1763_v58 = vadd.f32 %v2605_v47, %v1657_v17  ;;  %v1659_v20 = vpop.f32.mrb[23].mxu0  ;;  %3054 = vpow2.f32 %v2625_v52  ;;  %v2627_v26 = vmul.f32 -1.442695, %v1761_v53 }
 0x58d   : > { %v1764_v60 = vadd.f32 %v2606_v6, %v1659_v20  ;;  %v1746_v62 = vpop.f32.mrb[22].mxu1  ;;  %3056 = vpow2.f32 %v2626_v3 }
 0x58e   : > { %v3039_v43 = vpop.eup %3038  ;;  %v1748_v0 = vpop.f32.mrb[23].mxu1  ;;  %3058 = vtanh.f32 %v1763_v58 }
 0x58f   : > { %v3041_v42 = vpop.eup %3040  ;;  %v1803_v19 = vadd.f32 1.0, %v3039_v43  ;;  %3060 = vtanh.f32 %v1764_v60  ;;  %v2607_v60 = vld [vmem:[%s3611_s29 + $0x170] sm:$0xff] }
 0x590   : > { %v3043_v59 = vpop.eup %3042  ;;  %v1804_v41 = vadd.f32 1.0, %v3041_v42  ;;  %v2628_v42 = vmul.f32 -1.442695, %v1762_v25 }
 0x591   : > { %v3045_v46 = vpop.eup %3044  ;;  %3062 = vrcp.f32 %v1803_v19  ;;  %v1805_v47 = vadd.f32 1.0, %v3043_v59  ;;  %v2608_v19 = vld [vmem:[%s3611_s29 + $0x178] sm:$0xff]  ;;  %v1765_v59 = vadd.f32 %v2607_v60, %v1746_v62 }
 0x592   : > { %v3047_v17 = vpop.eup %3046  ;;  %3064 = vrcp.f32 %v1804_v41  ;;  %v1806_v58 = vadd.f32 1.0, %v3045_v46  ;;  %v1766_v35 = vadd.f32 %v2608_v19, %v1748_v0 }
 0x593   : > { %v3049_v55 = vpop.eup %3048  ;;  %v1807_v21 = vadd.f32 1.0, %v3047_v17  ;;  %3066 = vpow2.f32 %v2627_v26 }
 0x594   : > { %v3051_v52 = vpop.eup %3050  ;;  %v1808_v6 = vadd.f32 1.0, %v3049_v55 }
 0x595   : > { %v3053_v3 = vpop.eup %3052  ;;  %3068 = vrcp.f32 %v1807_v21  ;;  %v1809_v20 = vadd.f32 1.0, %v3051_v52 }
 0x596   : > { %3070 = vrcp.f32 %v1808_v6  ;;  %v1810_v53 = vadd.f32 1.0, %v3053_v3  ;;  %v3055_v43 = vpop.eup %3054 }
 0x597   : > { %3072 = vrcp.f32 %v1805_v47  ;;  %v3057_v41 = vpop.eup %3056  ;;  %v1811_v52 = vadd.f32 1.0, %v3055_v43 }
 0x598   : > { %3074 = vrcp.f32 %v1809_v20  ;;  %v3059_v51 = vpop.eup %3058  ;;  %v1812_v25 = vadd.f32 1.0, %v3057_v41 }
 0x599   : > { %3076 = vrcp.f32 %v1806_v58  ;;  %v3061_v61 = vpop.eup %3060 }
 0x59a   : > { %3078 = vrcp.f32 %v1810_v53 }
 0x59b   : > { %v3063_v26 = vpop.eup %3062  ;;  %3080 = vpow2.f32 %v2628_v42 }
 0x59c   : > { %v3065_v17 = vpop.eup %3064  ;;  %v1847_v46 = vmul.f32 %v3063_v26, %v3059_v51  ;;  %3082 = vtanh.f32 %v1765_v59 }
 0x59d   : > { %v1848_v55 = vmul.f32 %v3065_v17, %v3061_v61  ;;  %v3067_v21 = vpop.eup %3066  ;;  %3084 = vtanh.f32 %v1766_v35 }
 0x59e   : > { %3086 = vrcp.f32 %v1811_v52 }
 0x59f   : > { %v3069_v47 = vpop.eup %3068  ;;  %3088 = vrcp.f32 %v1812_v25 }
 0x5a0   : > { %v3071_v6 = vpop.eup %3070  ;;  %v1843_v3 = vmul.f32 %v3069_v47, %v4171_v12  ;;  %v1813_v12 = vadd.f32 1.0, %v3067_v21 }
 0x5a1   : > { %v3073_v62 = vpop.eup %3072  ;;  %v1844_v58 = vmul.f32 %v3071_v6, %v4173_v48 }
 0x5a2   : > { %v3075_v20 = vpop.eup %3074  ;;  %v4491_v0 = vadd.f32 %v1847_v46, %v1843_v3 }
 0x5a3   : > { %v3077_v60 = vpop.eup %3076  ;;  %v4493_v51 = vadd.f32 %v1848_v55, %v1844_v58  ;;  %v1845_v42 = vmul.f32 %v3075_v20, %v4179_v24 }
 0x5a4   : > { %v3079_v53 = vpop.eup %3078  ;;  %3090 = vtanh.f32 %v4491_v0 }
 0x5a5   : > { %v3081_v43 = vpop.eup %3080  ;;  %3092 = vtanh.f32 %v4493_v51  ;;  %v1846_v48 = vmul.f32 %v3079_v53, %v4182_v63 }
 0x5a6   : > { %v3083_v19 = vpop.eup %3082  ;;  %v1814_v61 = vadd.f32 1.0, %v3081_v43  ;;  %3094 = vrcp.f32 %v1813_v12 }
 0x5a7   : > { %v1849_v41 = vmul.f32 %v3083_v19, %v3073_v62  ;;  %v3085_v59 = vpop.eup %3084 }
 0x5a8   : > { %v1850_v26 = vmul.f32 %v3085_v59, %v3077_v60  ;;  %v3087_v24 = vpop.eup %3086 }
 0x5a9   : > { %v4499_v35 = vadd.f32 %v1849_v41, %v1845_v42  ;;  %v3089_v46 = vpop.eup %3088 }
 0x5aa   : > { %v4502_v17 = vadd.f32 %v1850_v26, %v1846_v48 }
 0x5ab   : > { %3096 = vtanh.f32 %v4499_v35 }
 0x5ac   : > { %3098 = vrcp.f32 %v1814_v61 }
 0x5ad   : > { %3100 = vtanh.f32 %v4502_v17 }
 0x5ae   : > { %v3091_v63 = vpop.eup %3090 }
 0x5af   : > { %v3093_v55 = vpop.eup %3092  ;;  %v4505_v21 = vmul.f32 %v3091_v63, %v3087_v24 }
 0x5b0   : > { %v4507_v52 = vmul.f32 %v3093_v55, %v3089_v46  ;;  %v3095_v47 = vpop.eup %3094 }
 0x5b1   : > { %2629 = vst [vmem:[%s3622_s10 + $0x40] sm:$0xff] %v4505_v21  ;;  %1868 = vrot.lane.b32.xlu0 %v4505_v21, %s3392_s18 }
 0x5b2   : > { %2630 = vst [vmem:[%s3622_s10 + $0x48] sm:$0xff] %v4507_v52  ;;  %1870 = vrot.lane.b32.xlu1 %v4507_v52, %s3392_s18 }
 0x5b5   : > { %v3097_v25 = vpop.eup %3096 }
 0x5b6   : > { %v3099_v6 = vpop.eup %3098  ;;  %v4517_v3 = vmul.f32 %v3097_v25, %v3095_v47 }
 0x5b7   : > { %v3101_v62 = vpop.eup %3100 }
 0x5b8   : > { %2631 = vst [vmem:[%s3622_s10 + $0x50] sm:$0xff] %v4517_v3  ;;  %v4521_v58 = vmul.f32 %v3101_v62, %v3099_v6  ;;  %1872 = vrot.lane.b32.xlu0 %v4517_v3, %s3392_s18 }
 0x5ba   : > { %2632 = vst [vmem:[%s3622_s10 + $0x58] sm:$0xff] %v4521_v58  ;;  %1874 = vrot.lane.b32.xlu1 %v4521_v58, %s3392_s18  ;;  %s3296_s18 = sshll.u32 %s3401_s24, 4  ;;  %s3297_s18 = int_to_ptr.vmem [resolvable:$false] %s3296_s18 }
 0x5bb   : > { %p3299_p10 = scmp.lt.s32.totalorder %s4739_s5, %s3297_s18 }
 0x5bc   : > { %1884 = vrot.lane.b32.xlu0 %v4505_v21, %s3393_s21 }
 0x5be   : > { %1886 = vrot.lane.b32.xlu1 %v4507_v52, %s3393_s21 }
 0x5c0   : > { %1888 = vrot.lane.b32.xlu0 %v4517_v3, %s3393_s21 }
 0x5c2   : > { %1890 = vrot.lane.b32.xlu1 %v4521_v58, %s3393_s21  ;;  %s3298_s21 = scalar_lea.vmem %s3297_s18, 4096 }
 0x5c4   : > { %1900 = vrot.lane.b32.xlu0 %v4505_v21, %s3394_s11 }
 0x5c6   : > { %1902 = vrot.lane.b32.xlu1 %v4507_v52, %s3394_s11 }
 0x5c8   : > { %1904 = vrot.lane.b32.xlu0 %v4517_v3, %s3394_s11 }
 0x5ca   : > { %1906 = vrot.lane.b32.xlu1 %v4521_v58, %s3394_s11 }
 0x5cc   : > { %1916 = vrot.lane.b32.xlu0 %v4505_v21, %s3395_s9 }
 0x5ce   : > { %1918 = vrot.lane.b32.xlu1 %v4507_v52, %s3395_s9 }
 0x5d0   : > { %1920 = vrot.lane.b32.xlu0 %v4517_v3, %s3395_s9 }
 0x5d2   : > { %1922 = vrot.lane.b32.xlu1 %v4521_v58, %s3395_s9 }
 0x5d4   : > { %1936 = vrot.lane.b32.xlu0 %v4505_v21, %s3396_s19 }
 0x5d6   : > { %1938 = vrot.lane.b32.xlu1 %v4507_v52, %s3396_s19 }
 0x5d8   : > { %1940 = vrot.lane.b32.xlu0 %v4517_v3, %s3396_s19 }
 0x5da   : > { %1942 = vrot.lane.b32.xlu1 %v4521_v58, %s3396_s19 }
 0x5dc   : > { %1952 = vrot.lane.b32.xlu0 %v4505_v21, %s3397_s25 }
 0x5de   : > { %1954 = vrot.lane.b32.xlu1 %v4507_v52, %s3397_s25 }
 0x5e0   : > { %1956 = vrot.lane.b32.xlu0 %v4517_v3, %s3397_s25 }
 0x5e2   : > { %1958 = vrot.lane.b32.xlu1 %v4521_v58, %s3397_s25 }
 0x5e4   : > { %1968 = vrot.lane.b32.xlu0 %v4505_v21, %s3398_s4 }
 0x5e6   : > { %1970 = vrot.lane.b32.xlu1 %v4507_v52, %s3398_s4 }
 0x5e8   : > { %1972 = vrot.lane.b32.xlu0 %v4517_v3, %s3398_s4 }
 0x5ea   : > { %1974 = vrot.lane.b32.xlu1 %v4521_v58, %s3398_s4 }
 0x5ec   : > { %1984 = vrot.lane.b32.xlu0 %v4505_v21, %s3400_s26 }
 0x5ee   : > { %1986 = vrot.lane.b32.xlu1 %v4507_v52, %s3400_s26 }
 0x5f0   : > { %1988 = vrot.lane.b32.xlu0 %v4517_v3, %s3400_s26 }
 0x5f2   : > { %1990 = vrot.lane.b32.xlu1 %v4521_v58, %s3400_s26 }
 0x623   : > { %v1869_v20 = vpop.permute.xlu0 %1868 }
 0x624   : > { %v1871_v60 = vpop.permute.xlu1 %1870 }
 0x625   : > { %v1878_v12 = vsel %vm309_vm0, %v1869_v20, %v1871_v60 }
 0x626   : > { %v2037_v41 = vmul.f32 %v4269_v1, %v1878_v12 }
 0x62a   : > { %v1873_v53 = vpop.permute.xlu0 %1872 }
 0x62b   : > { %v1877_v63 = vsel %vm309_vm0, %v1871_v60, %v1873_v53 }
 0x62c   : > { %v1875_v43 = vpop.permute.xlu1 %1874 }
 0x62d   : > { %v1876_v26 = vsel %vm309_vm0, %v1873_v53, %v1875_v43  ;;  %v1879_v24 = vsel %vm309_vm0, %v1875_v43, %v1869_v20  ;;  %v2038_v53 = vmul.f32 %v4302_v2, %v1877_v63 }
 0x62e   : > { %v1885_v42 = vpop.permute.xlu0 %1884  ;;  %v2036_v6 = vmul.f32 %v4290_v45, %v1879_v24  ;;  %v2039_v62 = vmul.f32 %v4293_v38, %v1876_v26 }
 0x630   : > { %v1887_v19 = vpop.permute.xlu1 %1886 }
 0x631   : > { %v1894_v48 = vsel %vm326_vm1, %v1885_v42, %v1887_v19 }
 0x632   : > { %v2041_v59 = vmul.f32 %v4272_v23, %v1894_v48  ;;  %v1889_v61 = vpop.permute.xlu0 %1888 }
 0x633   : > { %v1893_v46 = vsel %vm326_vm1, %v1887_v19, %v1889_v61 }
 0x634   : > { %v1891_v55 = vpop.permute.xlu1 %1890  ;;  %v2779_v47 = vpack.c.bf16 %v2041_v59, %v2037_v41  ;;  %v2042_v25 = vmul.f32 %v4283_v31, %v1893_v46 }
 0x635   : > { %v1892_v1 = vsel %vm326_vm1, %v1889_v61, %v1891_v55  ;;  %v1895_v23 = vsel %vm326_vm1, %v1891_v55, %v1885_v42 }
 0x636   : > { %v2040_v20 = vmul.f32 %v4296_v34, %v1895_v23  ;;  %v2043_v43 = vmul.f32 %v4299_v49, %v1892_v1  ;;  %2780 = vmatprep.subr.bf16.mxu0 %v2779_v47  ;;  %v1901_v60 = vpop.permute.xlu0 %1900  ;;  %v2797_v48 = vpack.c.bf16 %v2042_v25, %v2038_v53 }
 0x638   : > { %v2781_v12 = vpack.c.bf16 %v2040_v20, %v2036_v6  ;;  %v1903_v31 = vpop.permute.xlu1 %1902  ;;  %v2795_v19 = vpack.c.bf16 %v2043_v43, %v2039_v62 }
 0x639   : > { %v1910_v38 = vsel %vm343_vm2, %v1901_v60, %v1903_v31 }
 0x63a   : > { %2782 = vmatpush1.bf16.msra.mxu0 %v2781_v12  ;;  %2796 = vmatprep.subr.bf16.mxu1 %v2795_v19  ;;  %v1905_v41 = vpop.permute.xlu0 %1904  ;;  %v2045_v59 = vmul.f32 %v4309_v56, %v1910_v38 }
 0x63b   : > { %2798 = vmatpush1.bf16.msra.mxu1 %v2797_v48  ;;  %v1909_v63 = vsel %vm343_vm2, %v1903_v31, %v1905_v41  ;;  %v2052_v48 = vmul.f32 %v4359_v4, %v4505_v21 }
 0x63c   : > { %v1907_v42 = vpop.permute.xlu1 %1906  ;;  %v2046_v43 = vmul.f32 %v4342_v33, %v1909_v63  ;;  %v2053_v33 = vmul.f32 %v4355_v54, %v4507_v52  ;;  %v2055_v54 = vmul.f32 %v4377_v15, %v4521_v58 }
 0x63d   : > { %v1908_v26 = vsel %vm343_vm2, %v1905_v41, %v1907_v42  ;;  %v1911_v24 = vsel %vm343_vm2, %v1907_v42, %v1901_v60  ;;  %v2054_v41 = vmul.f32 %v4363_v30, %v4517_v3 }
 0x63e   : > { %v1917_v45 = vpop.permute.xlu0 %1916  ;;  %v2044_v1 = vmul.f32 %v4330_v44, %v1911_v24  ;;  %v2047_v23 = vmul.f32 %v4333_v57, %v1908_v26 }
 0x640   : > { %v1919_v34 = vpop.permute.xlu1 %1918 }
 0x641   : > { %v1926_v49 = vsel %vm360_vm3, %v1917_v45, %v1919_v34 }
 0x642   : > { %v2049_v2 = vmul.f32 %v4312_v29, %v1926_v49  ;;  %v1921_v61 = vpop.permute.xlu0 %1920 }
 0x643   : > { %v1925_v46 = vsel %vm360_vm3, %v1919_v34, %v1921_v61 }
 0x644   : > { %v1923_v55 = vpop.permute.xlu1 %1922  ;;  %v2783_v47 = vpack.c.bf16 %v2049_v2, %v2045_v59  ;;  %v2050_v25 = vmul.f32 %v4323_v11, %v1925_v46 }
 0x645   : > { %v1924_v56 = vsel %vm360_vm3, %v1921_v61, %v1923_v55  ;;  %v1927_v29 = vsel %vm360_vm3, %v1923_v55, %v1917_v45 }
 0x646   : > { %v2048_v6 = vmul.f32 %v4336_v36, %v1927_v29  ;;  %v2051_v62 = vmul.f32 %v4339_v39, %v1924_v56  ;;  %2784 = vmatprep.subr.bf16.mxu0 %v2783_v47  ;;  %v1937_v20 = vpop.permute.xlu0 %1936  ;;  %v2801_v12 = vpack.c.bf16 %v2050_v25, %v2046_v43 }
 0x648   : > { %v2785_v60 = vpack.c.bf16 %v2048_v6, %v2044_v1  ;;  %v1939_v11 = vpop.permute.xlu1 %1938  ;;  %v2799_v53 = vpack.c.bf16 %v2051_v62, %v2047_v23 }
 0x649   : > { %v1946_v31 = vsel %vm381_vm4, %v1937_v20, %v1939_v11 }
 0x64a   : > { %2786 = vmatpush1.bf16.msra.mxu0 %v2785_v60  ;;  %2800 = vmatprep.subr.bf16.mxu1 %v2799_v53  ;;  %v1941_v44 = vpop.permute.xlu0 %1940  ;;  %v2056_v57 = vmul.f32 %v4347_v8, %v1946_v31 }
 0x64b   : > { %v1945_v36 = vsel %vm381_vm4, %v1939_v11, %v1941_v44  ;;  %2802 = vmatpush1.bf16.msra.mxu1 %v2801_v12 }
 0x64c   : > { %v2057_v39 = vmul.f32 %v4352_v13, %v1945_v36  ;;  %v1943_v19 = vpop.permute.xlu1 %1942  ;;  %v2789_v52 = vpack.c.bf16 %v2056_v57, %v2052_v48  ;;  %v4845_v36 = vld [vmem:[#allocation17_spill] sm:$0xff]  ;;  %v2635_v48 = vld [vmem:[%s3611_s29 + $0x190] sm:$0xff] }
 0x64d   : > { %v1944_v42 = vsel %vm381_vm4, %v1941_v44, %v1943_v19  ;;  %v1947_v8 = vsel %vm381_vm4, %v1943_v19, %v1937_v20  ;;  %v4844_v44 = vld [vmem:[#allocation16_spill] sm:$0xff]  ;;  %v2634_v19 = vld [vmem:[%s3611_s29 + $0x188] sm:$0xff] }
 0x64e   : > { %v2058_v45 = vmul.f32 %v4371_v5, %v1944_v42  ;;  %v2059_v13 = vmul.f32 %v4374_v16, %v1947_v8  ;;  %v1953_v38 = vpop.permute.xlu0 %1952  ;;  %v2787_v34 = vpack.c.bf16 %v2057_v39, %v2053_v33  ;;  %v2633_v39 = vld [vmem:[%s3611_s29 + $0x180] sm:$0xff]  ;;  %v2636_v8 = vld [vmem:[%s3611_s29 + $0x198] sm:$0xff] }
 0x650   : > { %v2805_v4 = vpack.c.bf16 %v2058_v45, %v2054_v41  ;;  %v1955_v21 = vpop.permute.xlu1 %1954  ;;  %2788 = vmatprep.subr.bf16.mxu0 %v2787_v34  ;;  %v2803_v30 = vpack.c.bf16 %v2059_v13, %v2055_v54 }
 0x651   : > { %2790 = vmatpush1.bf16.msra.mxu0 %v2789_v52  ;;  %v1962_v15 = vsel %vm398_vm6, %v1953_v38, %v1955_v21 }
 0x652   : > { %2804 = vmatprep.subr.bf16.mxu1 %v2803_v30  ;;  %v1957_v3 = vpop.permute.xlu0 %1956  ;;  %v2060_v25 = vmul.f32 %v4402_v50, %v1962_v15 }
 0x653   : > { %2806 = vmatpush1.bf16.msra.mxu1 %v2805_v4  ;;  %v1961_v5 = vsel %vm398_vm6, %v1955_v21, %v1957_v3  ;;  %v2638_v4 = vld [vmem:[%s3611_s29 + $0x1a8] sm:$0xff] }
 0x654   : > { %v1959_v49 = vpop.permute.xlu1 %1958  ;;  %v2061_v63 = vmul.f32 %v4396_v27, %v1961_v5 }
 0x655   : > { %v1960_v58 = vsel %vm398_vm6, %v1957_v3, %v1959_v49  ;;  %v1963_v26 = vsel %vm398_vm6, %v1959_v49, %v1953_v38  ;;  %v2637_v38 = vld [vmem:[%s3611_s29 + $0x1a0] sm:$0xff]  ;;  %v2639_v49 = vld [vmem:[%s3611_s29 + $0x1b0] sm:$0xff] }
 0x656   : > { %v1969_v59 = vpop.permute.xlu0 %1968  ;;  %v2062_v56 = vmul.f32 %v4405_v7, %v1960_v58 }
 0x658   : > { %v1971_v2 = vpop.permute.xlu1 %1970 }
 0x659   : > { %v1978_v16 = vsel %vm415_vm5, %v1969_v59, %v1971_v2 }
 0x65a   : > { %v1973_v61 = vpop.permute.xlu0 %1972  ;;  %v2064_v24 = vmul.f32 %v4391_v32, %v1978_v16  ;;  %v2063_v32 = vmul.f32 %v4412_v14, %v1963_v26  ;;  %v2640_v16 = vld [vmem:[%s3611_s29 + $0x1b8] sm:$0xff] }
 0x65b   : > { %v1977_v46 = vsel %vm415_vm5, %v1971_v2, %v1973_v61 }
 0x65c   : > { %v2065_v55 = vmul.f32 %v4399_v40, %v1977_v46  ;;  %v1975_v47 = vpop.permute.xlu1 %1974  ;;  %v2793_v40 = vpack.c.bf16 %v2064_v24, %v2060_v25 }
 0x65d   : > { %v1976_v29 = vsel %vm415_vm5, %v1973_v61, %v1975_v47  ;;  %v1979_v1 = vsel %vm415_vm5, %v1975_v47, %v1969_v59  ;;  %v2641_v47 = vld [vmem:[%s3611_s29 + $0x1c0] sm:$0xff] }
 0x65e   : > { %v2066_v23 = vmul.f32 %v4415_v28, %v1976_v29  ;;  %v2067_v6 = vmul.f32 %v4418_v10, %v1979_v1  ;;  %v1985_v27 = vpop.permute.xlu0 %1984  ;;  %v2791_v62 = vpack.c.bf16 %v2065_v55, %v2061_v63  ;;  %v2642_v29 = vld [vmem:[%s3611_s29 + $0x1c8] sm:$0xff] }
 0x660   : > { %v2809_v20 = vpack.c.bf16 %v2066_v23, %v2062_v56  ;;  %v1987_v43 = vpop.permute.xlu1 %1986  ;;  %2792 = vmatprep.subr.bf16.mxu0 %v2791_v62  ;;  %v2807_v50 = vpack.c.bf16 %v2067_v6, %v2063_v32  ;;  %v2643_v23 = vld [vmem:[%s3611_s29 + $0x1d0] sm:$0xff] }
 0x661   : > { %2794 = vmatpush1.bf16.msra.mxu0 %v2793_v40  ;;  %v1994_v7 = vsel %vm432_vm7, %v1985_v27, %v1987_v43 }
 0x662   : > { %2808 = vmatprep.subr.bf16.mxu1 %v2807_v50  ;;  %v1989_v60 = vpop.permute.xlu0 %1988  ;;  %v2068_v11 = vmul.f32 %v4428_v18, %v1994_v7  ;;  %v4848_v18 = vld [vmem:[#allocation19_spill] sm:$0xff] }
 0x663   : > { %v1993_v14 = vsel %vm432_vm7, %v1987_v43, %v1989_v60  ;;  %2810 = vmatpush1.bf16.msra.mxu1 %v2809_v20  ;;  %v2644_v43 = vld [vmem:[%s3611_s29 + $0x1d8] sm:$0xff] }
 0x664   : > { %v2069_v28 = vmul.f32 %v4425_v22, %v1993_v14  ;;  %v1991_v10 = vpop.permute.xlu1 %1990  ;;  %v4846_v22 = vmov 0.0  }
 0x665   : > { %v1992_v53 = vsel %vm432_vm7, %v1989_v60, %v1991_v10  ;;  %v1995_v12 = vsel %vm432_vm7, %v1991_v10, %v1985_v27  ;;  %v2645_v27 = vld [vmem:[%s3611_s29 + $0x1e0] sm:$0xff] }
 0x666   : > { %v2070_v31 = vmul.f32 %v4435_v37, %v1992_v53  ;;  %v2071_v57 = vmul.f32 %v4844_v44, %v1995_v12  ;;  %2105 = vmatprep.subr.mxu0 %v2069_v28  ;;  %v4849_v37 = vld [vmem:[#allocation20_spill] sm:$0xff] }
 0x667   : > { %2106 = vmatpush1.msra.mxu0 %v2068_v11 }
 0x668   : > { %2194 = vmatprep.subr.mxu1 %v2071_v57  ;;  %2649 = vmatmul.mubr.msk.f32.vlgmr.msra.gmra.mrb[24].mxu0 %vm529_vm8, %v4845_v36 }
 0x669   : > { %2195 = vmatpush1.msra.mxu1 %v2070_v31  ;;  %2159 = vmatprep.mubr.f32.mxu0 %v4846_v22 }
 0x66a   : > { %2653 = vmatmul.mubr.msk.f32.vlgmr.msra.gmra.mrb[24].mxu1 %vm529_vm8, %v4845_v36 }
 0x66b   : > { %2248 = vmatprep.mubr.f32.mxu1 %v4846_v22 }
 0x66c   : > { %2650 = vmatmul.mubr.msk.f32.gmra.mrb[26].mxu0 %vm529_vm8, %v4847_v9 }
 0x66d   : > { %2165 = vmatprep.mubr.f32.mxu0 %v4846_v22 }
 0x66e   : > { %2654 = vmatmul.mubr.msk.f32.gmra.mrb[26].mxu1 %vm529_vm8, %v4847_v9 }
 0x66f   : > { %2254 = vmatprep.mubr.f32.mxu1 %v4846_v22 }
 0x670   : > { %2651 = vmatmul.mubr.msk.f32.gmra.mrb[28].mxu0 %vm529_vm8, %v4848_v18 }
 0x671   : > { %2171 = vmatprep.mubr.f32.mxu0 %v4846_v22 }
 0x672   : > { %2655 = vmatmul.mubr.msk.f32.gmra.mrb[28].mxu1 %vm529_vm8, %v4848_v18 }
 0x673   : > { %2260 = vmatprep.mubr.f32.mxu1 %v4846_v22 }
 0x674   : > { %2652 = vmatmul.mubr.msk.f32.gmra.mrb[30].mxu0 %vm529_vm8, %v4849_v37 }
 0x676   : > { %2656 = vmatmul.mubr.msk.f32.gmra.mrb[30].mxu1 %vm529_vm8, %v4849_v37 }
 0x73b   : > { %v2155_v33 = vpop.f32.mrb[24].mxu0 }
 0x73c   : > { %v2267_v41 = vadd.f32 %v2633_v39, %v2155_v33  ;;  %v2157_v42 = vpop.f32.mrb[25].mxu0 }
 0x73d   : > { %v2244_v45 = vpop.f32.mrb[24].mxu1  ;;  %v2268_v13 = vadd.f32 %v2634_v19, %v2157_v42 }
 0x73e   : > { %v2657_v34 = vmul.f32 -1.442695, %v2267_v41  ;;  %v2269_v54 = vadd.f32 %v2635_v48, %v2244_v45  ;;  %v2246_v52 = vpop.f32.mrb[25].mxu1 }
 0x73f   : > { %v2658_v21 = vmul.f32 -1.442695, %v2268_v13  ;;  %v2270_v30 = vadd.f32 %v2636_v8, %v2246_v52  ;;  %v2161_v3 = vpop.f32.mrb[26].mxu0  ;;  %v2647_v13 = vld [vmem:[%s3611_s29 + $0x1f0] sm:$0xff]  ;;  %v2648_v52 = vld [vmem:[%s3611_s29 + $0x1f8] sm:$0xff] }
 0x740   : > { %3102 = vpow2.f32 %v2657_v34  ;;  %v2659_v59 = vmul.f32 -1.442695, %v2269_v54  ;;  %v2271_v2 = vadd.f32 %v2637_v38, %v2161_v3  ;;  %v2163_v5 = vpop.f32.mrb[27].mxu0  ;;  %v2646_v34 = vld [vmem:[%s3611_s29 + $0x1e8] sm:$0xff]  ;;  %s3292_s29 = scalar_lea.vmem %s4739_s5, 2048 }
 0x741   : > { %3104 = vpow2.f32 %v2658_v21  ;;  %v2660_v15 = vmul.f32 -1.442695, %v2270_v30  ;;  %v2272_v58 = vadd.f32 %v2638_v4, %v2163_v5  ;;  %v2250_v61 = vpop.f32.mrb[26].mxu1  ;;  %p3293_p1 = scmp.ne.s32.totalorder %s4739_s5, %s3292_s29  ;;  %p3300_p0 = scmp.lt.s32.totalorder %s3298_s21, %s3292_s29 }
 0x742   : > { %3106 = vpow2.f32 %v2659_v59  ;;  %v2661_v26 = vmul.f32 -1.442695, %v2271_v2  ;;  %v2273_v24 = vadd.f32 %v2639_v49, %v2250_v61  ;;  %v2252_v46 = vpop.f32.mrb[27].mxu1 }
 0x743   : > { %3108 = vpow2.f32 %v2660_v15  ;;  %v2662_v63 = vmul.f32 -1.442695, %v2272_v58  ;;  %v2274_v55 = vadd.f32 %v2640_v16, %v2252_v46  ;;  %v2167_v25 = vpop.f32.mrb[28].mxu0  ;;  %p3294_p5 = pnand %p3293_p1, %p4850_p9  ;;  %p3301_p2 = por %p3300_p0, %p3299_p10 }
 0x744   : > { %3110 = vpow2.f32 %v2661_v26  ;;  %v2663_v56 = vmul.f32 -1.442695, %v2273_v24  ;;  %v2169_v1 = vpop.f32.mrb[29].mxu0  ;;  %v2275_v62 = vadd.f32 %v2641_v47, %v2167_v25 }
 0x745   : > { %3112 = vpow2.f32 %v2662_v63  ;;  %v2664_v32 = vmul.f32 -1.442695, %v2274_v55  ;;  %v2256_v6 = vpop.f32.mrb[28].mxu1  ;;  %v2276_v20 = vadd.f32 %v2642_v29, %v2169_v1  ;;  %p3295_p3 = pneg %p3294_p5 }
 0x746   : > { %3114 = vpow2.f32 %v2663_v56  ;;  %v2258_v40 = vpop.f32.mrb[29].mxu1  ;;  %v2277_v7 = vadd.f32 %v2643_v23, %v2256_v6  ;;  %v2665_v11 = vmul.f32 -1.442695, %v2275_v62 }
 0x747   : > { %3116 = vpow2.f32 %v2664_v32  ;;  %v2173_v50 = vpop.f32.mrb[30].mxu0  ;;  %v2278_v53 = vadd.f32 %v2644_v43, %v2258_v40  ;;  %v2666_v57 = vmul.f32 -1.442695, %v2276_v20  ;;  %p3302_p8 = pnand %p3301_p2, %p3295_p3 }
 0x748   : > { %v2279_v60 = vadd.f32 %v2645_v27, %v2173_v50  ;;  %v2175_v14 = vpop.f32.mrb[31].mxu0  ;;  %v2667_v22 = vmul.f32 -1.442695, %v2277_v7 }
 0x749   : > { %v2262_v28 = vpop.f32.mrb[30].mxu1  ;;  %v2668_v37 = vmul.f32 -1.442695, %v2278_v53  ;;  %v2280_v30 = vadd.f32 %v2646_v34, %v2175_v14 }
 0x74a   : > { %v3103_v10 = vpop.eup %3102  ;;  %v2264_v12 = vpop.f32.mrb[31].mxu1  ;;  %3118 = vtanh.f32 %v2279_v60  ;;  %v2281_v4 = vadd.f32 %v2647_v13, %v2262_v28 }
 0x74b   : > { %v3105_v31 = vpop.eup %3104  ;;  %v2319_v44 = vadd.f32 1.0, %v3103_v10  ;;  %v2282_v49 = vadd.f32 %v2648_v52, %v2264_v12 }
 0x74c   : > { %v3107_v36 = vpop.eup %3106  ;;  %v2320_v19 = vadd.f32 1.0, %v3105_v31 }
 0x74d   : > { %v3109_v9 = vpop.eup %3108  ;;  %3120 = vrcp.f32 %v2319_v44  ;;  %v2321_v41 = vadd.f32 1.0, %v3107_v36 }
 0x74e   : > { %v3111_v18 = vpop.eup %3110  ;;  %3122 = vpow2.f32 %v2665_v11  ;;  %v2322_v54 = vadd.f32 1.0, %v3109_v9 }
 0x74f   : > { %v3113_v39 = vpop.eup %3112  ;;  %v2323_v33 = vadd.f32 1.0, %v3111_v18  ;;  %3124 = vpow2.f32 %v2666_v57 }
 0x750   : > { %v3115_v48 = vpop.eup %3114  ;;  %3126 = vpow2.f32 %v2667_v22  ;;  %v2324_v45 = vadd.f32 1.0, %v3113_v39 }
 0x751   : > { %v3117_v42 = vpop.eup %3116  ;;  %3128 = vrcp.f32 %v2323_v33  ;;  %v2325_v8 = vadd.f32 1.0, %v3115_v48 }
 0x752   : > { %3130 = vpow2.f32 %v2668_v37  ;;  %v2326_v38 = vadd.f32 1.0, %v3117_v42 }
 0x753   : > { %3132 = vrcp.f32 %v2320_v19 }
 0x754   : > { %3134 = vrcp.f32 %v2321_v41  ;;  %v3119_v21 = vpop.eup %3118 }
 0x755   : > { %3136 = vrcp.f32 %v2325_v8 }
 0x756   : > { %3138 = vrcp.f32 %v2324_v45 }
 0x757   : > { %v3121_v3 = vpop.eup %3120  ;;  %3140 = vrcp.f32 %v2326_v38 }
 0x758   : > { %v3123_v59 = vpop.eup %3122  ;;  %3142 = vrcp.f32 %v2322_v54  ;;  %v2363_v2 = vmul.f32 %v3121_v3, %v3119_v21 }
 0x759   : > { %v3125_v5 = vpop.eup %3124  ;;  %3144 = vtanh.f32 %v2281_v4  ;;  %v2327_v58 = vadd.f32 1.0, %v3123_v59 }
 0x75a   : > { %v3127_v16 = vpop.eup %3126  ;;  %3146 = vtanh.f32 %v2280_v30  ;;  %v2328_v56 = vadd.f32 1.0, %v3125_v5 }
 0x75b   : > { %v3129_v15 = vpop.eup %3128  ;;  %3148 = vtanh.f32 %v2282_v49  ;;  %v2329_v32 = vadd.f32 1.0, %v3127_v16 }
 0x75c   : > { %v3131_v61 = vpop.eup %3130  ;;  %v2359_v26 = vmul.f32 %v3129_v15, %v4491_v0  ;;  %3150 = vrcp.f32 %v2327_v58 }
 0x75d   : > { %v3133_v24 = vpop.eup %3132  ;;  %v2330_v27 = vadd.f32 1.0, %v3131_v61 }
 0x75e   : > { %v3135_v46 = vpop.eup %3134  ;;  %v2367_v63 = vadd.f32 %v2363_v2, %v2359_v26 }
 0x75f   : > { %v3137_v55 = vpop.eup %3136 }
 0x760   : > { %v3139_v47 = vpop.eup %3138  ;;  %3152 = vtanh.f32 %v2367_v63  ;;  %2388 = vst [vmem:[#allocation3] sm:$0xff] %v2367_v63  ;;  %v2361_v1 = vmul.f32 %v3137_v55, %v4499_v35 }
 0x761   : > { %v3141_v25 = vpop.eup %3140  ;;  %v2360_v6 = vmul.f32 %v3139_v47, %v4493_v51  ;;  %3154 = vrcp.f32 %v2328_v56 }
 0x762   : > { %v3143_v29 = vpop.eup %3142  ;;  %v2362_v0 = vmul.f32 %v3141_v25, %v4502_v17  ;;  %3156 = vrcp.f32 %v2329_v32 }
 0x763   : > { %v3145_v23 = vpop.eup %3144  ;;  %3158 = vrcp.f32 %v2330_v27 }
 0x764   : > { %v3147_v62 = vpop.eup %3146  ;;  %v2365_v40 = vmul.f32 %v3145_v23, %v3135_v46 }
 0x765   : > { %v3149_v20 = vpop.eup %3148  ;;  %v2364_v43 = vmul.f32 %v3147_v62, %v3133_v24 }
 0x766   : > { %v2369_v50 = vadd.f32 %v2365_v40, %v2361_v1  ;;  %v2366_v7 = vmul.f32 %v3149_v20, %v3143_v29  ;;  %v3151_v51 = vpop.eup %3150 }
 0x767   : > { %v2368_v60 = vadd.f32 %v2364_v43, %v2360_v6 }
 0x768   : > { %3160 = vtanh.f32 %v2369_v50  ;;  %2390 = vst [vmem:[#allocation3 + $0x10] sm:$0xff] %v2369_v50  ;;  %v2370_v35 = vadd.f32 %v2366_v7, %v2362_v0 }
 0x769   : > { %3162 = vtanh.f32 %v2368_v60  ;;  %2389 = vst [vmem:[#allocation3 + $0x8] sm:$0xff] %v2368_v60 }
 0x76a   : > { %v3153_v14 = vpop.eup %3152  ;;  %3164 = vtanh.f32 %v2370_v35  ;;  %2391 = vst [vmem:[#allocation3 + $0x18] sm:$0xff] %v2370_v35 }
 0x76b   : > { %v2375_v17 = vmul.f32 %v3153_v14, %v3151_v51  ;;  %v3155_v28 = vpop.eup %3154 }
 0x76c   : > { %v3157_v10 = vpop.eup %3156 }
 0x76d   : > { %2669 = vst [vmem:[%s3622_s10 + $0x60] sm:$0xff] %v2375_v17  ;;  %2384 = vst [vmem:[#allocation2] sm:$0xff] %v2375_v17  ;;  %v3159_v11 = vpop.eup %3158 }
 0x772   : > { %v3161_v53 = vpop.eup %3160 }
 0x773   : > { %v3163_v12 = vpop.eup %3162  ;;  %v2377_v31 = vmul.f32 %v3161_v53, %v3157_v10 }
 0x774   : > { %v3165_v44 = vpop.eup %3164  ;;  %v2376_v57 = vmul.f32 %v3163_v12, %v3155_v28 }
 0x775   : > { %2671 = vst [vmem:[%s3622_s10 + $0x70] sm:$0xff] %v2377_v31  ;;  %2386 = vst [vmem:[#allocation2 + $0x10] sm:$0xff] %v2377_v31  ;;  %v2378_v36 = vmul.f32 %v3165_v44, %v3159_v11 }
 0x776   : > { %2670 = vst [vmem:[%s3622_s10 + $0x68] sm:$0xff] %v2376_v57  ;;  %2385 = vst [vmem:[#allocation2 + $0x8] sm:$0xff] %v2376_v57 }
 0x777   : > { %2672 = vst [vmem:[%s3622_s10 + $0x78] sm:$0xff] %v2378_v36  ;;  %2387 = vst [vmem:[#allocation2 + $0x18] sm:$0xff] %v2378_v36 }
 0x778   : > { %3305 = shalt.err (!%p3302_p8)
}
 0x779   : > { %s3306_s10 = scalar_lea.hbm %s4737_s27, 2048  ;;  %s3310_s19 = scalar_lea.hbm %s4794_s3, 4096 }
 0x77a   : > { %p3307_p12 = scmp.ne.s32.totalorder %s4737_s27, %s3306_s10  ;;  %p3311_p11 = scmp.lt.u32.totalorder %s4737_s27, %s4794_s3 }
 0x77b   : > { %p3312_p13 = scmp.lt.u32.totalorder %s3310_s19, %s3306_s10  ;;  %p3314_p1 = scmp.lt.u32.totalorder %s3306_s10, %s4737_s27 }
 0x77c   : > { %p3308_p7 = pnand %p3307_p12, %p4850_p9 }
 0x77d   : > { %p3313_p4 = por %p3312_p13, %p3311_p11 }
 0x77e   : > { %p3309_p6 = pneg %p3308_p7 }
 0x77f   : > { %p3315_p5 = por %p3314_p1, %p3313_p4 }
 0x781   : > { %p3316_p3 = pnand %p3315_p5, %p3309_p6 }
 0x783   : > { %3319 = shalt.err (!%p3316_p3)
}
 0x784   : > { %s3402_s26 = smov 512   ;;  %s3403_s6 = smov 32  }
 0x785   : > { %2821 = dma.vmem_to_hbm [thread:$0]  (%p4850_p9), %s4739_s5, 2048, %s4737_s27, %s2393_s15, %s3402_s26, %s3402_s26, %s3403_s6  }
 0x786 PF: > { %s2424_s28 = sand.u32 1, %s3362_s12   ;;  %p4851_p10 = scmp.ne.s32.totalorder %s4820_s23, 0 }
 0x787   : > { %p4852_p0 = scmp.ge.s32.totalorder %s3382_s17, 2  ;;  %s2425_s8 = scalar_lea.sflag [#allocation7], %s2424_s28 }
 0x789   : > { %p2835_p2 = pnand %p4852_p0, %p4851_p10 }
 0x78b   : > { %3357 = dma.done.wait (!%p2835_p2), %s2425_s8, 2048  }
 0x78c   : > { %3359 = vsyncadd (!%p2835_p2), %s2425_s8, 4294965248  ;;  %s20_s17 = sadd.s32 1, %s3382_s17   ;;  %s4853_s12 = smov %s3366_s13 }
 0x78d   : > { %p17_p8 = scmp.ge.s32.totalorder %s20_s17, 4   ;;  %s4854_s13 = smov %s3370_s14 }
 0x78e   : > { %s4855_s14 = smov %s3567_s20  ;;  %s4856_s15 = smov %s3378_s16 }
 0x78f   : > { %s4857_s16 = smov %s4859_s30  ;;  %19 = sbr.rel (!%p17_p8) target bundleno = 7 (0x7), region = 96 }
 0x796   :  { %2430 = vsyncpa [#allocation6], 1 }
 0x797   :  { %2432 = vsyncpa [#allocation6 + $0x1], 1 }
 0x798   :  { %2433 = vsyncpa [#allocation9], 1 }
 0x799   :  { %2435 = vsyncpa [#allocation9 + $0x1], 1 }
 0x79a   :  { %2436 = vsyncpa [#allocation7], 1 }
 0x79b   :  { %2438 = vsyncpa [#allocation7 + $0x1], 1 }

</bundles_post_ra>
